<compile_context>
chip_gen: v5e
topology: v5e:2x2
jax: 0.10.0
libtpu: 0.0.40
codegen_flags: <defaults>
</compile_context>

<pallas_src>
import math
import jax
import jax.numpy as jnp
from jax.experimental import pallas as pl
from jax.experimental.pallas import tpu as pltpu

# ---------------- small synthetic ViT config ----------------
B        = 2
C        = 3
IMG      = 16
PATCH    = 4
NP_SIDE  = IMG // PATCH
N_PATCH  = NP_SIDE * NP_SIDE          # 16 patches
SEQ      = N_PATCH + 1                # 17 tokens (CLS + patches)
SEQ_PAD  = 32                         # padded to a multiple of 16 sublanes (bf16 pack)
TOT      = B * SEQ_PAD                # 64 rows in the fused token slab
HIDDEN   = 32
HEADS    = 2
HEAD_DIM = HIDDEN // HEADS            # 16
INTER    = 4 * HIDDEN                 # 128
LAYERS   = 2
CLASSES  = 10
EPS      = 1e-12                      # HF ViT layer_norm_eps
CPP      = C * PATCH * PATCH          # 48
NEG_INF  = -1e30
NVEC     = 7                          # packed per-layer vectors: ln1_g, ln1_b, bo, ln2_g, ln2_b, b1, b2


def _layernorm_1pass(v, g, b):
    """Fused single-pass LayerNorm (kept in f32)."""
    inv_n = 1.0 / v.shape[-1]
    mu = jnp.sum(v, axis=-1, keepdims=True) * inv_n
    ms = jnp.sum(v * v, axis=-1, keepdims=True) * inv_n
    var = jnp.maximum(ms - mu * mu, 0.0)
    return (v - mu) * jax.lax.rsqrt(var + EPS) * g + b


def _layernorm_ref(v, g, b):
    mu = jnp.mean(v, axis=-1, keepdims=True)
    var = jnp.mean(jnp.square(v - mu), axis=-1, keepdims=True)
    return (v - mu) * jax.lax.rsqrt(var + EPS) * g + b


# ---------------- single fused kernel: embed + LAYERS encoder blocks + head ----------------
def fused_vit_kernel(patches_ref, pw_ref, tok_ref, wqkv_ref, bqkv_ref, wo_ref,
                     w1_ref, w2_ref, vecs_ref, wc_ref, headv_ref,
                     out_ref, x_sc):
    f32, bf16 = jnp.float32, jnp.bfloat16

    # ---- patch embedding (f32; tiny, keeps residual-stream error low) ----
    emb = jnp.dot(patches_ref[...], pw_ref[...], preferred_element_type=f32)   # (B*N_PATCH, H)

    # ---- assemble padded token slab via direct slice stores (no concatenation) ----
    x_sc[...] = jnp.zeros_like(x_sc)                 # pad rows zero for first LayerNorm
    cls_row   = tok_ref[0:1, :]                      # cls + pos[0] (prefolded)
    pos_patch = tok_ref[1:SEQ, :]                    # pos[1:] + patch_b (prefolded)
    for b in range(B):                               # static unroll, B=2
        base = b * SEQ_PAD
        x_sc[base:base + 1, :]       = cls_row
        x_sc[base + 1:base + SEQ, :] = emb[b * N_PATCH:(b + 1) * N_PATCH, :] + pos_patch
    x = x_sc[...]                                    # (TOT, H) f32

    # ---- in-kernel per-batch key mask (valid keys: col < SEQ) ----
    col  = jax.lax.broadcasted_iota(jnp.int32, (SEQ_PAD, SEQ_PAD), 1)
    mask = jnp.where(col < SEQ, 0.0, NEG_INF).astype(f32)

    # ---- encoder layers (statically unrolled; all weights VMEM resident) ----
    for l in range(LAYERS):
        ln1_g = vecs_ref[l, 0:1, :HIDDEN]
        ln1_b = vecs_ref[l, 1:2, :HIDDEN]
        bo    = vecs_ref[l, 2:3, :HIDDEN]
        ln2_g = vecs_ref[l, 3:4, :HIDDEN]
        ln2_b = vecs_ref[l, 4:5, :HIDDEN]
        b1    = vecs_ref[l, 5:6, :]                  # (1, INTER)
        b2    = vecs_ref[l, 6:7, :HIDDEN]

        # --- self attention (per batch, per head; no cross-batch masked waste) ---
        xn  = _layernorm_1pass(x, ln1_g, ln1_b)
        xnb = xn.astype(bf16)
        for b in range(B):
            base = b * SEQ_PAD
            xb = xnb[base:base + SEQ_PAD, :]                              # (SEQ_PAD, H) bf16
            out_b = jnp.zeros((SEQ_PAD, HIDDEN), f32)
            for h in range(HEADS):
                iq = (l * 3 + 0) * HEADS + h
                ik = (l * 3 + 1) * HEADS + h
                iv = (l * 3 + 2) * HEADS + h
                qh = jnp.dot(xb, wqkv_ref[iq], preferred_element_type=f32) + bqkv_ref[iq:iq + 1, :]
                kh = jnp.dot(xb, wqkv_ref[ik], preferred_element_type=f32) + bqkv_ref[ik:ik + 1, :]
                vh = jnp.dot(xb, wqkv_ref[iv], preferred_element_type=f32) + bqkv_ref[iv:iv + 1, :]

                s = jax.lax.dot_general(qh.astype(bf16), kh.astype(bf16),
                                        (((1,), (1,)), ((), ())),
                                        preferred_element_type=f32) + mask   # (SEQ_PAD, SEQ_PAD)
                s = s - jnp.max(s, axis=-1, keepdims=True)
                p = jnp.exp(s)
                inv = pl.reciprocal(jnp.sum(p, axis=-1, keepdims=True), approx=True)
                attn = (p * inv).astype(bf16)
                ctx = jnp.dot(attn, vh.astype(bf16), preferred_element_type=f32)  # (SEQ_PAD, Hd)
                out_b = out_b + jnp.dot(ctx.astype(bf16), wo_ref[l * HEADS + h],
                                        preferred_element_type=f32)              # (SEQ_PAD, H)
            x_sc[base:base + SEQ_PAD, :] = out_b
        x = x + x_sc[...] + bo

        # --- MLP ---
        xn2 = _layernorm_1pass(x, ln2_g, ln2_b)
        h1 = jnp.dot(xn2.astype(bf16), w1_ref[l], preferred_element_type=f32) + b1
        # TODO(synk): HF ViT uses exact erf-GELU; tanh-approx GELU used for robust Mosaic lowering.
        h1 = jax.nn.gelu(h1, approximate=True)
        x = x + jnp.dot(h1.astype(bf16), w2_ref[l], preferred_element_type=f32) + b2

    # ---- head: gather CLS rows, one LayerNorm, one matmul, one store ----
    cls_rows = jnp.concatenate([x[b * SEQ_PAD:b * SEQ_PAD + 1, :] for b in range(B)], axis=0)  # (B, H)
    lnf_g = headv_ref[0:1, :HIDDEN]
    lnf_b = headv_ref[1:2, :HIDDEN]
    bc    = headv_ref[2:3, :CLASSES]
    cln = _layernorm_1pass(cls_rows, lnf_g, lnf_b)
    out_ref[...] = jnp.dot(cln, wc_ref[...], preferred_element_type=f32) + bc


# ---------------- glue: NCHW -> patch-major ----------------
def extract_patches(x):
    # x: (B, C, IMG, IMG). Matches Conv2d(kernel=patch, stride=patch) with weight flattened (C, p, p).
    xp = x.reshape(B, C, NP_SIDE, PATCH, NP_SIDE, PATCH)
    xp = xp.transpose(0, 2, 4, 1, 3, 5)                 # (B, np, np, C, p, p)
    return xp.reshape(B, N_PATCH, CPP)


@jax.jit
def vit_forward(x_nchw, kp):
    patches = extract_patches(x_nchw).reshape(B * N_PATCH, CPP)
    # Grid-less pallas_call: every operand is a whole-array VMEM-resident block, so the entire
    # forward pass (embed + all layers + head) runs in a single kernel with no HBM round-trips.
    return pl.pallas_call(
        fused_vit_kernel,
        out_shape=jax.ShapeDtypeStruct((B, CLASSES), jnp.float32),
        scratch_shapes=[pltpu.VMEM((TOT, HIDDEN), jnp.float32)],
    )(patches, kp["patch_w"], kp["tokadd"], kp["wqkv"], kp["bqkv"], kp["wo"],
      kp["w1"], kp["w2"], kp["vecs"], kp["wc"], kp["headv"])


# ---------------- one-time parameter preparation ----------------
def _pad128(v):
    return jnp.pad(v, ((0, 0), (0, 128 - v.shape[-1])))


def prepare_params(p):
    scale = 1.0 / math.sqrt(HEAD_DIM)
    layers = p["layers"]

    # per-head q/k/v weights & biases, scale folded into Wq/bq
    wqkv_list, bqkv_list = [], []
    for lp in layers:
        for w, bvec, s in ((lp["wq"], lp["bq"], scale),
                           (lp["wk"], lp["bk"], 1.0),
                           (lp["wv"], lp["bv"], 1.0)):
            for h in range(HEADS):
                lo = h * HEAD_DIM
                wqkv_list.append(w[:, lo:lo + HEAD_DIM] * s)
                bqkv_list.append(bvec[0, lo:lo + HEAD_DIM] * s)
    wqkv = jnp.stack(wqkv_list).astype(jnp.bfloat16)          # (L*3*HEADS, H, Hd)
    bqkv = jnp.stack(bqkv_list).astype(jnp.float32)           # (L*3*HEADS, Hd)

    wo = jnp.stack([lp["wo"][h * HEAD_DIM:(h + 1) * HEAD_DIM, :]
                    for lp in layers for h in range(HEADS)]).astype(jnp.bfloat16)  # (L*HEADS, Hd, H)
    w1 = jnp.stack([lp["w1"] for lp in layers]).astype(jnp.bfloat16)               # (L, H, INTER)
    w2 = jnp.stack([lp["w2"] for lp in layers]).astype(jnp.bfloat16)               # (L, INTER, H)

    # pack all per-layer 1-row vectors into (L, NVEC, 128)
    vecs = jnp.stack([
        jnp.concatenate([_pad128(lp["ln1_g"]), _pad128(lp["ln1_b"]), _pad128(lp["bo"]),
                         _pad128(lp["ln2_g"]), _pad128(lp["ln2_b"]),
                         _pad128(lp["b1"]), _pad128(lp["b2"])], axis=0)
        for lp in layers]).astype(jnp.float32)                                     # (L, 7, 128)

    # fold cls + pos[0] and patch_b + pos[1:] into one token-add table
    tokadd = jnp.concatenate([p["cls"] + p["pos"][0:1, :],
                              p["pos"][1:, :] + p["patch_b"]], axis=0)             # (SEQ, H)

    headv = jnp.concatenate([_pad128(p["lnf_g"]), _pad128(p["lnf_b"]),
                             _pad128(p["bc"])], axis=0).astype(jnp.float32)        # (3, 128)

    return {
        "patch_w": p["patch_w"], "tokadd": tokadd,
        "wqkv": wqkv, "bqkv": bqkv, "wo": wo, "w1": w1, "w2": w2,
        "vecs": vecs, "wc": p["wc"], "headv": headv,
    }


# ---------------- pure-JAX reference (same math, unfused, f32) ----------------
def vit_reference(x_nchw, params):
    patches = extract_patches(x_nchw)
    emb = patches @ params["patch_w"] + params["patch_b"]
    cls = jnp.broadcast_to(params["cls"][None], (B, 1, HIDDEN))
    h = jnp.concatenate([cls, emb], axis=1) + params["pos"][None]
    for lp in params["layers"]:
        xn = _layernorm_ref(h, lp["ln1_g"], lp["ln1_b"])
        q = xn @ lp["wq"] + lp["bq"]
        k = xn @ lp["wk"] + lp["bk"]
        v = xn @ lp["wv"] + lp["bv"]
        qh = q.reshape(B, SEQ, HEADS, HEAD_DIM).transpose(0, 2, 1, 3)
        kh = k.reshape(B, SEQ, HEADS, HEAD_DIM).transpose(0, 2, 1, 3)
        vh = v.reshape(B, SEQ, HEADS, HEAD_DIM).transpose(0, 2, 1, 3)
        s = jnp.einsum("bhqd,bhkd->bhqk", qh, kh) / math.sqrt(HEAD_DIM)
        a = jax.nn.softmax(s, axis=-1)
        ctx = jnp.einsum("bhqk,bhkd->bhqd", a, vh).transpose(0, 2, 1, 3).reshape(B, SEQ, HIDDEN)
        h = h + (ctx @ lp["wo"] + lp["bo"])
        xn2 = _layernorm_ref(h, lp["ln2_g"], lp["ln2_b"])
        m = jax.nn.gelu(xn2 @ lp["w1"] + lp["b1"], approximate=True)
        h = h + (m @ lp["w2"] + lp["b2"])
    hn = _layernorm_ref(h, params["lnf_g"], params["lnf_b"])
    return hn[:, 0] @ params["wc"] + params["bc"]


# ---------------- deterministic parameter init ----------------
def init_params(key):
    std = 0.02
    ks = iter(jax.random.split(key, 8 + LAYERS * 10))
    p = {
        "patch_w": std * jax.random.normal(next(ks), (CPP, HIDDEN), jnp.float32),
        "patch_b": std * jax.random.normal(next(ks), (1, HIDDEN), jnp.float32),
        "cls":     std * jax.random.normal(next(ks), (1, HIDDEN), jnp.float32),
        "pos":     std * jax.random.normal(next(ks), (SEQ, HIDDEN), jnp.float32),
        "lnf_g":   jnp.ones((1, HIDDEN), jnp.float32),
        "lnf_b":   jnp.zeros((1, HIDDEN), jnp.float32),
        "wc":      std * jax.random.normal(next(ks), (HIDDEN, CLASSES), jnp.float32),
        "bc":      jnp.zeros((1, CLASSES), jnp.float32),
        "layers":  [],
    }
    for _ in range(LAYERS):
        lp = {
            "ln1_g": jnp.ones((1, HIDDEN), jnp.float32),
            "ln1_b": jnp.zeros((1, HIDDEN), jnp.float32),
            "wq": std * jax.random.normal(next(ks), (HIDDEN, HIDDEN), jnp.float32),
            "bq": jnp.zeros((1, HIDDEN), jnp.float32),
            "wk": std * jax.random.normal(next(ks), (HIDDEN, HIDDEN), jnp.float32),
            "bk": jnp.zeros((1, HIDDEN), jnp.float32),
            "wv": std * jax.random.normal(next(ks), (HIDDEN, HIDDEN), jnp.float32),
            "bv": jnp.zeros((1, HIDDEN), jnp.float32),
            "wo": std * jax.random.normal(next(ks), (HIDDEN, HIDDEN), jnp.float32),
            "bo": jnp.zeros((1, HIDDEN), jnp.float32),
            "ln2_g": jnp.ones((1, HIDDEN), jnp.float32),
            "ln2_b": jnp.zeros((1, HIDDEN), jnp.float32),
            "w1": std * jax.random.normal(next(ks), (HIDDEN, INTER), jnp.float32),
            "b1": jnp.zeros((1, INTER), jnp.float32),
            "w2": std * jax.random.normal(next(ks), (INTER, HIDDEN), jnp.float32),
            "b2": jnp.zeros((1, HIDDEN), jnp.float32),
        }
        p["layers"].append(lp)
    return p


if __name__ == "__main__":
    key = jax.random.PRNGKey(0)
    k_x, k_p = jax.random.split(key)
    x = jax.random.normal(k_x, (B, C, IMG, IMG), jnp.float32)   # PyTorch NCHW input
    params = init_params(k_p)
    kparams = prepare_params(params)                            # one-time stacking / folding / bf16 cast

    logits = jax.block_until_ready(vit_forward(x, kparams))
    ref    = jax.block_until_ready(vit_reference(x, params))

    assert logits.shape == (B, CLASSES)
    assert bool(jnp.all(jnp.isfinite(logits)))
    assert bool(jnp.allclose(logits, ref, atol=5e-3, rtol=5e-3))
    print("KERNEL_OK")
</pallas_src>

<mosaic_0001>
module attributes {stable_mosaic.version = 11 : i64} {
  func.func @fused_vit_kernel(%arg0: memref<32x48xf32, #tpu.memory_space<vmem>>, %arg1: memref<48x32xf32, #tpu.memory_space<vmem>>, %arg2: memref<17x32xf32, #tpu.memory_space<vmem>>, %arg3: memref<12x32x16xbf16, #tpu.memory_space<vmem>>, %arg4: memref<12x16xf32, #tpu.memory_space<vmem>>, %arg5: memref<4x16x32xbf16, #tpu.memory_space<vmem>>, %arg6: memref<2x32x128xbf16, #tpu.memory_space<vmem>>, %arg7: memref<2x128x32xbf16, #tpu.memory_space<vmem>>, %arg8: memref<2x7x128xf32, #tpu.memory_space<vmem>>, %arg9: memref<32x10xf32, #tpu.memory_space<vmem>>, %arg10: memref<3x128xf32, #tpu.memory_space<vmem>>, %arg11: memref<2x10xf32, #tpu.memory_space<vmem>>, %arg12: memref<64x32xf32, #tpu.memory_space<vmem>>) attributes {dimension_semantics = [], scalar_prefetch = 0 : i64, scratch_operands = 1 : i64, tpu.core_type = #tpu.core_type<tc>} {
    %c0 = arith.constant 0 : index
    %c0_0 = arith.constant 0 : index
    %0 = vector.load %arg0[%c0, %c0_0] : memref<32x48xf32, #tpu.memory_space<vmem>>, vector<32x48xf32>
    %c0_1 = arith.constant 0 : index
    %c0_2 = arith.constant 0 : index
    %1 = vector.load %arg1[%c0_1, %c0_2] : memref<48x32xf32, #tpu.memory_space<vmem>>, vector<48x32xf32>
    %cst = arith.constant dense<0.000000e+00> : vector<32x32xf32>
    %2 = tpu.matmul %0, %1, %cst {dimension_numbers = #tpu.dot_dimension_numbers<[1], [0], [0], [1], [0, 0, 1, 1], [], []>} : vector<32x48xf32>, vector<48x32xf32>, vector<32x32xf32> -> vector<32x32xf32>
    %cst_3 = arith.constant 0.000000e+00 : f32
    %3 = vector.broadcast %cst_3 : f32 to vector<64x32xf32>
    %c0_4 = arith.constant 0 : index
    %c0_5 = arith.constant 0 : index
    %4 = vector.load %arg12[%c0_4, %c0_5] : memref<64x32xf32, #tpu.memory_space<vmem>>, vector<64x32xf32>
    tpu.vector_store %arg12[%c0_4, %c0_5], %3 {strides = array<i32>} : memref<64x32xf32, #tpu.memory_space<vmem>>, vector<64x32xf32>,
    %c0_6 = arith.constant 0 : index
    %c0_7 = arith.constant 0 : index
    %5 = vector.load %arg2[%c0_6, %c0_7] : memref<17x32xf32, #tpu.memory_space<vmem>>, vector<1x32xf32>
    %c1 = arith.constant 1 : index
    %c0_8 = arith.constant 0 : index
    %6 = vector.load %arg2[%c1, %c0_8] : memref<17x32xf32, #tpu.memory_space<vmem>>, vector<16x32xf32>
    %c0_9 = arith.constant 0 : index
    %c0_10 = arith.constant 0 : index
    %7 = vector.load %arg12[%c0_9, %c0_10] : memref<64x32xf32, #tpu.memory_space<vmem>>, vector<1x32xf32>
    tpu.vector_store %arg12[%c0_9, %c0_10], %5 {strides = array<i32>} : memref<64x32xf32, #tpu.memory_space<vmem>>, vector<1x32xf32>,
    %8 = vector.extract_strided_slice %2 {offsets = [0, 0], sizes = [16, 32], strides = [1, 1]} : vector<32x32xf32> to vector<16x32xf32>
    %9 = arith.addf %8, %6 : vector<16x32xf32>
    %c1_11 = arith.constant 1 : index
    %c0_12 = arith.constant 0 : index
    %10 = vector.load %arg12[%c1_11, %c0_12] : memref<64x32xf32, #tpu.memory_space<vmem>>, vector<16x32xf32>
    tpu.vector_store %arg12[%c1_11, %c0_12], %9 {strides = array<i32>} : memref<64x32xf32, #tpu.memory_space<vmem>>, vector<16x32xf32>,
    %c32 = arith.constant 32 : index
    %c0_13 = arith.constant 0 : index
    %11 = vector.load %arg12[%c32, %c0_13] : memref<64x32xf32, #tpu.memory_space<vmem>>, vector<1x32xf32>
    tpu.vector_store %arg12[%c32, %c0_13], %5 {strides = array<i32>} : memref<64x32xf32, #tpu.memory_space<vmem>>, vector<1x32xf32>,
    %12 = vector.extract_strided_slice %2 {offsets = [16, 0], sizes = [16, 32], strides = [1, 1]} : vector<32x32xf32> to vector<16x32xf32>
    %13 = arith.addf %12, %6 : vector<16x32xf32>
    %c33 = arith.constant 33 : index
    %c0_14 = arith.constant 0 : index
    %14 = vector.load %arg12[%c33, %c0_14] : memref<64x32xf32, #tpu.memory_space<vmem>>, vector<16x32xf32>
    tpu.vector_store %arg12[%c33, %c0_14], %13 {strides = array<i32>} : memref<64x32xf32, #tpu.memory_space<vmem>>, vector<16x32xf32>,
    %c0_15 = arith.constant 0 : index
    %c0_16 = arith.constant 0 : index
    %15 = vector.load %arg12[%c0_15, %c0_16] : memref<64x32xf32, #tpu.memory_space<vmem>>, vector<64x32xf32>
    %16 = tpu.iota {dimensions = array<i32: 1>} : vector<32x32xi32>
    %c17_i32 = arith.constant 17 : i32
    %17 = vector.broadcast %c17_i32 : i32 to vector<32x32xi32>
    %18 = arith.cmpi slt, %16, %17 : vector<32x32xi32>
    %cst_17 = arith.constant 0.000000e+00 : f32
    %cst_18 = arith.constant -1.000000e+30 : f32
    %19 = vector.broadcast %cst_17 : f32 to vector<32x32xf32>
    %20 = vector.broadcast %cst_18 : f32 to vector<32x32xf32>
    %21 = arith.select %18, %19, %20 : vector<32x32xi1>, vector<32x32xf32>
    %c0_19 = arith.constant 0 : index
    %c0_20 = arith.constant 0 : index
    %c0_21 = arith.constant 0 : index
    %22 = vector.load %arg8[%c0_19, %c0_20, %c0_21] : memref<2x7x128xf32, #tpu.memory_space<vmem>>, vector<1x1x32xf32>
    %23 = vector.shape_cast %22 : vector<1x1x32xf32> to vector<1x32xf32>
    %c0_22 = arith.constant 0 : index
    %c1_23 = arith.constant 1 : index
    %c0_24 = arith.constant 0 : index
    %24 = vector.load %arg8[%c0_22, %c1_23, %c0_24] : memref<2x7x128xf32, #tpu.memory_space<vmem>>, vector<1x1x32xf32>
    %25 = vector.shape_cast %24 : vector<1x1x32xf32> to vector<1x32xf32>
    %c0_25 = arith.constant 0 : index
    %c2 = arith.constant 2 : index
    %c0_26 = arith.constant 0 : index
    %26 = vector.load %arg8[%c0_25, %c2, %c0_26] : memref<2x7x128xf32, #tpu.memory_space<vmem>>, vector<1x1x32xf32>
    %27 = vector.shape_cast %26 : vector<1x1x32xf32> to vector<1x32xf32>
    %c0_27 = arith.constant 0 : index
    %c3 = arith.constant 3 : index
    %c0_28 = arith.constant 0 : index
    %28 = vector.load %arg8[%c0_27, %c3, %c0_28] : memref<2x7x128xf32, #tpu.memory_space<vmem>>, vector<1x1x32xf32>
    %29 = vector.shape_cast %28 : vector<1x1x32xf32> to vector<1x32xf32>
    %c0_29 = arith.constant 0 : index
    %c4 = arith.constant 4 : index
    %c0_30 = arith.constant 0 : index
    %30 = vector.load %arg8[%c0_29, %c4, %c0_30] : memref<2x7x128xf32, #tpu.memory_space<vmem>>, vector<1x1x32xf32>
    %31 = vector.shape_cast %30 : vector<1x1x32xf32> to vector<1x32xf32>
    %c0_31 = arith.constant 0 : index
    %c5 = arith.constant 5 : index
    %c0_32 = arith.constant 0 : index
    %32 = vector.load %arg8[%c0_31, %c5, %c0_32] : memref<2x7x128xf32, #tpu.memory_space<vmem>>, vector<1x1x128xf32>
    %33 = vector.shape_cast %32 : vector<1x1x128xf32> to vector<1x128xf32>
    %c0_33 = arith.constant 0 : index
    %c6 = arith.constant 6 : index
    %c0_34 = arith.constant 0 : index
    %34 = vector.load %arg8[%c0_33, %c6, %c0_34] : memref<2x7x128xf32, #tpu.memory_space<vmem>>, vector<1x1x32xf32>
    %35 = vector.shape_cast %34 : vector<1x1x32xf32> to vector<1x32xf32>
    %cst_35 = arith.constant dense<0.000000e+00> : vector<64xf32>
    %36 = vector.multi_reduction <add>, %15, %cst_35 [1] : vector<64x32xf32> to vector<64xf32>
    %37 = vector.shape_cast %36 : vector<64xf32> to vector<64x1xf32>
    %cst_36 = arith.constant 3.125000e-02 : f32
    %38 = vector.broadcast %cst_36 : f32 to vector<64x1xf32>
    %39 = arith.mulf %37, %38 : vector<64x1xf32>
    %40 = arith.mulf %15, %15 : vector<64x32xf32>
    %cst_37 = arith.constant dense<0.000000e+00> : vector<64xf32>
    %41 = vector.multi_reduction <add>, %40, %cst_37 [1] : vector<64x32xf32> to vector<64xf32>
    %42 = vector.shape_cast %41 : vector<64xf32> to vector<64x1xf32>
    %cst_38 = arith.constant 3.125000e-02 : f32
    %43 = vector.broadcast %cst_38 : f32 to vector<64x1xf32>
    %44 = arith.mulf %42, %43 : vector<64x1xf32>
    %45 = arith.mulf %39, %39 : vector<64x1xf32>
    %46 = arith.subf %44, %45 : vector<64x1xf32>
    %cst_39 = arith.constant 0.000000e+00 : f32
    %47 = vector.broadcast %cst_39 : f32 to vector<64x1xf32>
    %48 = arith.maximumf %46, %47 : vector<64x1xf32>
    %49 = vector.broadcast %39 : vector<64x1xf32> to vector<64x32xf32>
    %50 = arith.subf %15, %49 : vector<64x32xf32>
    %cst_40 = arith.constant 9.99999996E-13 : f32
    %51 = vector.broadcast %cst_40 : f32 to vector<64x1xf32>
    %52 = arith.addf %48, %51 : vector<64x1xf32>
    %53 = math.rsqrt %52 : vector<64x1xf32>
    %54 = vector.broadcast %53 : vector<64x1xf32> to vector<64x32xf32>
    %55 = arith.mulf %50, %54 : vector<64x32xf32>
    %56 = vector.broadcast %23 : vector<1x32xf32> to vector<64x32xf32>
    %57 = arith.mulf %55, %56 : vector<64x32xf32>
    %58 = vector.broadcast %25 : vector<1x32xf32> to vector<64x32xf32>
    %59 = arith.addf %57, %58 : vector<64x32xf32>
    %60 = arith.truncf %59 : vector<64x32xf32> to vector<64x32xbf16>
    %61 = vector.extract_strided_slice %60 {offsets = [0, 0], sizes = [32, 32], strides = [1, 1]} : vector<64x32xbf16> to vector<32x32xbf16>
    %cst_41 = arith.constant 0.000000e+00 : f32
    %62 = vector.broadcast %cst_41 : f32 to vector<32x32xf32>
    %c0_42 = arith.constant 0 : index
    %c0_43 = arith.constant 0 : index
    %c0_44 = arith.constant 0 : index
    %63 = vector.load %arg3[%c0_42, %c0_43, %c0_44] : memref<12x32x16xbf16, #tpu.memory_space<vmem>>, vector<1x32x16xbf16>
    %64 = vector.shape_cast %63 : vector<1x32x16xbf16> to vector<32x16xbf16>
    %cst_45 = arith.constant dense<0.000000e+00> : vector<32x16xf32>
    %65 = tpu.matmul %61, %64, %cst_45 {dimension_numbers = #tpu.dot_dimension_numbers<[1], [0], [0], [1], [0, 0, 1, 1], [], []>} : vector<32x32xbf16>, vector<32x16xbf16>, vector<32x16xf32> -> vector<32x16xf32>
    %c0_46 = arith.constant 0 : index
    %c0_47 = arith.constant 0 : index
    %66 = vector.load %arg4[%c0_46, %c0_47] : memref<12x16xf32, #tpu.memory_space<vmem>>, vector<1x16xf32>
    %67 = vector.broadcast %66 : vector<1x16xf32> to vector<32x16xf32>
    %68 = arith.addf %65, %67 : vector<32x16xf32>
    %c2_48 = arith.constant 2 : index
    %c0_49 = arith.constant 0 : index
    %c0_50 = arith.constant 0 : index
    %69 = vector.load %arg3[%c2_48, %c0_49, %c0_50] : memref<12x32x16xbf16, #tpu.memory_space<vmem>>, vector<1x32x16xbf16>
    %70 = vector.shape_cast %69 : vector<1x32x16xbf16> to vector<32x16xbf16>
    %cst_51 = arith.constant dense<0.000000e+00> : vector<32x16xf32>
    %71 = tpu.matmul %61, %70, %cst_51 {dimension_numbers = #tpu.dot_dimension_numbers<[1], [0], [0], [1], [0, 0, 1, 1], [], []>} : vector<32x32xbf16>, vector<32x16xbf16>, vector<32x16xf32> -> vector<32x16xf32>
    %c2_52 = arith.constant 2 : index
    %c0_53 = arith.constant 0 : index
    %72 = vector.load %arg4[%c2_52, %c0_53] : memref<12x16xf32, #tpu.memory_space<vmem>>, vector<1x16xf32>
    %73 = vector.broadcast %72 : vector<1x16xf32> to vector<32x16xf32>
    %74 = arith.addf %71, %73 : vector<32x16xf32>
    %c4_54 = arith.constant 4 : index
    %c0_55 = arith.constant 0 : index
    %c0_56 = arith.constant 0 : index
    %75 = vector.load %arg3[%c4_54, %c0_55, %c0_56] : memref<12x32x16xbf16, #tpu.memory_space<vmem>>, vector<1x32x16xbf16>
    %76 = vector.shape_cast %75 : vector<1x32x16xbf16> to vector<32x16xbf16>
    %cst_57 = arith.constant dense<0.000000e+00> : vector<32x16xf32>
    %77 = tpu.matmul %61, %76, %cst_57 {dimension_numbers = #tpu.dot_dimension_numbers<[1], [0], [0], [1], [0, 0, 1, 1], [], []>} : vector<32x32xbf16>, vector<32x16xbf16>, vector<32x16xf32> -> vector<32x16xf32>
    %c4_58 = arith.constant 4 : index
    %c0_59 = arith.constant 0 : index
    %78 = vector.load %arg4[%c4_58, %c0_59] : memref<12x16xf32, #tpu.memory_space<vmem>>, vector<1x16xf32>
    %79 = vector.broadcast %78 : vector<1x16xf32> to vector<32x16xf32>
    %80 = arith.addf %77, %79 : vector<32x16xf32>
    %81 = arith.truncf %68 : vector<32x16xf32> to vector<32x16xbf16>
    %82 = arith.truncf %74 : vector<32x16xf32> to vector<32x16xbf16>
    %cst_60 = arith.constant dense<0.000000e+00> : vector<32x32xf32>
    %83 = tpu.matmul %81, %82, %cst_60 {dimension_numbers = #tpu.dot_dimension_numbers<[1], [1], [0], [0], [0, 0, 1, 0], [], []>} : vector<32x16xbf16>, vector<32x16xbf16>, vector<32x32xf32> -> vector<32x32xf32>
    %84 = arith.addf %83, %21 : vector<32x32xf32>
    %cst_61 = arith.constant dense<0xFF800000> : vector<32xf32>
    %85 = vector.multi_reduction <maximumf>, %84, %cst_61 [1] : vector<32x32xf32> to vector<32xf32>
    %86 = vector.shape_cast %85 : vector<32xf32> to vector<32x1xf32>
    %87 = vector.broadcast %86 : vector<32x1xf32> to vector<32x32xf32>
    %88 = arith.subf %84, %87 : vector<32x32xf32>
    %89 = math.exp %88 : vector<32x32xf32>
    %cst_62 = arith.constant dense<0.000000e+00> : vector<32xf32>
    %90 = vector.multi_reduction <add>, %89, %cst_62 [1] : vector<32x32xf32> to vector<32xf32>
    %91 = vector.shape_cast %90 : vector<32xf32> to vector<32x1xf32>
    %92 = tpu.reciprocal %91 {approx = true} : vector<32x1xf32> -> vector<32x1xf32>
    %93 = vector.broadcast %92 : vector<32x1xf32> to vector<32x32xf32>
    %94 = arith.mulf %89, %93 : vector<32x32xf32>
    %95 = arith.truncf %94 : vector<32x32xf32> to vector<32x32xbf16>
    %96 = arith.truncf %80 : vector<32x16xf32> to vector<32x16xbf16>
    %cst_63 = arith.constant dense<0.000000e+00> : vector<32x16xf32>
    %97 = tpu.matmul %95, %96, %cst_63 {dimension_numbers = #tpu.dot_dimension_numbers<[1], [0], [0], [1], [0, 0, 1, 1], [], []>} : vector<32x32xbf16>, vector<32x16xbf16>, vector<32x16xf32> -> vector<32x16xf32>
    %98 = arith.truncf %97 : vector<32x16xf32> to vector<32x16xbf16>
    %c0_64 = arith.constant 0 : index
    %c0_65 = arith.constant 0 : index
    %c0_66 = arith.constant 0 : index
    %99 = vector.load %arg5[%c0_64, %c0_65, %c0_66] : memref<4x16x32xbf16, #tpu.memory_space<vmem>>, vector<1x16x32xbf16>
    %100 = vector.shape_cast %99 : vector<1x16x32xbf16> to vector<16x32xbf16>
    %cst_67 = arith.constant dense<0.000000e+00> : vector<32x32xf32>
    %101 = tpu.matmul %98, %100, %cst_67 {dimension_numbers = #tpu.dot_dimension_numbers<[1], [0], [0], [1], [0, 0, 1, 1], [], []>} : vector<32x16xbf16>, vector<16x32xbf16>, vector<32x32xf32> -> vector<32x32xf32>
    %102 = arith.addf %62, %101 : vector<32x32xf32>
    %c1_68 = arith.constant 1 : index
    %c0_69 = arith.constant 0 : index
    %c0_70 = arith.constant 0 : index
    %103 = vector.load %arg3[%c1_68, %c0_69, %c0_70] : memref<12x32x16xbf16, #tpu.memory_space<vmem>>, vector<1x32x16xbf16>
    %104 = vector.shape_cast %103 : vector<1x32x16xbf16> to vector<32x16xbf16>
    %cst_71 = arith.constant dense<0.000000e+00> : vector<32x16xf32>
    %105 = tpu.matmul %61, %104, %cst_71 {dimension_numbers = #tpu.dot_dimension_numbers<[1], [0], [0], [1], [0, 0, 1, 1], [], []>} : vector<32x32xbf16>, vector<32x16xbf16>, vector<32x16xf32> -> vector<32x16xf32>
    %c1_72 = arith.constant 1 : index
    %c0_73 = arith.constant 0 : index
    %106 = vector.load %arg4[%c1_72, %c0_73] : memref<12x16xf32, #tpu.memory_space<vmem>>, vector<1x16xf32>
    %107 = vector.broadcast %106 : vector<1x16xf32> to vector<32x16xf32>
    %108 = arith.addf %105, %107 : vector<32x16xf32>
    %c3_74 = arith.constant 3 : index
    %c0_75 = arith.constant 0 : index
    %c0_76 = arith.constant 0 : index
    %109 = vector.load %arg3[%c3_74, %c0_75, %c0_76] : memref<12x32x16xbf16, #tpu.memory_space<vmem>>, vector<1x32x16xbf16>
    %110 = vector.shape_cast %109 : vector<1x32x16xbf16> to vector<32x16xbf16>
    %cst_77 = arith.constant dense<0.000000e+00> : vector<32x16xf32>
    %111 = tpu.matmul %61, %110, %cst_77 {dimension_numbers = #tpu.dot_dimension_numbers<[1], [0], [0], [1], [0, 0, 1, 1], [], []>} : vector<32x32xbf16>, vector<32x16xbf16>, vector<32x16xf32> -> vector<32x16xf32>
    %c3_78 = arith.constant 3 : index
    %c0_79 = arith.constant 0 : index
    %112 = vector.load %arg4[%c3_78, %c0_79] : memref<12x16xf32, #tpu.memory_space<vmem>>, vector<1x16xf32>
    %113 = vector.broadcast %112 : vector<1x16xf32> to vector<32x16xf32>
    %114 = arith.addf %111, %113 : vector<32x16xf32>
    %c5_80 = arith.constant 5 : index
    %c0_81 = arith.constant 0 : index
    %c0_82 = arith.constant 0 : index
    %115 = vector.load %arg3[%c5_80, %c0_81, %c0_82] : memref<12x32x16xbf16, #tpu.memory_space<vmem>>, vector<1x32x16xbf16>
    %116 = vector.shape_cast %115 : vector<1x32x16xbf16> to vector<32x16xbf16>
    %cst_83 = arith.constant dense<0.000000e+00> : vector<32x16xf32>
    %117 = tpu.matmul %61, %116, %cst_83 {dimension_numbers = #tpu.dot_dimension_numbers<[1], [0], [0], [1], [0, 0, 1, 1], [], []>} : vector<32x32xbf16>, vector<32x16xbf16>, vector<32x16xf32> -> vector<32x16xf32>
    %c5_84 = arith.constant 5 : index
    %c0_85 = arith.constant 0 : index
    %118 = vector.load %arg4[%c5_84, %c0_85] : memref<12x16xf32, #tpu.memory_space<vmem>>, vector<1x16xf32>
    %119 = vector.broadcast %118 : vector<1x16xf32> to vector<32x16xf32>
    %120 = arith.addf %117, %119 : vector<32x16xf32>
    %121 = arith.truncf %108 : vector<32x16xf32> to vector<32x16xbf16>
    %122 = arith.truncf %114 : vector<32x16xf32> to vector<32x16xbf16>
    %cst_86 = arith.constant dense<0.000000e+00> : vector<32x32xf32>
    %123 = tpu.matmul %121, %122, %cst_86 {dimension_numbers = #tpu.dot_dimension_numbers<[1], [1], [0], [0], [0, 0, 1, 0], [], []>} : vector<32x16xbf16>, vector<32x16xbf16>, vector<32x32xf32> -> vector<32x32xf32>
    %124 = arith.addf %123, %21 : vector<32x32xf32>
    %cst_87 = arith.constant dense<0xFF800000> : vector<32xf32>
    %125 = vector.multi_reduction <maximumf>, %124, %cst_87 [1] : vector<32x32xf32> to vector<32xf32>
    %126 = vector.shape_cast %125 : vector<32xf32> to vector<32x1xf32>
    %127 = vector.broadcast %126 : vector<32x1xf32> to vector<32x32xf32>
    %128 = arith.subf %124, %127 : vector<32x32xf32>
    %129 = math.exp %128 : vector<32x32xf32>
    %cst_88 = arith.constant dense<0.000000e+00> : vector<32xf32>
    %130 = vector.multi_reduction <add>, %129, %cst_88 [1] : vector<32x32xf32> to vector<32xf32>
    %131 = vector.shape_cast %130 : vector<32xf32> to vector<32x1xf32>
    %132 = tpu.reciprocal %131 {approx = true} : vector<32x1xf32> -> vector<32x1xf32>
    %133 = vector.broadcast %132 : vector<32x1xf32> to vector<32x32xf32>
    %134 = arith.mulf %129, %133 : vector<32x32xf32>
    %135 = arith.truncf %134 : vector<32x32xf32> to vector<32x32xbf16>
    %136 = arith.truncf %120 : vector<32x16xf32> to vector<32x16xbf16>
    %cst_89 = arith.constant dense<0.000000e+00> : vector<32x16xf32>
    %137 = tpu.matmul %135, %136, %cst_89 {dimension_numbers = #tpu.dot_dimension_numbers<[1], [0], [0], [1], [0, 0, 1, 1], [], []>} : vector<32x32xbf16>, vector<32x16xbf16>, vector<32x16xf32> -> vector<32x16xf32>
    %138 = arith.truncf %137 : vector<32x16xf32> to vector<32x16xbf16>
    %c1_90 = arith.constant 1 : index
    %c0_91 = arith.constant 0 : index
    %c0_92 = arith.constant 0 : index
    %139 = vector.load %arg5[%c1_90, %c0_91, %c0_92] : memref<4x16x32xbf16, #tpu.memory_space<vmem>>, vector<1x16x32xbf16>
    %140 = vector.shape_cast %139 : vector<1x16x32xbf16> to vector<16x32xbf16>
    %cst_93 = arith.constant dense<0.000000e+00> : vector<32x32xf32>
    %141 = tpu.matmul %138, %140, %cst_93 {dimension_numbers = #tpu.dot_dimension_numbers<[1], [0], [0], [1], [0, 0, 1, 1], [], []>} : vector<32x16xbf16>, vector<16x32xbf16>, vector<32x32xf32> -> vector<32x32xf32>
    %142 = arith.addf %102, %141 : vector<32x32xf32>
    %c0_94 = arith.constant 0 : index
    %c0_95 = arith.constant 0 : index
    %143 = vector.load %arg12[%c0_94, %c0_95] : memref<64x32xf32, #tpu.memory_space<vmem>>, vector<32x32xf32>
    tpu.vector_store %arg12[%c0_94, %c0_95], %142 {strides = array<i32>} : memref<64x32xf32, #tpu.memory_space<vmem>>, vector<32x32xf32>,
    %144 = vector.extract_strided_slice %60 {offsets = [32, 0], sizes = [32, 32], strides = [1, 1]} : vector<64x32xbf16> to vector<32x32xbf16>
    %cst_96 = arith.constant 0.000000e+00 : f32
    %145 = vector.broadcast %cst_96 : f32 to vector<32x32xf32>
    %c0_97 = arith.constant 0 : index
    %c0_98 = arith.constant 0 : index
    %c0_99 = arith.constant 0 : index
    %146 = vector.load %arg3[%c0_97, %c0_98, %c0_99] : memref<12x32x16xbf16, #tpu.memory_space<vmem>>, vector<1x32x16xbf16>
    %147 = vector.shape_cast %146 : vector<1x32x16xbf16> to vector<32x16xbf16>
    %cst_100 = arith.constant dense<0.000000e+00> : vector<32x16xf32>
    %148 = tpu.matmul %144, %147, %cst_100 {dimension_numbers = #tpu.dot_dimension_numbers<[1], [0], [0], [1], [0, 0, 1, 1], [], []>} : vector<32x32xbf16>, vector<32x16xbf16>, vector<32x16xf32> -> vector<32x16xf32>
    %c0_101 = arith.constant 0 : index
    %c0_102 = arith.constant 0 : index
    %149 = vector.load %arg4[%c0_101, %c0_102] : memref<12x16xf32, #tpu.memory_space<vmem>>, vector<1x16xf32>
    %150 = vector.broadcast %149 : vector<1x16xf32> to vector<32x16xf32>
    %151 = arith.addf %148, %150 : vector<32x16xf32>
    %c2_103 = arith.constant 2 : index
    %c0_104 = arith.constant 0 : index
    %c0_105 = arith.constant 0 : index
    %152 = vector.load %arg3[%c2_103, %c0_104, %c0_105] : memref<12x32x16xbf16, #tpu.memory_space<vmem>>, vector<1x32x16xbf16>
    %153 = vector.shape_cast %152 : vector<1x32x16xbf16> to vector<32x16xbf16>
    %cst_106 = arith.constant dense<0.000000e+00> : vector<32x16xf32>
    %154 = tpu.matmul %144, %153, %cst_106 {dimension_numbers = #tpu.dot_dimension_numbers<[1], [0], [0], [1], [0, 0, 1, 1], [], []>} : vector<32x32xbf16>, vector<32x16xbf16>, vector<32x16xf32> -> vector<32x16xf32>
    %c2_107 = arith.constant 2 : index
    %c0_108 = arith.constant 0 : index
    %155 = vector.load %arg4[%c2_107, %c0_108] : memref<12x16xf32, #tpu.memory_space<vmem>>, vector<1x16xf32>
    %156 = vector.broadcast %155 : vector<1x16xf32> to vector<32x16xf32>
    %157 = arith.addf %154, %156 : vector<32x16xf32>
    %c4_109 = arith.constant 4 : index
    %c0_110 = arith.constant 0 : index
    %c0_111 = arith.constant 0 : index
    %158 = vector.load %arg3[%c4_109, %c0_110, %c0_111] : memref<12x32x16xbf16, #tpu.memory_space<vmem>>, vector<1x32x16xbf16>
    %159 = vector.shape_cast %158 : vector<1x32x16xbf16> to vector<32x16xbf16>
    %cst_112 = arith.constant dense<0.000000e+00> : vector<32x16xf32>
    %160 = tpu.matmul %144, %159, %cst_112 {dimension_numbers = #tpu.dot_dimension_numbers<[1], [0], [0], [1], [0, 0, 1, 1], [], []>} : vector<32x32xbf16>, vector<32x16xbf16>, vector<32x16xf32> -> vector<32x16xf32>
    %c4_113 = arith.constant 4 : index
    %c0_114 = arith.constant 0 : index
    %161 = vector.load %arg4[%c4_113, %c0_114] : memref<12x16xf32, #tpu.memory_space<vmem>>, vector<1x16xf32>
    %162 = vector.broadcast %161 : vector<1x16xf32> to vector<32x16xf32>
    %163 = arith.addf %160, %162 : vector<32x16xf32>
    %164 = arith.truncf %151 : vector<32x16xf32> to vector<32x16xbf16>
    %165 = arith.truncf %157 : vector<32x16xf32> to vector<32x16xbf16>
    %cst_115 = arith.constant dense<0.000000e+00> : vector<32x32xf32>
    %166 = tpu.matmul %164, %165, %cst_115 {dimension_numbers = #tpu.dot_dimension_numbers<[1], [1], [0], [0], [0, 0, 1, 0], [], []>} : vector<32x16xbf16>, vector<32x16xbf16>, vector<32x32xf32> -> vector<32x32xf32>
    %167 = arith.addf %166, %21 : vector<32x32xf32>
    %cst_116 = arith.constant dense<0xFF800000> : vector<32xf32>
    %168 = vector.multi_reduction <maximumf>, %167, %cst_116 [1] : vector<32x32xf32> to vector<32xf32>
    %169 = vector.shape_cast %168 : vector<32xf32> to vector<32x1xf32>
    %170 = vector.broadcast %169 : vector<32x1xf32> to vector<32x32xf32>
    %171 = arith.subf %167, %170 : vector<32x32xf32>
    %172 = math.exp %171 : vector<32x32xf32>
    %cst_117 = arith.constant dense<0.000000e+00> : vector<32xf32>
    %173 = vector.multi_reduction <add>, %172, %cst_117 [1] : vector<32x32xf32> to vector<32xf32>
    %174 = vector.shape_cast %173 : vector<32xf32> to vector<32x1xf32>
    %175 = tpu.reciprocal %174 {approx = true} : vector<32x1xf32> -> vector<32x1xf32>
    %176 = vector.broadcast %175 : vector<32x1xf32> to vector<32x32xf32>
    %177 = arith.mulf %172, %176 : vector<32x32xf32>
    %178 = arith.truncf %177 : vector<32x32xf32> to vector<32x32xbf16>
    %179 = arith.truncf %163 : vector<32x16xf32> to vector<32x16xbf16>
    %cst_118 = arith.constant dense<0.000000e+00> : vector<32x16xf32>
    %180 = tpu.matmul %178, %179, %cst_118 {dimension_numbers = #tpu.dot_dimension_numbers<[1], [0], [0], [1], [0, 0, 1, 1], [], []>} : vector<32x32xbf16>, vector<32x16xbf16>, vector<32x16xf32> -> vector<32x16xf32>
    %181 = arith.truncf %180 : vector<32x16xf32> to vector<32x16xbf16>
    %c0_119 = arith.constant 0 : index
    %c0_120 = arith.constant 0 : index
    %c0_121 = arith.constant 0 : index
    %182 = vector.load %arg5[%c0_119, %c0_120, %c0_121] : memref<4x16x32xbf16, #tpu.memory_space<vmem>>, vector<1x16x32xbf16>
    %183 = vector.shape_cast %182 : vector<1x16x32xbf16> to vector<16x32xbf16>
    %cst_122 = arith.constant dense<0.000000e+00> : vector<32x32xf32>
    %184 = tpu.matmul %181, %183, %cst_122 {dimension_numbers = #tpu.dot_dimension_numbers<[1], [0], [0], [1], [0, 0, 1, 1], [], []>} : vector<32x16xbf16>, vector<16x32xbf16>, vector<32x32xf32> -> vector<32x32xf32>
    %185 = arith.addf %145, %184 : vector<32x32xf32>
    %c1_123 = arith.constant 1 : index
    %c0_124 = arith.constant 0 : index
    %c0_125 = arith.constant 0 : index
    %186 = vector.load %arg3[%c1_123, %c0_124, %c0_125] : memref<12x32x16xbf16, #tpu.memory_space<vmem>>, vector<1x32x16xbf16>
    %187 = vector.shape_cast %186 : vector<1x32x16xbf16> to vector<32x16xbf16>
    %cst_126 = arith.constant dense<0.000000e+00> : vector<32x16xf32>
    %188 = tpu.matmul %144, %187, %cst_126 {dimension_numbers = #tpu.dot_dimension_numbers<[1], [0], [0], [1], [0, 0, 1, 1], [], []>} : vector<32x32xbf16>, vector<32x16xbf16>, vector<32x16xf32> -> vector<32x16xf32>
    %c1_127 = arith.constant 1 : index
    %c0_128 = arith.constant 0 : index
    %189 = vector.load %arg4[%c1_127, %c0_128] : memref<12x16xf32, #tpu.memory_space<vmem>>, vector<1x16xf32>
    %190 = vector.broadcast %189 : vector<1x16xf32> to vector<32x16xf32>
    %191 = arith.addf %188, %190 : vector<32x16xf32>
    %c3_129 = arith.constant 3 : index
    %c0_130 = arith.constant 0 : index
    %c0_131 = arith.constant 0 : index
    %192 = vector.load %arg3[%c3_129, %c0_130, %c0_131] : memref<12x32x16xbf16, #tpu.memory_space<vmem>>, vector<1x32x16xbf16>
    %193 = vector.shape_cast %192 : vector<1x32x16xbf16> to vector<32x16xbf16>
    %cst_132 = arith.constant dense<0.000000e+00> : vector<32x16xf32>
    %194 = tpu.matmul %144, %193, %cst_132 {dimension_numbers = #tpu.dot_dimension_numbers<[1], [0], [0], [1], [0, 0, 1, 1], [], []>} : vector<32x32xbf16>, vector<32x16xbf16>, vector<32x16xf32> -> vector<32x16xf32>
    %c3_133 = arith.constant 3 : index
    %c0_134 = arith.constant 0 : index
    %195 = vector.load %arg4[%c3_133, %c0_134] : memref<12x16xf32, #tpu.memory_space<vmem>>, vector<1x16xf32>
    %196 = vector.broadcast %195 : vector<1x16xf32> to vector<32x16xf32>
    %197 = arith.addf %194, %196 : vector<32x16xf32>
    %c5_135 = arith.constant 5 : index
    %c0_136 = arith.constant 0 : index
    %c0_137 = arith.constant 0 : index
    %198 = vector.load %arg3[%c5_135, %c0_136, %c0_137] : memref<12x32x16xbf16, #tpu.memory_space<vmem>>, vector<1x32x16xbf16>
    %199 = vector.shape_cast %198 : vector<1x32x16xbf16> to vector<32x16xbf16>
    %cst_138 = arith.constant dense<0.000000e+00> : vector<32x16xf32>
    %200 = tpu.matmul %144, %199, %cst_138 {dimension_numbers = #tpu.dot_dimension_numbers<[1], [0], [0], [1], [0, 0, 1, 1], [], []>} : vector<32x32xbf16>, vector<32x16xbf16>, vector<32x16xf32> -> vector<32x16xf32>
    %c5_139 = arith.constant 5 : index
    %c0_140 = arith.constant 0 : index
    %201 = vector.load %arg4[%c5_139, %c0_140] : memref<12x16xf32, #tpu.memory_space<vmem>>, vector<1x16xf32>
    %202 = vector.broadcast %201 : vector<1x16xf32> to vector<32x16xf32>
    %203 = arith.addf %200, %202 : vector<32x16xf32>
    %204 = arith.truncf %191 : vector<32x16xf32> to vector<32x16xbf16>
    %205 = arith.truncf %197 : vector<32x16xf32> to vector<32x16xbf16>
    %cst_141 = arith.constant dense<0.000000e+00> : vector<32x32xf32>
    %206 = tpu.matmul %204, %205, %cst_141 {dimension_numbers = #tpu.dot_dimension_numbers<[1], [1], [0], [0], [0, 0, 1, 0], [], []>} : vector<32x16xbf16>, vector<32x16xbf16>, vector<32x32xf32> -> vector<32x32xf32>
    %207 = arith.addf %206, %21 : vector<32x32xf32>
    %cst_142 = arith.constant dense<0xFF800000> : vector<32xf32>
    %208 = vector.multi_reduction <maximumf>, %207, %cst_142 [1] : vector<32x32xf32> to vector<32xf32>
    %209 = vector.shape_cast %208 : vector<32xf32> to vector<32x1xf32>
    %210 = vector.broadcast %209 : vector<32x1xf32> to vector<32x32xf32>
    %211 = arith.subf %207, %210 : vector<32x32xf32>
    %212 = math.exp %211 : vector<32x32xf32>
    %cst_143 = arith.constant dense<0.000000e+00> : vector<32xf32>
    %213 = vector.multi_reduction <add>, %212, %cst_143 [1] : vector<32x32xf32> to vector<32xf32>
    %214 = vector.shape_cast %213 : vector<32xf32> to vector<32x1xf32>
    %215 = tpu.reciprocal %214 {approx = true} : vector<32x1xf32> -> vector<32x1xf32>
    %216 = vector.broadcast %215 : vector<32x1xf32> to vector<32x32xf32>
    %217 = arith.mulf %212, %216 : vector<32x32xf32>
    %218 = arith.truncf %217 : vector<32x32xf32> to vector<32x32xbf16>
    %219 = arith.truncf %203 : vector<32x16xf32> to vector<32x16xbf16>
    %cst_144 = arith.constant dense<0.000000e+00> : vector<32x16xf32>
    %220 = tpu.matmul %218, %219, %cst_144 {dimension_numbers = #tpu.dot_dimension_numbers<[1], [0], [0], [1], [0, 0, 1, 1], [], []>} : vector<32x32xbf16>, vector<32x16xbf16>, vector<32x16xf32> -> vector<32x16xf32>
    %221 = arith.truncf %220 : vector<32x16xf32> to vector<32x16xbf16>
    %c1_145 = arith.constant 1 : index
    %c0_146 = arith.constant 0 : index
    %c0_147 = arith.constant 0 : index
    %222 = vector.load %arg5[%c1_145, %c0_146, %c0_147] : memref<4x16x32xbf16, #tpu.memory_space<vmem>>, vector<1x16x32xbf16>
    %223 = vector.shape_cast %222 : vector<1x16x32xbf16> to vector<16x32xbf16>
    %cst_148 = arith.constant dense<0.000000e+00> : vector<32x32xf32>
    %224 = tpu.matmul %221, %223, %cst_148 {dimension_numbers = #tpu.dot_dimension_numbers<[1], [0], [0], [1], [0, 0, 1, 1], [], []>} : vector<32x16xbf16>, vector<16x32xbf16>, vector<32x32xf32> -> vector<32x32xf32>
    %225 = arith.addf %185, %224 : vector<32x32xf32>
    %c32_149 = arith.constant 32 : index
    %c0_150 = arith.constant 0 : index
    %226 = vector.load %arg12[%c32_149, %c0_150] : memref<64x32xf32, #tpu.memory_space<vmem>>, vector<32x32xf32>
    tpu.vector_store %arg12[%c32_149, %c0_150], %225 {strides = array<i32>} : memref<64x32xf32, #tpu.memory_space<vmem>>, vector<32x32xf32>,
    %c0_151 = arith.constant 0 : index
    %c0_152 = arith.constant 0 : index
    %227 = vector.load %arg12[%c0_151, %c0_152] : memref<64x32xf32, #tpu.memory_space<vmem>>, vector<64x32xf32>
    %228 = arith.addf %15, %227 : vector<64x32xf32>
    %229 = vector.broadcast %27 : vector<1x32xf32> to vector<64x32xf32>
    %230 = arith.addf %228, %229 : vector<64x32xf32>
    %cst_153 = arith.constant dense<0.000000e+00> : vector<64xf32>
    %231 = vector.multi_reduction <add>, %230, %cst_153 [1] : vector<64x32xf32> to vector<64xf32>
    %232 = vector.shape_cast %231 : vector<64xf32> to vector<64x1xf32>
    %cst_154 = arith.constant 3.125000e-02 : f32
    %233 = vector.broadcast %cst_154 : f32 to vector<64x1xf32>
    %234 = arith.mulf %232, %233 : vector<64x1xf32>
    %235 = arith.mulf %230, %230 : vector<64x32xf32>
    %cst_155 = arith.constant dense<0.000000e+00> : vector<64xf32>
    %236 = vector.multi_reduction <add>, %235, %cst_155 [1] : vector<64x32xf32> to vector<64xf32>
    %237 = vector.shape_cast %236 : vector<64xf32> to vector<64x1xf32>
    %cst_156 = arith.constant 3.125000e-02 : f32
    %238 = vector.broadcast %cst_156 : f32 to vector<64x1xf32>
    %239 = arith.mulf %237, %238 : vector<64x1xf32>
    %240 = arith.mulf %234, %234 : vector<64x1xf32>
    %241 = arith.subf %239, %240 : vector<64x1xf32>
    %cst_157 = arith.constant 0.000000e+00 : f32
    %242 = vector.broadcast %cst_157 : f32 to vector<64x1xf32>
    %243 = arith.maximumf %241, %242 : vector<64x1xf32>
    %244 = vector.broadcast %234 : vector<64x1xf32> to vector<64x32xf32>
    %245 = arith.subf %230, %244 : vector<64x32xf32>
    %cst_158 = arith.constant 9.99999996E-13 : f32
    %246 = vector.broadcast %cst_158 : f32 to vector<64x1xf32>
    %247 = arith.addf %243, %246 : vector<64x1xf32>
    %248 = math.rsqrt %247 : vector<64x1xf32>
    %249 = vector.broadcast %248 : vector<64x1xf32> to vector<64x32xf32>
    %250 = arith.mulf %245, %249 : vector<64x32xf32>
    %251 = vector.broadcast %29 : vector<1x32xf32> to vector<64x32xf32>
    %252 = arith.mulf %250, %251 : vector<64x32xf32>
    %253 = vector.broadcast %31 : vector<1x32xf32> to vector<64x32xf32>
    %254 = arith.addf %252, %253 : vector<64x32xf32>
    %255 = arith.truncf %254 : vector<64x32xf32> to vector<64x32xbf16>
    %c0_159 = arith.constant 0 : index
    %c0_160 = arith.constant 0 : index
    %c0_161 = arith.constant 0 : index
    %256 = vector.load %arg6[%c0_159, %c0_160, %c0_161] : memref<2x32x128xbf16, #tpu.memory_space<vmem>>, vector<1x32x128xbf16>
    %257 = vector.shape_cast %256 : vector<1x32x128xbf16> to vector<32x128xbf16>
    %cst_162 = arith.constant dense<0.000000e+00> : vector<64x128xf32>
    %258 = tpu.matmul %255, %257, %cst_162 {dimension_numbers = #tpu.dot_dimension_numbers<[1], [0], [0], [1], [0, 0, 1, 1], [], []>} : vector<64x32xbf16>, vector<32x128xbf16>, vector<64x128xf32> -> vector<64x128xf32>
    %259 = vector.broadcast %33 : vector<1x128xf32> to vector<64x128xf32>
    %260 = arith.addf %258, %259 : vector<64x128xf32>
    %261 = arith.mulf %260, %260 : vector<64x128xf32>
    %262 = arith.mulf %260, %261 : vector<64x128xf32>
    %cst_163 = arith.constant 4.471500e-02 : f32
    %263 = vector.broadcast %cst_163 : f32 to vector<64x128xf32>
    %264 = arith.mulf %263, %262 : vector<64x128xf32>
    %265 = arith.addf %260, %264 : vector<64x128xf32>
    %cst_164 = arith.constant 0.797884583 : f32
    %266 = vector.broadcast %cst_164 : f32 to vector<64x128xf32>
    %267 = arith.mulf %266, %265 : vector<64x128xf32>
    %268 = math.tanh %267 : vector<64x128xf32>
    %cst_165 = arith.constant 1.000000e+00 : f32
    %269 = vector.broadcast %cst_165 : f32 to vector<64x128xf32>
    %270 = arith.addf %269, %268 : vector<64x128xf32>
    %cst_166 = arith.constant 5.000000e-01 : f32
    %271 = vector.broadcast %cst_166 : f32 to vector<64x128xf32>
    %272 = arith.mulf %271, %270 : vector<64x128xf32>
    %273 = arith.mulf %260, %272 : vector<64x128xf32>
    %274 = arith.truncf %273 : vector<64x128xf32> to vector<64x128xbf16>
    %c0_167 = arith.constant 0 : index
    %c0_168 = arith.constant 0 : index
    %c0_169 = arith.constant 0 : index
    %275 = vector.load %arg7[%c0_167, %c0_168, %c0_169] : memref<2x128x32xbf16, #tpu.memory_space<vmem>>, vector<1x128x32xbf16>
    %276 = vector.shape_cast %275 : vector<1x128x32xbf16> to vector<128x32xbf16>
    %cst_170 = arith.constant dense<0.000000e+00> : vector<64x32xf32>
    %277 = tpu.matmul %274, %276, %cst_170 {dimension_numbers = #tpu.dot_dimension_numbers<[1], [0], [0], [1], [0, 0, 1, 1], [], []>} : vector<64x128xbf16>, vector<128x32xbf16>, vector<64x32xf32> -> vector<64x32xf32>
    %278 = arith.addf %230, %277 : vector<64x32xf32>
    %279 = vector.broadcast %35 : vector<1x32xf32> to vector<64x32xf32>
    %280 = arith.addf %278, %279 : vector<64x32xf32>
    %c1_171 = arith.constant 1 : index
    %c0_172 = arith.constant 0 : index
    %c0_173 = arith.constant 0 : index
    %281 = vector.load %arg8[%c1_171, %c0_172, %c0_173] : memref<2x7x128xf32, #tpu.memory_space<vmem>>, vector<1x1x32xf32>
    %282 = vector.shape_cast %281 : vector<1x1x32xf32> to vector<1x32xf32>
    %c1_174 = arith.constant 1 : index
    %c1_175 = arith.constant 1 : index
    %c0_176 = arith.constant 0 : index
    %283 = vector.load %arg8[%c1_174, %c1_175, %c0_176] : memref<2x7x128xf32, #tpu.memory_space<vmem>>, vector<1x1x32xf32>
    %284 = vector.shape_cast %283 : vector<1x1x32xf32> to vector<1x32xf32>
    %c1_177 = arith.constant 1 : index
    %c2_178 = arith.constant 2 : index
    %c0_179 = arith.constant 0 : index
    %285 = vector.load %arg8[%c1_177, %c2_178, %c0_179] : memref<2x7x128xf32, #tpu.memory_space<vmem>>, vector<1x1x32xf32>
    %286 = vector.shape_cast %285 : vector<1x1x32xf32> to vector<1x32xf32>
    %c1_180 = arith.constant 1 : index
    %c3_181 = arith.constant 3 : index
    %c0_182 = arith.constant 0 : index
    %287 = vector.load %arg8[%c1_180, %c3_181, %c0_182] : memref<2x7x128xf32, #tpu.memory_space<vmem>>, vector<1x1x32xf32>
    %288 = vector.shape_cast %287 : vector<1x1x32xf32> to vector<1x32xf32>
    %c1_183 = arith.constant 1 : index
    %c4_184 = arith.constant 4 : index
    %c0_185 = arith.constant 0 : index
    %289 = vector.load %arg8[%c1_183, %c4_184, %c0_185] : memref<2x7x128xf32, #tpu.memory_space<vmem>>, vector<1x1x32xf32>
    %290 = vector.shape_cast %289 : vector<1x1x32xf32> to vector<1x32xf32>
    %c1_186 = arith.constant 1 : index
    %c5_187 = arith.constant 5 : index
    %c0_188 = arith.constant 0 : index
    %291 = vector.load %arg8[%c1_186, %c5_187, %c0_188] : memref<2x7x128xf32, #tpu.memory_space<vmem>>, vector<1x1x128xf32>
    %292 = vector.shape_cast %291 : vector<1x1x128xf32> to vector<1x128xf32>
    %c1_189 = arith.constant 1 : index
    %c6_190 = arith.constant 6 : index
    %c0_191 = arith.constant 0 : index
    %293 = vector.load %arg8[%c1_189, %c6_190, %c0_191] : memref<2x7x128xf32, #tpu.memory_space<vmem>>, vector<1x1x32xf32>
    %294 = vector.shape_cast %293 : vector<1x1x32xf32> to vector<1x32xf32>
    %cst_192 = arith.constant dense<0.000000e+00> : vector<64xf32>
    %295 = vector.multi_reduction <add>, %280, %cst_192 [1] : vector<64x32xf32> to vector<64xf32>
    %296 = vector.shape_cast %295 : vector<64xf32> to vector<64x1xf32>
    %cst_193 = arith.constant 3.125000e-02 : f32
    %297 = vector.broadcast %cst_193 : f32 to vector<64x1xf32>
    %298 = arith.mulf %296, %297 : vector<64x1xf32>
    %299 = arith.mulf %280, %280 : vector<64x32xf32>
    %cst_194 = arith.constant dense<0.000000e+00> : vector<64xf32>
    %300 = vector.multi_reduction <add>, %299, %cst_194 [1] : vector<64x32xf32> to vector<64xf32>
    %301 = vector.shape_cast %300 : vector<64xf32> to vector<64x1xf32>
    %cst_195 = arith.constant 3.125000e-02 : f32
    %302 = vector.broadcast %cst_195 : f32 to vector<64x1xf32>
    %303 = arith.mulf %301, %302 : vector<64x1xf32>
    %304 = arith.mulf %298, %298 : vector<64x1xf32>
    %305 = arith.subf %303, %304 : vector<64x1xf32>
    %cst_196 = arith.constant 0.000000e+00 : f32
    %306 = vector.broadcast %cst_196 : f32 to vector<64x1xf32>
    %307 = arith.maximumf %305, %306 : vector<64x1xf32>
    %308 = vector.broadcast %298 : vector<64x1xf32> to vector<64x32xf32>
    %309 = arith.subf %280, %308 : vector<64x32xf32>
    %cst_197 = arith.constant 9.99999996E-13 : f32
    %310 = vector.broadcast %cst_197 : f32 to vector<64x1xf32>
    %311 = arith.addf %307, %310 : vector<64x1xf32>
    %312 = math.rsqrt %311 : vector<64x1xf32>
    %313 = vector.broadcast %312 : vector<64x1xf32> to vector<64x32xf32>
    %314 = arith.mulf %309, %313 : vector<64x32xf32>
    %315 = vector.broadcast %282 : vector<1x32xf32> to vector<64x32xf32>
    %316 = arith.mulf %314, %315 : vector<64x32xf32>
    %317 = vector.broadcast %284 : vector<1x32xf32> to vector<64x32xf32>
    %318 = arith.addf %316, %317 : vector<64x32xf32>
    %319 = arith.truncf %318 : vector<64x32xf32> to vector<64x32xbf16>
    %320 = vector.extract_strided_slice %319 {offsets = [0, 0], sizes = [32, 32], strides = [1, 1]} : vector<64x32xbf16> to vector<32x32xbf16>
    %cst_198 = arith.constant 0.000000e+00 : f32
    %321 = vector.broadcast %cst_198 : f32 to vector<32x32xf32>
    %c6_199 = arith.constant 6 : index
    %c0_200 = arith.constant 0 : index
    %c0_201 = arith.constant 0 : index
    %322 = vector.load %arg3[%c6_199, %c0_200, %c0_201] : memref<12x32x16xbf16, #tpu.memory_space<vmem>>, vector<1x32x16xbf16>
    %323 = vector.shape_cast %322 : vector<1x32x16xbf16> to vector<32x16xbf16>
    %cst_202 = arith.constant dense<0.000000e+00> : vector<32x16xf32>
    %324 = tpu.matmul %320, %323, %cst_202 {dimension_numbers = #tpu.dot_dimension_numbers<[1], [0], [0], [1], [0, 0, 1, 1], [], []>} : vector<32x32xbf16>, vector<32x16xbf16>, vector<32x16xf32> -> vector<32x16xf32>
    %c6_203 = arith.constant 6 : index
    %c0_204 = arith.constant 0 : index
    %325 = vector.load %arg4[%c6_203, %c0_204] : memref<12x16xf32, #tpu.memory_space<vmem>>, vector<1x16xf32>
    %326 = vector.broadcast %325 : vector<1x16xf32> to vector<32x16xf32>
    %327 = arith.addf %324, %326 : vector<32x16xf32>
    %c8 = arith.constant 8 : index
    %c0_205 = arith.constant 0 : index
    %c0_206 = arith.constant 0 : index
    %328 = vector.load %arg3[%c8, %c0_205, %c0_206] : memref<12x32x16xbf16, #tpu.memory_space<vmem>>, vector<1x32x16xbf16>
    %329 = vector.shape_cast %328 : vector<1x32x16xbf16> to vector<32x16xbf16>
    %cst_207 = arith.constant dense<0.000000e+00> : vector<32x16xf32>
    %330 = tpu.matmul %320, %329, %cst_207 {dimension_numbers = #tpu.dot_dimension_numbers<[1], [0], [0], [1], [0, 0, 1, 1], [], []>} : vector<32x32xbf16>, vector<32x16xbf16>, vector<32x16xf32> -> vector<32x16xf32>
    %c8_208 = arith.constant 8 : index
    %c0_209 = arith.constant 0 : index
    %331 = vector.load %arg4[%c8_208, %c0_209] : memref<12x16xf32, #tpu.memory_space<vmem>>, vector<1x16xf32>
    %332 = vector.broadcast %331 : vector<1x16xf32> to vector<32x16xf32>
    %333 = arith.addf %330, %332 : vector<32x16xf32>
    %c10 = arith.constant 10 : index
    %c0_210 = arith.constant 0 : index
    %c0_211 = arith.constant 0 : index
    %334 = vector.load %arg3[%c10, %c0_210, %c0_211] : memref<12x32x16xbf16, #tpu.memory_space<vmem>>, vector<1x32x16xbf16>
    %335 = vector.shape_cast %334 : vector<1x32x16xbf16> to vector<32x16xbf16>
    %cst_212 = arith.constant dense<0.000000e+00> : vector<32x16xf32>
    %336 = tpu.matmul %320, %335, %cst_212 {dimension_numbers = #tpu.dot_dimension_numbers<[1], [0], [0], [1], [0, 0, 1, 1], [], []>} : vector<32x32xbf16>, vector<32x16xbf16>, vector<32x16xf32> -> vector<32x16xf32>
    %c10_213 = arith.constant 10 : index
    %c0_214 = arith.constant 0 : index
    %337 = vector.load %arg4[%c10_213, %c0_214] : memref<12x16xf32, #tpu.memory_space<vmem>>, vector<1x16xf32>
    %338 = vector.broadcast %337 : vector<1x16xf32> to vector<32x16xf32>
    %339 = arith.addf %336, %338 : vector<32x16xf32>
    %340 = arith.truncf %327 : vector<32x16xf32> to vector<32x16xbf16>
    %341 = arith.truncf %333 : vector<32x16xf32> to vector<32x16xbf16>
    %cst_215 = arith.constant dense<0.000000e+00> : vector<32x32xf32>
    %342 = tpu.matmul %340, %341, %cst_215 {dimension_numbers = #tpu.dot_dimension_numbers<[1], [1], [0], [0], [0, 0, 1, 0], [], []>} : vector<32x16xbf16>, vector<32x16xbf16>, vector<32x32xf32> -> vector<32x32xf32>
    %343 = arith.addf %342, %21 : vector<32x32xf32>
    %cst_216 = arith.constant dense<0xFF800000> : vector<32xf32>
    %344 = vector.multi_reduction <maximumf>, %343, %cst_216 [1] : vector<32x32xf32> to vector<32xf32>
    %345 = vector.shape_cast %344 : vector<32xf32> to vector<32x1xf32>
    %346 = vector.broadcast %345 : vector<32x1xf32> to vector<32x32xf32>
    %347 = arith.subf %343, %346 : vector<32x32xf32>
    %348 = math.exp %347 : vector<32x32xf32>
    %cst_217 = arith.constant dense<0.000000e+00> : vector<32xf32>
    %349 = vector.multi_reduction <add>, %348, %cst_217 [1] : vector<32x32xf32> to vector<32xf32>
    %350 = vector.shape_cast %349 : vector<32xf32> to vector<32x1xf32>
    %351 = tpu.reciprocal %350 {approx = true} : vector<32x1xf32> -> vector<32x1xf32>
    %352 = vector.broadcast %351 : vector<32x1xf32> to vector<32x32xf32>
    %353 = arith.mulf %348, %352 : vector<32x32xf32>
    %354 = arith.truncf %353 : vector<32x32xf32> to vector<32x32xbf16>
    %355 = arith.truncf %339 : vector<32x16xf32> to vector<32x16xbf16>
    %cst_218 = arith.constant dense<0.000000e+00> : vector<32x16xf32>
    %356 = tpu.matmul %354, %355, %cst_218 {dimension_numbers = #tpu.dot_dimension_numbers<[1], [0], [0], [1], [0, 0, 1, 1], [], []>} : vector<32x32xbf16>, vector<32x16xbf16>, vector<32x16xf32> -> vector<32x16xf32>
    %357 = arith.truncf %356 : vector<32x16xf32> to vector<32x16xbf16>
    %c2_219 = arith.constant 2 : index
    %c0_220 = arith.constant 0 : index
    %c0_221 = arith.constant 0 : index
    %358 = vector.load %arg5[%c2_219, %c0_220, %c0_221] : memref<4x16x32xbf16, #tpu.memory_space<vmem>>, vector<1x16x32xbf16>
    %359 = vector.shape_cast %358 : vector<1x16x32xbf16> to vector<16x32xbf16>
    %cst_222 = arith.constant dense<0.000000e+00> : vector<32x32xf32>
    %360 = tpu.matmul %357, %359, %cst_222 {dimension_numbers = #tpu.dot_dimension_numbers<[1], [0], [0], [1], [0, 0, 1, 1], [], []>} : vector<32x16xbf16>, vector<16x32xbf16>, vector<32x32xf32> -> vector<32x32xf32>
    %361 = arith.addf %321, %360 : vector<32x32xf32>
    %c7 = arith.constant 7 : index
    %c0_223 = arith.constant 0 : index
    %c0_224 = arith.constant 0 : index
    %362 = vector.load %arg3[%c7, %c0_223, %c0_224] : memref<12x32x16xbf16, #tpu.memory_space<vmem>>, vector<1x32x16xbf16>
    %363 = vector.shape_cast %362 : vector<1x32x16xbf16> to vector<32x16xbf16>
    %cst_225 = arith.constant dense<0.000000e+00> : vector<32x16xf32>
    %364 = tpu.matmul %320, %363, %cst_225 {dimension_numbers = #tpu.dot_dimension_numbers<[1], [0], [0], [1], [0, 0, 1, 1], [], []>} : vector<32x32xbf16>, vector<32x16xbf16>, vector<32x16xf32> -> vector<32x16xf32>
    %c7_226 = arith.constant 7 : index
    %c0_227 = arith.constant 0 : index
    %365 = vector.load %arg4[%c7_226, %c0_227] : memref<12x16xf32, #tpu.memory_space<vmem>>, vector<1x16xf32>
    %366 = vector.broadcast %365 : vector<1x16xf32> to vector<32x16xf32>
    %367 = arith.addf %364, %366 : vector<32x16xf32>
    %c9 = arith.constant 9 : index
    %c0_228 = arith.constant 0 : index
    %c0_229 = arith.constant 0 : index
    %368 = vector.load %arg3[%c9, %c0_228, %c0_229] : memref<12x32x16xbf16, #tpu.memory_space<vmem>>, vector<1x32x16xbf16>
    %369 = vector.shape_cast %368 : vector<1x32x16xbf16> to vector<32x16xbf16>
    %cst_230 = arith.constant dense<0.000000e+00> : vector<32x16xf32>
    %370 = tpu.matmul %320, %369, %cst_230 {dimension_numbers = #tpu.dot_dimension_numbers<[1], [0], [0], [1], [0, 0, 1, 1], [], []>} : vector<32x32xbf16>, vector<32x16xbf16>, vector<32x16xf32> -> vector<32x16xf32>
    %c9_231 = arith.constant 9 : index
    %c0_232 = arith.constant 0 : index
    %371 = vector.load %arg4[%c9_231, %c0_232] : memref<12x16xf32, #tpu.memory_space<vmem>>, vector<1x16xf32>
    %372 = vector.broadcast %371 : vector<1x16xf32> to vector<32x16xf32>
    %373 = arith.addf %370, %372 : vector<32x16xf32>
    %c11 = arith.constant 11 : index
    %c0_233 = arith.constant 0 : index
    %c0_234 = arith.constant 0 : index
    %374 = vector.load %arg3[%c11, %c0_233, %c0_234] : memref<12x32x16xbf16, #tpu.memory_space<vmem>>, vector<1x32x16xbf16>
    %375 = vector.shape_cast %374 : vector<1x32x16xbf16> to vector<32x16xbf16>
    %cst_235 = arith.constant dense<0.000000e+00> : vector<32x16xf32>
    %376 = tpu.matmul %320, %375, %cst_235 {dimension_numbers = #tpu.dot_dimension_numbers<[1], [0], [0], [1], [0, 0, 1, 1], [], []>} : vector<32x32xbf16>, vector<32x16xbf16>, vector<32x16xf32> -> vector<32x16xf32>
    %c11_236 = arith.constant 11 : index
    %c0_237 = arith.constant 0 : index
    %377 = vector.load %arg4[%c11_236, %c0_237] : memref<12x16xf32, #tpu.memory_space<vmem>>, vector<1x16xf32>
    %378 = vector.broadcast %377 : vector<1x16xf32> to vector<32x16xf32>
    %379 = arith.addf %376, %378 : vector<32x16xf32>
    %380 = arith.truncf %367 : vector<32x16xf32> to vector<32x16xbf16>
    %381 = arith.truncf %373 : vector<32x16xf32> to vector<32x16xbf16>
    %cst_238 = arith.constant dense<0.000000e+00> : vector<32x32xf32>
    %382 = tpu.matmul %380, %381, %cst_238 {dimension_numbers = #tpu.dot_dimension_numbers<[1], [1], [0], [0], [0, 0, 1, 0], [], []>} : vector<32x16xbf16>, vector<32x16xbf16>, vector<32x32xf32> -> vector<32x32xf32>
    %383 = arith.addf %382, %21 : vector<32x32xf32>
    %cst_239 = arith.constant dense<0xFF800000> : vector<32xf32>
    %384 = vector.multi_reduction <maximumf>, %383, %cst_239 [1] : vector<32x32xf32> to vector<32xf32>
    %385 = vector.shape_cast %384 : vector<32xf32> to vector<32x1xf32>
    %386 = vector.broadcast %385 : vector<32x1xf32> to vector<32x32xf32>
    %387 = arith.subf %383, %386 : vector<32x32xf32>
    %388 = math.exp %387 : vector<32x32xf32>
    %cst_240 = arith.constant dense<0.000000e+00> : vector<32xf32>
    %389 = vector.multi_reduction <add>, %388, %cst_240 [1] : vector<32x32xf32> to vector<32xf32>
    %390 = vector.shape_cast %389 : vector<32xf32> to vector<32x1xf32>
    %391 = tpu.reciprocal %390 {approx = true} : vector<32x1xf32> -> vector<32x1xf32>
    %392 = vector.broadcast %391 : vector<32x1xf32> to vector<32x32xf32>
    %393 = arith.mulf %388, %392 : vector<32x32xf32>
    %394 = arith.truncf %393 : vector<32x32xf32> to vector<32x32xbf16>
    %395 = arith.truncf %379 : vector<32x16xf32> to vector<32x16xbf16>
    %cst_241 = arith.constant dense<0.000000e+00> : vector<32x16xf32>
    %396 = tpu.matmul %394, %395, %cst_241 {dimension_numbers = #tpu.dot_dimension_numbers<[1], [0], [0], [1], [0, 0, 1, 1], [], []>} : vector<32x32xbf16>, vector<32x16xbf16>, vector<32x16xf32> -> vector<32x16xf32>
    %397 = arith.truncf %396 : vector<32x16xf32> to vector<32x16xbf16>
    %c3_242 = arith.constant 3 : index
    %c0_243 = arith.constant 0 : index
    %c0_244 = arith.constant 0 : index
    %398 = vector.load %arg5[%c3_242, %c0_243, %c0_244] : memref<4x16x32xbf16, #tpu.memory_space<vmem>>, vector<1x16x32xbf16>
    %399 = vector.shape_cast %398 : vector<1x16x32xbf16> to vector<16x32xbf16>
    %cst_245 = arith.constant dense<0.000000e+00> : vector<32x32xf32>
    %400 = tpu.matmul %397, %399, %cst_245 {dimension_numbers = #tpu.dot_dimension_numbers<[1], [0], [0], [1], [0, 0, 1, 1], [], []>} : vector<32x16xbf16>, vector<16x32xbf16>, vector<32x32xf32> -> vector<32x32xf32>
    %401 = arith.addf %361, %400 : vector<32x32xf32>
    %c0_246 = arith.constant 0 : index
    %c0_247 = arith.constant 0 : index
    %402 = vector.load %arg12[%c0_246, %c0_247] : memref<64x32xf32, #tpu.memory_space<vmem>>, vector<32x32xf32>
    tpu.vector_store %arg12[%c0_246, %c0_247], %401 {strides = array<i32>} : memref<64x32xf32, #tpu.memory_space<vmem>>, vector<32x32xf32>,
    %403 = vector.extract_strided_slice %319 {offsets = [32, 0], sizes = [32, 32], strides = [1, 1]} : vector<64x32xbf16> to vector<32x32xbf16>
    %cst_248 = arith.constant 0.000000e+00 : f32
    %404 = vector.broadcast %cst_248 : f32 to vector<32x32xf32>
    %c6_249 = arith.constant 6 : index
    %c0_250 = arith.constant 0 : index
    %c0_251 = arith.constant 0 : index
    %405 = vector.load %arg3[%c6_249, %c0_250, %c0_251] : memref<12x32x16xbf16, #tpu.memory_space<vmem>>, vector<1x32x16xbf16>
    %406 = vector.shape_cast %405 : vector<1x32x16xbf16> to vector<32x16xbf16>
    %cst_252 = arith.constant dense<0.000000e+00> : vector<32x16xf32>
    %407 = tpu.matmul %403, %406, %cst_252 {dimension_numbers = #tpu.dot_dimension_numbers<[1], [0], [0], [1], [0, 0, 1, 1], [], []>} : vector<32x32xbf16>, vector<32x16xbf16>, vector<32x16xf32> -> vector<32x16xf32>
    %c6_253 = arith.constant 6 : index
    %c0_254 = arith.constant 0 : index
    %408 = vector.load %arg4[%c6_253, %c0_254] : memref<12x16xf32, #tpu.memory_space<vmem>>, vector<1x16xf32>
    %409 = vector.broadcast %408 : vector<1x16xf32> to vector<32x16xf32>
    %410 = arith.addf %407, %409 : vector<32x16xf32>
    %c8_255 = arith.constant 8 : index
    %c0_256 = arith.constant 0 : index
    %c0_257 = arith.constant 0 : index
    %411 = vector.load %arg3[%c8_255, %c0_256, %c0_257] : memref<12x32x16xbf16, #tpu.memory_space<vmem>>, vector<1x32x16xbf16>
    %412 = vector.shape_cast %411 : vector<1x32x16xbf16> to vector<32x16xbf16>
    %cst_258 = arith.constant dense<0.000000e+00> : vector<32x16xf32>
    %413 = tpu.matmul %403, %412, %cst_258 {dimension_numbers = #tpu.dot_dimension_numbers<[1], [0], [0], [1], [0, 0, 1, 1], [], []>} : vector<32x32xbf16>, vector<32x16xbf16>, vector<32x16xf32> -> vector<32x16xf32>
    %c8_259 = arith.constant 8 : index
    %c0_260 = arith.constant 0 : index
    %414 = vector.load %arg4[%c8_259, %c0_260] : memref<12x16xf32, #tpu.memory_space<vmem>>, vector<1x16xf32>
    %415 = vector.broadcast %414 : vector<1x16xf32> to vector<32x16xf32>
    %416 = arith.addf %413, %415 : vector<32x16xf32>
    %c10_261 = arith.constant 10 : index
    %c0_262 = arith.constant 0 : index
    %c0_263 = arith.constant 0 : index
    %417 = vector.load %arg3[%c10_261, %c0_262, %c0_263] : memref<12x32x16xbf16, #tpu.memory_space<vmem>>, vector<1x32x16xbf16>
    %418 = vector.shape_cast %417 : vector<1x32x16xbf16> to vector<32x16xbf16>
    %cst_264 = arith.constant dense<0.000000e+00> : vector<32x16xf32>
    %419 = tpu.matmul %403, %418, %cst_264 {dimension_numbers = #tpu.dot_dimension_numbers<[1], [0], [0], [1], [0, 0, 1, 1], [], []>} : vector<32x32xbf16>, vector<32x16xbf16>, vector<32x16xf32> -> vector<32x16xf32>
    %c10_265 = arith.constant 10 : index
    %c0_266 = arith.constant 0 : index
    %420 = vector.load %arg4[%c10_265, %c0_266] : memref<12x16xf32, #tpu.memory_space<vmem>>, vector<1x16xf32>
    %421 = vector.broadcast %420 : vector<1x16xf32> to vector<32x16xf32>
    %422 = arith.addf %419, %421 : vector<32x16xf32>
    %423 = arith.truncf %410 : vector<32x16xf32> to vector<32x16xbf16>
    %424 = arith.truncf %416 : vector<32x16xf32> to vector<32x16xbf16>
    %cst_267 = arith.constant dense<0.000000e+00> : vector<32x32xf32>
    %425 = tpu.matmul %423, %424, %cst_267 {dimension_numbers = #tpu.dot_dimension_numbers<[1], [1], [0], [0], [0, 0, 1, 0], [], []>} : vector<32x16xbf16>, vector<32x16xbf16>, vector<32x32xf32> -> vector<32x32xf32>
    %426 = arith.addf %425, %21 : vector<32x32xf32>
    %cst_268 = arith.constant dense<0xFF800000> : vector<32xf32>
    %427 = vector.multi_reduction <maximumf>, %426, %cst_268 [1] : vector<32x32xf32> to vector<32xf32>
    %428 = vector.shape_cast %427 : vector<32xf32> to vector<32x1xf32>
    %429 = vector.broadcast %428 : vector<32x1xf32> to vector<32x32xf32>
    %430 = arith.subf %426, %429 : vector<32x32xf32>
    %431 = math.exp %430 : vector<32x32xf32>
    %cst_269 = arith.constant dense<0.000000e+00> : vector<32xf32>
    %432 = vector.multi_reduction <add>, %431, %cst_269 [1] : vector<32x32xf32> to vector<32xf32>
    %433 = vector.shape_cast %432 : vector<32xf32> to vector<32x1xf32>
    %434 = tpu.reciprocal %433 {approx = true} : vector<32x1xf32> -> vector<32x1xf32>
    %435 = vector.broadcast %434 : vector<32x1xf32> to vector<32x32xf32>
    %436 = arith.mulf %431, %435 : vector<32x32xf32>
    %437 = arith.truncf %436 : vector<32x32xf32> to vector<32x32xbf16>
    %438 = arith.truncf %422 : vector<32x16xf32> to vector<32x16xbf16>
    %cst_270 = arith.constant dense<0.000000e+00> : vector<32x16xf32>
    %439 = tpu.matmul %437, %438, %cst_270 {dimension_numbers = #tpu.dot_dimension_numbers<[1], [0], [0], [1], [0, 0, 1, 1], [], []>} : vector<32x32xbf16>, vector<32x16xbf16>, vector<32x16xf32> -> vector<32x16xf32>
    %440 = arith.truncf %439 : vector<32x16xf32> to vector<32x16xbf16>
    %c2_271 = arith.constant 2 : index
    %c0_272 = arith.constant 0 : index
    %c0_273 = arith.constant 0 : index
    %441 = vector.load %arg5[%c2_271, %c0_272, %c0_273] : memref<4x16x32xbf16, #tpu.memory_space<vmem>>, vector<1x16x32xbf16>
    %442 = vector.shape_cast %441 : vector<1x16x32xbf16> to vector<16x32xbf16>
    %cst_274 = arith.constant dense<0.000000e+00> : vector<32x32xf32>
    %443 = tpu.matmul %440, %442, %cst_274 {dimension_numbers = #tpu.dot_dimension_numbers<[1], [0], [0], [1], [0, 0, 1, 1], [], []>} : vector<32x16xbf16>, vector<16x32xbf16>, vector<32x32xf32> -> vector<32x32xf32>
    %444 = arith.addf %404, %443 : vector<32x32xf32>
    %c7_275 = arith.constant 7 : index
    %c0_276 = arith.constant 0 : index
    %c0_277 = arith.constant 0 : index
    %445 = vector.load %arg3[%c7_275, %c0_276, %c0_277] : memref<12x32x16xbf16, #tpu.memory_space<vmem>>, vector<1x32x16xbf16>
    %446 = vector.shape_cast %445 : vector<1x32x16xbf16> to vector<32x16xbf16>
    %cst_278 = arith.constant dense<0.000000e+00> : vector<32x16xf32>
    %447 = tpu.matmul %403, %446, %cst_278 {dimension_numbers = #tpu.dot_dimension_numbers<[1], [0], [0], [1], [0, 0, 1, 1], [], []>} : vector<32x32xbf16>, vector<32x16xbf16>, vector<32x16xf32> -> vector<32x16xf32>
    %c7_279 = arith.constant 7 : index
    %c0_280 = arith.constant 0 : index
    %448 = vector.load %arg4[%c7_279, %c0_280] : memref<12x16xf32, #tpu.memory_space<vmem>>, vector<1x16xf32>
    %449 = vector.broadcast %448 : vector<1x16xf32> to vector<32x16xf32>
    %450 = arith.addf %447, %449 : vector<32x16xf32>
    %c9_281 = arith.constant 9 : index
    %c0_282 = arith.constant 0 : index
    %c0_283 = arith.constant 0 : index
    %451 = vector.load %arg3[%c9_281, %c0_282, %c0_283] : memref<12x32x16xbf16, #tpu.memory_space<vmem>>, vector<1x32x16xbf16>
    %452 = vector.shape_cast %451 : vector<1x32x16xbf16> to vector<32x16xbf16>
    %cst_284 = arith.constant dense<0.000000e+00> : vector<32x16xf32>
    %453 = tpu.matmul %403, %452, %cst_284 {dimension_numbers = #tpu.dot_dimension_numbers<[1], [0], [0], [1], [0, 0, 1, 1], [], []>} : vector<32x32xbf16>, vector<32x16xbf16>, vector<32x16xf32> -> vector<32x16xf32>
    %c9_285 = arith.constant 9 : index
    %c0_286 = arith.constant 0 : index
    %454 = vector.load %arg4[%c9_285, %c0_286] : memref<12x16xf32, #tpu.memory_space<vmem>>, vector<1x16xf32>
    %455 = vector.broadcast %454 : vector<1x16xf32> to vector<32x16xf32>
    %456 = arith.addf %453, %455 : vector<32x16xf32>
    %c11_287 = arith.constant 11 : index
    %c0_288 = arith.constant 0 : index
    %c0_289 = arith.constant 0 : index
    %457 = vector.load %arg3[%c11_287, %c0_288, %c0_289] : memref<12x32x16xbf16, #tpu.memory_space<vmem>>, vector<1x32x16xbf16>
    %458 = vector.shape_cast %457 : vector<1x32x16xbf16> to vector<32x16xbf16>
    %cst_290 = arith.constant dense<0.000000e+00> : vector<32x16xf32>
    %459 = tpu.matmul %403, %458, %cst_290 {dimension_numbers = #tpu.dot_dimension_numbers<[1], [0], [0], [1], [0, 0, 1, 1], [], []>} : vector<32x32xbf16>, vector<32x16xbf16>, vector<32x16xf32> -> vector<32x16xf32>
    %c11_291 = arith.constant 11 : index
    %c0_292 = arith.constant 0 : index
    %460 = vector.load %arg4[%c11_291, %c0_292] : memref<12x16xf32, #tpu.memory_space<vmem>>, vector<1x16xf32>
    %461 = vector.broadcast %460 : vector<1x16xf32> to vector<32x16xf32>
    %462 = arith.addf %459, %461 : vector<32x16xf32>
    %463 = arith.truncf %450 : vector<32x16xf32> to vector<32x16xbf16>
    %464 = arith.truncf %456 : vector<32x16xf32> to vector<32x16xbf16>
    %cst_293 = arith.constant dense<0.000000e+00> : vector<32x32xf32>
    %465 = tpu.matmul %463, %464, %cst_293 {dimension_numbers = #tpu.dot_dimension_numbers<[1], [1], [0], [0], [0, 0, 1, 0], [], []>} : vector<32x16xbf16>, vector<32x16xbf16>, vector<32x32xf32> -> vector<32x32xf32>
    %466 = arith.addf %465, %21 : vector<32x32xf32>
    %cst_294 = arith.constant dense<0xFF800000> : vector<32xf32>
    %467 = vector.multi_reduction <maximumf>, %466, %cst_294 [1] : vector<32x32xf32> to vector<32xf32>
    %468 = vector.shape_cast %467 : vector<32xf32> to vector<32x1xf32>
    %469 = vector.broadcast %468 : vector<32x1xf32> to vector<32x32xf32>
    %470 = arith.subf %466, %469 : vector<32x32xf32>
    %471 = math.exp %470 : vector<32x32xf32>
    %cst_295 = arith.constant dense<0.000000e+00> : vector<32xf32>
    %472 = vector.multi_reduction <add>, %471, %cst_295 [1] : vector<32x32xf32> to vector<32xf32>
    %473 = vector.shape_cast %472 : vector<32xf32> to vector<32x1xf32>
    %474 = tpu.reciprocal %473 {approx = true} : vector<32x1xf32> -> vector<32x1xf32>
    %475 = vector.broadcast %474 : vector<32x1xf32> to vector<32x32xf32>
    %476 = arith.mulf %471, %475 : vector<32x32xf32>
    %477 = arith.truncf %476 : vector<32x32xf32> to vector<32x32xbf16>
    %478 = arith.truncf %462 : vector<32x16xf32> to vector<32x16xbf16>
    %cst_296 = arith.constant dense<0.000000e+00> : vector<32x16xf32>
    %479 = tpu.matmul %477, %478, %cst_296 {dimension_numbers = #tpu.dot_dimension_numbers<[1], [0], [0], [1], [0, 0, 1, 1], [], []>} : vector<32x32xbf16>, vector<32x16xbf16>, vector<32x16xf32> -> vector<32x16xf32>
    %480 = arith.truncf %479 : vector<32x16xf32> to vector<32x16xbf16>
    %c3_297 = arith.constant 3 : index
    %c0_298 = arith.constant 0 : index
    %c0_299 = arith.constant 0 : index
    %481 = vector.load %arg5[%c3_297, %c0_298, %c0_299] : memref<4x16x32xbf16, #tpu.memory_space<vmem>>, vector<1x16x32xbf16>
    %482 = vector.shape_cast %481 : vector<1x16x32xbf16> to vector<16x32xbf16>
    %cst_300 = arith.constant dense<0.000000e+00> : vector<32x32xf32>
    %483 = tpu.matmul %480, %482, %cst_300 {dimension_numbers = #tpu.dot_dimension_numbers<[1], [0], [0], [1], [0, 0, 1, 1], [], []>} : vector<32x16xbf16>, vector<16x32xbf16>, vector<32x32xf32> -> vector<32x32xf32>
    %484 = arith.addf %444, %483 : vector<32x32xf32>
    %c32_301 = arith.constant 32 : index
    %c0_302 = arith.constant 0 : index
    %485 = vector.load %arg12[%c32_301, %c0_302] : memref<64x32xf32, #tpu.memory_space<vmem>>, vector<32x32xf32>
    tpu.vector_store %arg12[%c32_301, %c0_302], %484 {strides = array<i32>} : memref<64x32xf32, #tpu.memory_space<vmem>>, vector<32x32xf32>,
    %c0_303 = arith.constant 0 : index
    %c0_304 = arith.constant 0 : index
    %486 = vector.load %arg12[%c0_303, %c0_304] : memref<64x32xf32, #tpu.memory_space<vmem>>, vector<64x32xf32>
    %487 = arith.addf %280, %486 : vector<64x32xf32>
    %488 = vector.broadcast %286 : vector<1x32xf32> to vector<64x32xf32>
    %489 = arith.addf %487, %488 : vector<64x32xf32>
    %cst_305 = arith.constant dense<0.000000e+00> : vector<64xf32>
    %490 = vector.multi_reduction <add>, %489, %cst_305 [1] : vector<64x32xf32> to vector<64xf32>
    %491 = vector.shape_cast %490 : vector<64xf32> to vector<64x1xf32>
    %cst_306 = arith.constant 3.125000e-02 : f32
    %492 = vector.broadcast %cst_306 : f32 to vector<64x1xf32>
    %493 = arith.mulf %491, %492 : vector<64x1xf32>
    %494 = arith.mulf %489, %489 : vector<64x32xf32>
    %cst_307 = arith.constant dense<0.000000e+00> : vector<64xf32>
    %495 = vector.multi_reduction <add>, %494, %cst_307 [1] : vector<64x32xf32> to vector<64xf32>
    %496 = vector.shape_cast %495 : vector<64xf32> to vector<64x1xf32>
    %cst_308 = arith.constant 3.125000e-02 : f32
    %497 = vector.broadcast %cst_308 : f32 to vector<64x1xf32>
    %498 = arith.mulf %496, %497 : vector<64x1xf32>
    %499 = arith.mulf %493, %493 : vector<64x1xf32>
    %500 = arith.subf %498, %499 : vector<64x1xf32>
    %cst_309 = arith.constant 0.000000e+00 : f32
    %501 = vector.broadcast %cst_309 : f32 to vector<64x1xf32>
    %502 = arith.maximumf %500, %501 : vector<64x1xf32>
    %503 = vector.broadcast %493 : vector<64x1xf32> to vector<64x32xf32>
    %504 = arith.subf %489, %503 : vector<64x32xf32>
    %cst_310 = arith.constant 9.99999996E-13 : f32
    %505 = vector.broadcast %cst_310 : f32 to vector<64x1xf32>
    %506 = arith.addf %502, %505 : vector<64x1xf32>
    %507 = math.rsqrt %506 : vector<64x1xf32>
    %508 = vector.broadcast %507 : vector<64x1xf32> to vector<64x32xf32>
    %509 = arith.mulf %504, %508 : vector<64x32xf32>
    %510 = vector.broadcast %288 : vector<1x32xf32> to vector<64x32xf32>
    %511 = arith.mulf %509, %510 : vector<64x32xf32>
    %512 = vector.broadcast %290 : vector<1x32xf32> to vector<64x32xf32>
    %513 = arith.addf %511, %512 : vector<64x32xf32>
    %514 = arith.truncf %513 : vector<64x32xf32> to vector<64x32xbf16>
    %c1_311 = arith.constant 1 : index
    %c0_312 = arith.constant 0 : index
    %c0_313 = arith.constant 0 : index
    %515 = vector.load %arg6[%c1_311, %c0_312, %c0_313] : memref<2x32x128xbf16, #tpu.memory_space<vmem>>, vector<1x32x128xbf16>
    %516 = vector.shape_cast %515 : vector<1x32x128xbf16> to vector<32x128xbf16>
    %cst_314 = arith.constant dense<0.000000e+00> : vector<64x128xf32>
    %517 = tpu.matmul %514, %516, %cst_314 {dimension_numbers = #tpu.dot_dimension_numbers<[1], [0], [0], [1], [0, 0, 1, 1], [], []>} : vector<64x32xbf16>, vector<32x128xbf16>, vector<64x128xf32> -> vector<64x128xf32>
    %518 = vector.broadcast %292 : vector<1x128xf32> to vector<64x128xf32>
    %519 = arith.addf %517, %518 : vector<64x128xf32>
    %520 = arith.mulf %519, %519 : vector<64x128xf32>
    %521 = arith.mulf %519, %520 : vector<64x128xf32>
    %cst_315 = arith.constant 4.471500e-02 : f32
    %522 = vector.broadcast %cst_315 : f32 to vector<64x128xf32>
    %523 = arith.mulf %522, %521 : vector<64x128xf32>
    %524 = arith.addf %519, %523 : vector<64x128xf32>
    %cst_316 = arith.constant 0.797884583 : f32
    %525 = vector.broadcast %cst_316 : f32 to vector<64x128xf32>
    %526 = arith.mulf %525, %524 : vector<64x128xf32>
    %527 = math.tanh %526 : vector<64x128xf32>
    %cst_317 = arith.constant 1.000000e+00 : f32
    %528 = vector.broadcast %cst_317 : f32 to vector<64x128xf32>
    %529 = arith.addf %528, %527 : vector<64x128xf32>
    %cst_318 = arith.constant 5.000000e-01 : f32
    %530 = vector.broadcast %cst_318 : f32 to vector<64x128xf32>
    %531 = arith.mulf %530, %529 : vector<64x128xf32>
    %532 = arith.mulf %519, %531 : vector<64x128xf32>
    %533 = arith.truncf %532 : vector<64x128xf32> to vector<64x128xbf16>
    %c1_319 = arith.constant 1 : index
    %c0_320 = arith.constant 0 : index
    %c0_321 = arith.constant 0 : index
    %534 = vector.load %arg7[%c1_319, %c0_320, %c0_321] : memref<2x128x32xbf16, #tpu.memory_space<vmem>>, vector<1x128x32xbf16>
    %535 = vector.shape_cast %534 : vector<1x128x32xbf16> to vector<128x32xbf16>
    %cst_322 = arith.constant dense<0.000000e+00> : vector<64x32xf32>
    %536 = tpu.matmul %533, %535, %cst_322 {dimension_numbers = #tpu.dot_dimension_numbers<[1], [0], [0], [1], [0, 0, 1, 1], [], []>} : vector<64x128xbf16>, vector<128x32xbf16>, vector<64x32xf32> -> vector<64x32xf32>
    %537 = arith.addf %489, %536 : vector<64x32xf32>
    %538 = vector.broadcast %294 : vector<1x32xf32> to vector<64x32xf32>
    %539 = arith.addf %537, %538 : vector<64x32xf32>
    %540 = vector.extract_strided_slice %539 {offsets = [0, 0], sizes = [1, 32], strides = [1, 1]} : vector<64x32xf32> to vector<1x32xf32>
    %541 = vector.extract_strided_slice %539 {offsets = [32, 0], sizes = [1, 32], strides = [1, 1]} : vector<64x32xf32> to vector<1x32xf32>
    %542 = tpu.concatenate %540, %541 in 0 : vector<1x32xf32>, vector<1x32xf32> -> vector<2x32xf32>
    %c0_323 = arith.constant 0 : index
    %c0_324 = arith.constant 0 : index
    %543 = vector.load %arg10[%c0_323, %c0_324] : memref<3x128xf32, #tpu.memory_space<vmem>>, vector<1x32xf32>
    %c1_325 = arith.constant 1 : index
    %c0_326 = arith.constant 0 : index
    %544 = vector.load %arg10[%c1_325, %c0_326] : memref<3x128xf32, #tpu.memory_space<vmem>>, vector<1x32xf32>
    %c2_327 = arith.constant 2 : index
    %c0_328 = arith.constant 0 : index
    %545 = vector.load %arg10[%c2_327, %c0_328] : memref<3x128xf32, #tpu.memory_space<vmem>>, vector<1x10xf32>
    %cst_329 = arith.constant dense<0.000000e+00> : vector<2xf32>
    %546 = vector.multi_reduction <add>, %542, %cst_329 [1] : vector<2x32xf32> to vector<2xf32>
    %547 = vector.shape_cast %546 : vector<2xf32> to vector<2x1xf32>
    %cst_330 = arith.constant 3.125000e-02 : f32
    %548 = vector.broadcast %cst_330 : f32 to vector<2x1xf32>
    %549 = arith.mulf %547, %548 : vector<2x1xf32>
    %550 = arith.mulf %542, %542 : vector<2x32xf32>
    %cst_331 = arith.constant dense<0.000000e+00> : vector<2xf32>
    %551 = vector.multi_reduction <add>, %550, %cst_331 [1] : vector<2x32xf32> to vector<2xf32>
    %552 = vector.shape_cast %551 : vector<2xf32> to vector<2x1xf32>
    %cst_332 = arith.constant 3.125000e-02 : f32
    %553 = vector.broadcast %cst_332 : f32 to vector<2x1xf32>
    %554 = arith.mulf %552, %553 : vector<2x1xf32>
    %555 = arith.mulf %549, %549 : vector<2x1xf32>
    %556 = arith.subf %554, %555 : vector<2x1xf32>
    %cst_333 = arith.constant 0.000000e+00 : f32
    %557 = vector.broadcast %cst_333 : f32 to vector<2x1xf32>
    %558 = arith.maximumf %556, %557 : vector<2x1xf32>
    %559 = vector.broadcast %549 : vector<2x1xf32> to vector<2x32xf32>
    %560 = arith.subf %542, %559 : vector<2x32xf32>
    %cst_334 = arith.constant 9.99999996E-13 : f32
    %561 = vector.broadcast %cst_334 : f32 to vector<2x1xf32>
    %562 = arith.addf %558, %561 : vector<2x1xf32>
    %563 = math.rsqrt %562 : vector<2x1xf32>
    %564 = vector.broadcast %563 : vector<2x1xf32> to vector<2x32xf32>
    %565 = arith.mulf %560, %564 : vector<2x32xf32>
    %566 = vector.broadcast %543 : vector<1x32xf32> to vector<2x32xf32>
    %567 = arith.mulf %565, %566 : vector<2x32xf32>
    %568 = vector.broadcast %544 : vector<1x32xf32> to vector<2x32xf32>
    %569 = arith.addf %567, %568 : vector<2x32xf32>
    %c0_335 = arith.constant 0 : index
    %c0_336 = arith.constant 0 : index
    %570 = vector.load %arg9[%c0_335, %c0_336] : memref<32x10xf32, #tpu.memory_space<vmem>>, vector<32x10xf32>
    %cst_337 = arith.constant dense<0.000000e+00> : vector<2x10xf32>
    %571 = tpu.matmul %569, %570, %cst_337 {dimension_numbers = #tpu.dot_dimension_numbers<[1], [0], [0], [1], [0, 0, 1, 1], [], []>} : vector<2x32xf32>, vector<32x10xf32>, vector<2x10xf32> -> vector<2x10xf32>
    %572 = vector.broadcast %545 : vector<1x10xf32> to vector<2x10xf32>
    %573 = arith.addf %571, %572 : vector<2x10xf32>
    %c0_338 = arith.constant 0 : index
    %c0_339 = arith.constant 0 : index
    %574 = vector.load %arg11[%c0_338, %c0_339] : memref<2x10xf32, #tpu.memory_space<vmem>>, vector<2x10xf32>
    tpu.vector_store %arg11[%c0_338, %c0_339], %573 {strides = array<i32>} : memref<2x10xf32, #tpu.memory_space<vmem>>, vector<2x10xf32>,
    return
  }
}

</mosaic_0001>

<bundles_post_ra>
// kernel: vit_forward.1
= control target key start
LH: loop header
LB: loop body
LE: loop exit
PB: predicated region body
PF: predicated region fallthrough
CT: control target
= control target key end

     0   :  { %vm50_vm0 = vcmask 392192   ;;  %s6016_s0 = inlined_call_operand.vmem [shape: f32[32,48], index: 0, kind: input, shape index: {}]   ;;  %s6017_s1 = inlined_call_operand.vmem [shape: f32[48,32], index: 1, kind: input, shape index: {}]   ;;  %s6018_s2 = inlined_call_operand.vmem [shape: f32[17,32], index: 2, kind: input, shape index: {}]   ;;  %s6019_s3 = inlined_call_operand.vmem [shape: bf16[12,32,16], index: 3, kind: input, shape index: {}]   ;;  %s6020_s4 = inlined_call_operand.vmem [shape: f32[12,16], index: 4, kind: input, shape index: {}]   ;;  %s6021_s5 = inlined_call_operand.vmem [shape: bf16[4,16,32], index: 5, kind: input, shape index: {}]   ;;  %s6022_s6 = inlined_call_operand.vmem [shape: bf16[2,32,128], index: 6, kind: input, shape index: {}]   ;;  %s6023_s7 = inlined_call_operand.vmem [shape: bf16[2,128,32], index: 7, kind: input, shape index: {}]   ;;  %s6024_s8 = inlined_call_operand.vmem [shape: f32[2,7,128], index: 8, kind: input, shape index: {}]   ;;  %s6025_s9 = inlined_call_operand.vmem [shape: f32[32,10], index: 9, kind: input, shape index: {}]   ;;  %s6026_s10 = inlined_call_operand.vmem [shape: f32[3,128], index: 10, kind: input, shape index: {}]   ;;  %s6027_s11 = inlined_call_operand.hbm [shape: f32[2,10], index: 11, kind: output, shape index: {}]  }
   0x1   :  { %v49_v0 = vld [vmem:[%s6017_s1 + $0x28] sm:$0xff]  ;;  %v48_v1 = vld [vmem:[%s6017_s1 + $0x20] sm:$0xff]  ;;  %v47_v2 = vld [vmem:[%s6017_s1 + $0x18] sm:$0xff] }
   0x2   :  { %73 = vmatpush.msra.mxu0 %v49_v0  ;;  %v46_v3 = vld [vmem:[%s6017_s1 + $0x10] sm:$0xff]  ;;  %v45_v4 = vld [vmem:[%s6017_s1 + $0x8] sm:$0xff]  ;;  %v44_v5 = vld [vmem:[%s6017_s1] sm:$0xff] }
   0x3   :  { %v40_v6 = vld [vmem:[%s6016_s0] sm:$0xff] }
   0x4   :  { %74 = vmatpush.msra.mxu0 %v48_v1 }
   0x6   :  { %75 = vmatpush.msra.mxu0 %v47_v2 }
   0x8   :  { %76 = vmatpush.msra.mxu0 %v46_v3 }
   0xa   :  { %77 = vmatpush.msra.mxu0 %v45_v4 }
   0xc   :  { %78 = vmatpush.msra.mxu0 %v44_v5 }
   0xd   :  { %3771 = vmatmul.msk.f32.vlgmr.msra.gmra.mxu0 %vm50_vm0, %v40_v6 }
   0xe   :  { %16 = vsyncpa [#allocation4], 0  ;;  %v41_v7 = vld [vmem:[%s6016_s0 + $0x8] sm:$0xff]  ;;  %vm92_vm1 = vcmask 261120   ;;  %v101_v8 = vld [vmem:[%s6018_s2] sm:$0x1] }
   0xf   :  { %vm104_vm2 = vcmask 253952   ;;  %v4688_v9 = vmov 0.0   ;;  %v4791_v10 = vld [vmem:[%s6018_s2 + $0x1] sm:$0xff]  ;;  %v4798_v13 = vld [vmem:[%s6018_s2 + $0x9] sm:$0xff]  ;;  %v43_v35 = vld [vmem:[%s6016_s0 + $0x18] sm:$0xff]  ;;  %vm493_vm15 = vcmask 130048  }
  0x10   :  { %93 = vst.msk [vmem:[#allocation2] sm:$0xff] %vm92_vm1, %v4688_v9  ;;  %v42_v32 = vld [vmem:[%s6016_s0 + $0x10] sm:$0xff]  ;;  %v4314_v45 = vld [vmem:[%s6019_s3 + $0x28] sm:$0xff]  ;;  %v4311_v51 = vld [vmem:[%s6019_s3] sm:$0xff]  ;;  %s4690_s17 = smov [#allocation3]   ;;  %s3762_s20 = sshll.u32 %s6027_s11, 4  ;;  %s3763_s20 = int_to_ptr.hbm [resolvable:$true] %s3762_s20 }
  0x11   :  { %94 = vst.msk [vmem:[#allocation2 + $0x8] sm:$0xff] %vm92_vm1, %v4688_v9  ;;  %v4312_v46 = vld [vmem:[%s6019_s3 + $0x8] sm:$0xff]  ;;  %438 = vmatpush.bf16.msrb.mxu0 %v4314_v45  ;;  %v4313_v52 = vld [vmem:[%s6019_s3 + $0x20] sm:$0xff]  ;;  %s3760_s18 = sshll.u32 %s4690_s17, 4  ;;  %s3761_s18 = int_to_ptr.vmem [resolvable:$true] %s3760_s18 }
  0x12   :  { %105 = vst.msk [vmem:[#allocation2] sm:$0x1] %vm104_vm2, %v101_v8  ;;  %400 = vmatpush.bf16.msra.mxu1 %v4312_v46  ;;  %v4316_v61 = vld [vmem:[%s6019_s3 + $0x48] sm:$0xff] }
  0x13   :  { %95 = vst.msk [vmem:[#allocation2 + $0x10] sm:$0xff] %vm92_vm1, %v4688_v9  ;;  %4387 = vmatpush.bf16.msra.mxu3 %v4316_v61 }
  0x14   :  { %96 = vst.msk [vmem:[#allocation2 + $0x18] sm:$0xff] %vm92_vm1, %v4688_v9 }
  0x15   :  { %3772 = vmatmul.msk.f32.gmra.mxu0 %vm50_vm0, %v41_v7  ;;  %97 = vst.msk [vmem:[#allocation2 + $0x20] sm:$0xff] %vm92_vm1, %v4688_v9  ;;  %v4315_v7 = vld [vmem:[%s6019_s3 + $0x40] sm:$0xff] }
  0x16   :  { %98 = vst.msk [vmem:[#allocation2 + $0x28] sm:$0xff] %vm92_vm1, %v4688_v9  ;;  %401 = vmatpush.bf16.msra.mxu1 %v4311_v51  ;;  %439 = vmatpush.bf16.msrb.mxu0 %v4313_v52  ;;  %v4321_v52 = vld [vmem:[%s6019_s3 + $0x38] sm:$0xff] }
  0x17   :  { %99 = vst.msk [vmem:[#allocation2 + $0x30] sm:$0xff] %vm92_vm1, %v4688_v9  ;;  %4388 = vmatpush.bf16.msra.mxu3 %v4315_v7 }
  0x18   :  { %100 = vst.msk [vmem:[#allocation2 + $0x38] sm:$0xff] %vm92_vm1, %v4688_v9 }
  0x19   :  { %110 = vst.msk [vmem:[#allocation2 + $0x20] sm:$0x1] %vm104_vm2, %v101_v8 }
  0x1a   :  { %476 = vmatpush.bf16.msrb.mxu1 %v4316_v61  ;;  %665 = vmatpush.bf16.msra.mxu0 %v4321_v52 }
  0x1b   :  { %v4819_v25 = vld [vmem:[#allocation2 + $0x18] sm:$0xff] }
  0x1c   :  { %v169_v28 = vmul.f32 %v4819_v25, %v4819_v25  ;;  %v143_v29 = vsel %vm92_vm1, %v4819_v25, 0.0 }
  0x1d   :  { %3773 = vmatmul.msk.f32.gmra.mxu0 %vm50_vm0, %v42_v32  ;;  %v4319_v32 = vld [vmem:[%s6019_s3 + $0x18] sm:$0xff] }
  0x1e   :  { %v183_v31 = vsel %vm92_vm1, %v169_v28, 0.0  ;;  %477 = vmatpush.bf16.msrb.mxu1 %v4315_v7  ;;  %627 = vmatpush.bf16.msrb.mxu3 %v4319_v32 }
  0x25   :  { %3774 = vmatmul.msk.f32.gmra.mxu0 %vm50_vm0, %v43_v35 }
  0x8a   :  { %v80_v11 = vpop.f32.mrf.mxu0 }
  0x8b   :  { %v106_v12 = vadd.f32 %v4791_v10, %v80_v11 }
  0x8d   :  { %108 = vst.msk [vmem:[#allocation2 + $0x1] sm:$0xff] %vm92_vm1, %v106_v12 }
  0x92   :  { %v83_v14 = vpop.f32.mrf.mxu0 }
  0x93   :  { %v107_v15 = vadd.f32 %v4798_v13, %v83_v14 }
  0x94   :  { %v4801_v16 = vld [vmem:[#allocation2] sm:$0xff] }
  0x95   :  { %109 = vst.msk [vmem:[#allocation2 + $0x9] sm:$0xff] %vm92_vm1, %v107_v15  ;;  %v134_v17 = vsel %vm92_vm1, %v4801_v16, 0.0  ;;  %v166_v18 = vmul.f32 %v4801_v16, %v4801_v16 }
  0x96   :  { %135 = vadd.xlane.f32.xlu0 %v134_v17 }
  0x97   :  { %v174_v19 = vsel %vm92_vm1, %v166_v18, 0.0 }
  0x98   :  { %175 = vadd.xlane.f32.xlu1 %v174_v19 }
  0x9c   :  { %v4809_v20 = vld [vmem:[#allocation2 + $0x10] sm:$0xff]  ;;  %v4811_v21 = vld [vmem:[#allocation2 + $0x8] sm:$0xff] }
  0x9d   :  { %v140_v22 = vsel %vm92_vm1, %v4809_v20, 0.0  ;;  %v137_v23 = vsel %vm92_vm1, %v4811_v21, 0.0  ;;  %v167_v24 = vmul.f32 %v4811_v21, %v4811_v21  ;;  %v168_v27 = vmul.f32 %v4809_v20, %v4809_v20 }
  0x9e   :  { %141 = vadd.xlane.f32.xlu2 %v140_v22  ;;  %138 = vadd.xlane.f32.xlu0 %v137_v23 }
  0x9f   :  { %v177_v26 = vsel %vm92_vm1, %v167_v24, 0.0  ;;  %v180_v30 = vsel %vm92_vm1, %v168_v27, 0.0  ;;  %v4877_v24 = vld [vmem:[%s6024_s8] ss:$0 sm:$0xff] }
  0xa0   :  { %178 = vadd.xlane.f32.xlu1 %v177_v26 }
  0xa6   :  { %144 = vadd.xlane.f32.xlu2 %v143_v29  ;;  %181 = vadd.xlane.f32.xlu0 %v180_v30 }
  0xa8   :  { %184 = vadd.xlane.f32.xlu1 %v183_v31 }
 0x109   :  { %v136_v33 = vpop.xlane.xlu0 %135 }
 0x10a   :  { %v4834_v34 = vmul.f32 0.03125, %v136_v33  ;;  %v4885_v33 = vld [vmem:[%s6024_s8 + $0x1] ss:$0 sm:$0xff] }
 0x10b   :  { %v176_v36 = vpop.xlane.xlu1 %175 }
 0x10c   :  { %v206_v37 = vmul.f32 %v4834_v34, %v4834_v34  ;;  %v198_v38 = vmul.f32 0.03125, %v176_v36  ;;  %v230_v19 = vsub.f32 %v4801_v16, %v4834_v34 }
 0x10e   :  { %v214_v39 = vsub.f32 %v198_v38, %v206_v37  ;;  %v4318_v38 = vld [vmem:[%s6019_s3 + $0x10] sm:$0xff] }
 0x10f   :  { %628 = vmatpush.bf16.msrb.mxu3 %v4318_v38 }
 0x110   :  { %v222_v40 = vmax.f32 %v214_v39, 0.0 }
 0x111   :  { %v142_v41 = vpop.xlane.xlu2 %141  ;;  %v139_v42 = vpop.xlane.xlu0 %138 }
 0x112   :  { %v238_v43 = vadd.f32 1e-12, %v222_v40  ;;  %v4842_v44 = vmul.f32 0.03125, %v139_v42  ;;  %v4852_v50 = vmul.f32 0.03125, %v142_v41 }
 0x113   :  { %v179_v47 = vpop.xlane.xlu1 %178 }
 0x114   :  { %4433 = vrsqrt.f32 %v238_v43  ;;  %v207_v48 = vmul.f32 %v4842_v44, %v4842_v44  ;;  %v199_v49 = vmul.f32 0.03125, %v179_v47  ;;  %v208_v58 = vmul.f32 %v4852_v50, %v4852_v50 }
 0x115   :  { %vm252_vm4 = vweird.f32 %v238_v43  ;;  %v231_v39 = vsub.f32 %v4811_v21, %v4842_v44  ;;  %v232_v44 = vsub.f32 %v4809_v20, %v4852_v50  ;;  %v4320_v50 = vld [vmem:[%s6019_s3 + $0x30] sm:$0xff] }
 0x116   :  { %v215_v53 = vsub.f32 %v199_v49, %v207_v48  ;;  %666 = vmatpush.bf16.msra.mxu0 %v4320_v50  ;;  %v4398_v50 = vld [vmem:[%s6020_s4 + $0x3] ss:$0 sm:$0xff] }
 0x118   :  { %v223_v54 = vmax.f32 %v215_v53, 0.0 }
 0x119   :  { %v145_v55 = vpop.xlane.xlu2 %144  ;;  %v182_v56 = vpop.xlane.xlu0 %181 }
 0x11a   :  { %v4434_v57 = vpop.eup %4433  ;;  %v4862_v59 = vmul.f32 0.03125, %v145_v55  ;;  %v200_v60 = vmul.f32 0.03125, %v182_v56  ;;  %v239_v63 = vadd.f32 1e-12, %v223_v54 }
 0x11b   :  { %v247_v62 = vmul.f32 %v4434_v57, %v238_v43  ;;  %v185_v0 = vpop.xlane.xlu1 %184  ;;  %vm253_vm3 = vweird.f32 %v4434_v57 }
 0x11c   :  { %v209_v1 = vmul.f32 %v4862_v59, %v4862_v59  ;;  %v216_v2 = vsub.f32 %v200_v60, %v208_v58  ;;  %v201_v3 = vmul.f32 0.03125, %v185_v0  ;;  %4435 = vrsqrt.f32 %v239_v63  ;;  %vm254_vm5 = vmor %vm252_vm4, %vm253_vm3 }
 0x11d   :  { %v248_v4 = vmul.f32 %v4434_v57, %v247_v62  ;;  %vm262_vm7 = vweird.f32 %v239_v63 }
 0x11e   :  { %v224_v5 = vmax.f32 %v216_v2, 0.0  ;;  %v217_v6 = vsub.f32 %v201_v3, %v209_v1 }
 0x11f   :  { %v249_v8 = vmul.f32 0.5, %v248_v4 }
 0x120   :  { %v240_v9 = vadd.f32 1e-12, %v224_v5  ;;  %v225_v11 = vmax.f32 %v217_v6, 0.0 }
 0x121   :  { %v250_v12 = vsub.f32 1.5, %v249_v8 }
 0x122   :  { %4437 = vrsqrt.f32 %v240_v9  ;;  %v241_v14 = vadd.f32 1e-12, %v225_v11  ;;  %v4436_v15 = vpop.eup %4435  ;;  %vm272_vm10 = vweird.f32 %v240_v9  ;;  %v86_v11 = vpop.f32.mrf.mxu0 }
 0x123   :  { %v251_v17 = vmul.f32 %v4434_v57, %v250_v12  ;;  %v257_v18 = vmul.f32 %v4436_v15, %v239_v63  ;;  %vm263_vm6 = vweird.f32 %v4436_v15  ;;  %v111_v12 = vadd.f32 %v4791_v10, %v86_v11 }
 0x124   :  { %4439 = vrsqrt.f32 %v241_v14  ;;  %vm264_vm8 = vmor %vm262_vm7, %vm263_vm6  ;;  %vm282_vm11 = vweird.f32 %v241_v14  ;;  %v4689_v11 = vmov -1e+30  }
 0x125   :  { %v255_v22 = vsel %vm254_vm5, %v4434_v57, %v251_v17  ;;  %v258_v23 = vmul.f32 %v4436_v15, %v257_v18  ;;  %v233_v57 = vsub.f32 %v4819_v25, %v4862_v59  ;;  %113 = vst.msk [vmem:[#allocation2 + $0x21] sm:$0xff] %vm92_vm1, %v111_v12 }
 0x126   :  { %v326_v26 = vmul.f32 %v255_v22, %v230_v19 }
 0x127   :  { %v259_v28 = vmul.f32 0.5, %v258_v23 }
 0x128   :  { %v4438_v27 = vpop.eup %4437  ;;  %v335_v34 = vmul.f32 %v4877_v24, %v326_v26 }
 0x129   :  { %v267_v29 = vmul.f32 %v4438_v27, %v240_v9  ;;  %v260_v31 = vsub.f32 1.5, %v259_v28  ;;  %vm273_vm9 = vweird.f32 %v4438_v27  ;;  %v4396_v28 = vld [vmem:[%s6020_s4 + $0x4] ss:$0 sm:$0xff] }
 0x12a   :  { %v4440_v30 = vpop.eup %4439  ;;  %v344_v43 = vadd.f32 %v4885_v33, %v335_v34  ;;  %vm274_vm13 = vmor %vm272_vm10, %vm273_vm9 }
 0x12b   :  { %v268_v35 = vmul.f32 %v4438_v27, %v267_v29  ;;  %v277_v36 = vmul.f32 %v4440_v30, %v241_v14  ;;  %v261_v37 = vmul.f32 %v4436_v15, %v260_v31  ;;  %vm283_vm12 = vweird.f32 %v4440_v30  ;;  %v89_v14 = vpop.f32.mrf.mxu0 }
 0x12c   :  { %v352_v53 = vpack.c.bf16 %v344_v43, %v344_v43  ;;  %vm284_vm14 = vmor %vm282_vm11, %vm283_vm12 }
 0x12d   :  { %v269_v40 = vmul.f32 0.5, %v268_v35  ;;  %v278_v41 = vmul.f32 %v4440_v30, %v277_v36  ;;  %v265_v42 = vsel %vm264_vm8, %v4436_v15, %v261_v37  ;;  %v112_v15 = vadd.f32 %v4798_v13, %v89_v14  ;;  %v4395_v13 = vld [vmem:[%s6020_s4 + $0x2] ss:$0 sm:$0xff] }
 0x12e   :  { %v327_v45 = vmul.f32 %v265_v42, %v231_v39  ;;  %v370_v0 = vunpack.c.l.b16 %v352_v53 }
 0x12f   :  { %v270_v46 = vsub.f32 1.5, %v269_v40  ;;  %v279_v47 = vmul.f32 0.5, %v278_v41  ;;  %114 = vst.msk [vmem:[#allocation2 + $0x29] sm:$0xff] %vm92_vm1, %v112_v15 }
 0x130   :  { %v336_v48 = vmul.f32 %v4877_v24, %v327_v45  ;;  %v4323_v45 = vld [vmem:[%s6019_s3 + $0x58] sm:$0xff] }
 0x131   :  { %v271_v49 = vmul.f32 %v4438_v27, %v270_v46  ;;  %v280_v51 = vsub.f32 1.5, %v279_v47  ;;  %v4394_v46 = vld [vmem:[%s6020_s4] ss:$0 sm:$0xff] }
 0x132   :  { %v345_v54 = vadd.f32 %v4885_v33, %v336_v48 }
 0x133   :  { %v275_v55 = vsel %vm274_vm13, %v4438_v27, %v271_v49  ;;  %v281_v56 = vmul.f32 %v4440_v30, %v280_v51  ;;  %v4322_v49 = vld [vmem:[%s6019_s3 + $0x50] sm:$0xff] }
 0x134   :  { %v328_v58 = vmul.f32 %v275_v55, %v232_v44  ;;  %v353_v60 = vpack.c.bf16 %v345_v54, %v345_v54 }
 0x135   :  { %v285_v61 = vsel %vm284_vm14, %v4440_v30, %v281_v56 }
 0x136   :  { %v337_v62 = vmul.f32 %v4877_v24, %v328_v58  ;;  %v329_v63 = vmul.f32 %v285_v61, %v233_v57  ;;  %v371_v1 = vunpack.c.l.b16 %v353_v60 }
 0x138   :  { %v346_v2 = vadd.f32 %v4885_v33, %v337_v62  ;;  %v338_v3 = vmul.f32 %v4877_v24, %v329_v63  ;;  %v4910_v59 = vpack.c.b16 %v371_v1, %v370_v0 }
 0x13a   :  { %v354_v4 = vpack.c.bf16 %v346_v2, %v346_v2  ;;  %v347_v5 = vadd.f32 %v4885_v33, %v338_v3  ;;  %3783 = vmatmul.msk.bf16.vlgmr.msra.gmra.mxu1 %vm92_vm1, %v4910_v59  ;;  %3797 = vmatmul.msk.bf16.vlgmr.msrb.gmra.mxu0 %vm92_vm1, %v4910_v59 }
 0x13c   :  { %v355_v6 = vpack.c.bf16 %v347_v5, %v347_v5  ;;  %v372_v7 = vunpack.c.l.b16 %v354_v4 }
 0x13e   :  { %v373_v8 = vunpack.c.l.b16 %v355_v6 }
 0x140   :  { %v4917_v9 = vpack.c.b16 %v373_v8, %v372_v7  ;;  %v123_v7 = vlaneseq }
 0x142   :  { %3812 = vmatmul.msk.bf16.vlgmr.msra.gmra.mxu3 %vm92_vm1, %v4917_v9  ;;  %v124_v8 = vand.u32 127, %v123_v7 }
 0x144   :  { %vm125_vm0 = vcmp.lt.s32.totalorder %v124_v8, 17 }
 0x145   :  { %v4967_v12 = vsel %vm125_vm0, 0.0, %v4689_v11 }
 0x14a   :  { %3784 = vmatmul.msk.bf16.gmra.mxu1 %vm92_vm1, %v4917_v9  ;;  %3798 = vmatmul.msk.bf16.gmra.mxu0 %vm92_vm1, %v4917_v9 }
 0x152   :  { %3829 = vmatmul.msk.bf16.vlgmr.msrb.gmra.mxu3 %vm92_vm1, %v4910_v59 }
 0x15a   :  { %3811 = vmatmul.msk.bf16.vlgmr.msrb.gmra.mxu1 %vm92_vm1, %v4910_v59  ;;  %3843 = vmatmul.msk.bf16.vlgmr.msra.gmra.mxu0 %vm92_vm1, %v4910_v59 }
 0x162   :  { %3830 = vmatmul.msk.bf16.gmra.mxu3 %vm92_vm1, %v4917_v9 }
 0x16a   :  { %3844 = vmatmul.msk.bf16.gmra.mxu0 %vm92_vm1, %v4917_v9 }
 0x1b7   :  { %v403_v17 = vpop.f32.mrf.mxu1  ;;  %v441_v18 = vpop.f32.mrf.mxu0 }
 0x1b8   :  { %v442_v40 = vadd.f32 %v4395_v13, %v441_v18  ;;  %v404_v52 = vadd.f32 %v4394_v46, %v403_v17 }
 0x1bf   :  { %v405_v19 = vpop.f32.mrf.mxu1  ;;  %v443_v22 = vpop.f32.mrf.mxu0 }
 0x1c0   :  { %v444_v38 = vadd.f32 %v4395_v13, %v443_v22  ;;  %v406_v48 = vadd.f32 %v4394_v46, %v405_v19 }
 0x1c2   :  { %v491_v43 = vpack.c.bf16 %v444_v38, %v442_v40  ;;  %v489_v55 = vpack.c.bf16 %v406_v48, %v404_v52 }
 0x1c4   :  { %v501_v47 = vsel %vm493_vm15, %v491_v43, 0 }
 0x1c5   :  { %v484_v23 = vpop.f32.mrf.mxu3 }
 0x1c6   :  { %v485_v10 = vadd.f32 %v4396_v28, %v484_v23 }
 0x1c7   :  { %v408_v26 = vpop.f32.mrf.mxu1  ;;  %v446_v27 = vpop.f32.mrf.mxu0 }
 0x1c8   :  { %v447_v35 = vadd.f32 %v4395_v13, %v446_v27  ;;  %v409_v61 = vadd.f32 %v4394_v46, %v408_v26 }
 0x1cd   :  { %v486_v29 = vpop.f32.mrf.mxu3 }
 0x1ce   :  { %v487_v30 = vadd.f32 %v4396_v28, %v486_v29 }
 0x1cf   :  { %v410_v31 = vpop.f32.mrf.mxu1  ;;  %v448_v32 = vpop.f32.mrf.mxu0 }
 0x1d0   :  { %v572_v34 = vpack.c.bf16 %v487_v30, %v485_v10  ;;  %v449_v36 = vadd.f32 %v4395_v13, %v448_v32  ;;  %v411_v58 = vadd.f32 %v4394_v46, %v410_v31  ;;  %v4399_v13 = vld [vmem:[%s6020_s4 + $0x5] ss:$0 sm:$0xff] }
 0x1d2   :  { %585 = vmatpush.bf16.msra.mxu2 %v572_v34  ;;  %v492_v37 = vpack.c.bf16 %v449_v36, %v447_v35  ;;  %v490_v0 = vpack.c.bf16 %v411_v58, %v409_v61 }
 0x1d4   :  { %v504_v39 = vsel %vm493_vm15, %v492_v37, 0 }
 0x1d5   :  { %512 = vmatpush.bf16.xpose.msra.mxu1 %v504_v39 }
 0x1d7   :  { %v479_v41 = vpop.f32.mrf.mxu1  ;;  %v668_v42 = vpop.f32.mrf.mxu0 }
 0x1d8   :  { %v480_v53 = vadd.f32 %v4396_v28, %v479_v41  ;;  %v669_v4 = vadd.f32 %v4398_v50, %v668_v42 }
 0x1dd   :  { %513 = vmatpush.bf16.xpose.msra.mxu1 %v501_v47 }
 0x1df   :  { %v481_v51 = vpop.f32.mrf.mxu1  ;;  %v670_v44 = vpop.f32.mrf.mxu0 }
 0x1e0   :  { %v482_v54 = vadd.f32 %v4396_v28, %v481_v51  ;;  %v671_v2 = vadd.f32 %v4398_v50, %v670_v44 }
 0x1e2   :  { %v571_v56 = vpack.c.bf16 %v482_v54, %v480_v53  ;;  %v718_v5 = vpack.c.bf16 %v671_v2, %v669_v4 }
 0x1e4   :  { %3813 = vmatmul.msk.bf16.vlgmr.msra.gmra.mxu1 %vm493_vm15, %v489_v55  ;;  %586 = vmatpush.bf16.msra.mxu2 %v571_v56  ;;  %v727_v6 = vsel %vm493_vm15, %v718_v5, 0 }
 0x1e5   :  { %703 = vmatpush.bf16.msrb.mxu1 %v4323_v45 }
 0x1e7   :  { %v673_v57 = vpop.f32.mrf.mxu0 }
 0x1e8   :  { %v674_v62 = vadd.f32 %v4398_v50, %v673_v57 }
 0x1e9   :  { %704 = vmatpush.bf16.msrb.mxu1 %v4322_v49 }
 0x1ef   :  { %v675_v60 = vpop.f32.mrf.mxu0 }
 0x1f0   :  { %v676_v63 = vadd.f32 %v4398_v50, %v675_v60 }
 0x1f2   :  { %v719_v1 = vpack.c.bf16 %v676_v63, %v674_v62 }
 0x1f4   :  { %3814 = vmatmul.msk.bf16.gmra.mxu1 %vm493_vm15, %v490_v0  ;;  %v730_v3 = vsel %vm493_vm15, %v719_v1, 0 }
 0x1f5   :  { %738 = vmatpush.bf16.xpose.msrb.mxu2 %v730_v3 }
 0x1fd   :  { %739 = vmatpush.bf16.xpose.msrb.mxu2 %v727_v6  ;;  %v630_v6 = vpop.f32.mrf.mxu3 }
 0x204   :  { %3857 = vmatmul.msk.bf16.vlgmr.msrb.gmra.mxu1 %vm92_vm1, %v4910_v59 }
 0x214   :  { %3858 = vmatmul.msk.bf16.gmra.mxu1 %vm92_vm1, %v4917_v9 }
 0x261   :  { %v515_v14 = vpop.f32.mrf.mxu1 }
 0x262   :  { %v516_v15 = vadd.f32 %v515_v14, %v4967_v12 }
 0x264   :  { %v525_v17 = vsel %vm92_vm1, %v516_v15, -inf }
 0x265   :  { %526 = vmax.xlane.f32.xlu2 %v525_v17  ;;  %v4397_v17 = vld [vmem:[%s6020_s4 + $0x1] ss:$0 sm:$0xff] }
 0x269   :  { %v517_v18 = vpop.f32.mrf.mxu1 }
 0x26a   :  { %v518_v19 = vadd.f32 %v517_v18, %v4967_v12 }
 0x26c   :  { %v528_v59 = vsel %vm92_vm1, %v518_v19, -inf }
 0x26d   :  { %529 = vmax.xlane.f32.xlu0 %v528_v59 }
 0x271   :  { %v520_v22 = vpop.f32.mrf.mxu1 }
 0x272   :  { %v521_v9 = vadd.f32 %v520_v22, %v4967_v12 }
 0x274   :  { %v531_v23 = vsel %vm92_vm1, %v521_v9, -inf }
 0x275   :  { %532 = vmax.xlane.f32.xlu1 %v531_v23 }
 0x279   :  { %v522_v26 = vpop.f32.mrf.mxu1 }
 0x27a   :  { %v523_v27 = vadd.f32 %v522_v26, %v4967_v12 }
 0x27c   :  { %v534_v28 = vsel %vm92_vm1, %v523_v27, -inf }
 0x27d   :  { %535 = vmax.xlane.f32.xlu2 %v534_v28  ;;  %v4317_v28 = vld [vmem:[%s6021_s5] sm:$0xff] }
 0x27e   :  { %879 = vmatpush.bf16.msra.mxu1 %v4317_v28 }
 0x281   :  { %v706_v29 = vpop.f32.mrf.mxu1 }
 0x282   :  { %v707_v37 = vadd.f32 %v4399_v13, %v706_v29 }
 0x289   :  { %v708_v10 = vpop.f32.mrf.mxu1 }
 0x28a   :  { %v709_v35 = vadd.f32 %v4399_v13, %v708_v10 }
 0x28c   :  { %v797_v38 = vpack.c.bf16 %v709_v35, %v707_v37 }
 0x291   :  { %v711_v30 = vpop.f32.mrf.mxu1 }
 0x292   :  { %v712_v32 = vadd.f32 %v4399_v13, %v711_v30 }
 0x299   :  { %v713_v31 = vpop.f32.mrf.mxu1 }
 0x29a   :  { %v714_v34 = vadd.f32 %v4399_v13, %v713_v31 }
 0x29c   :  { %v798_v36 = vpack.c.bf16 %v714_v34, %v712_v32 }
 0x29e   :  { %811 = vmatpush.bf16.msra.mxu3 %v798_v36 }
 0x2a2   :  { %812 = vmatpush.bf16.msra.mxu3 %v797_v38 }
 0x2d8   :  { %v527_v39 = vpop.xlane.xlu2 %526 }
 0x2d9   :  { %v537_v40 = vsub.f32 %v516_v15, %v527_v39  ;;  %v632_v15 = vpop.f32.mrf.mxu3 }
 0x2da   :  { %v633_v18 = vadd.f32 %v4397_v17, %v632_v15 }
 0x2db   :  { %v541_v41 = vmul.f32 1.442695, %v537_v40 }
 0x2dd   :  { %4441 = vpow2.f32 %v541_v41 }
 0x2e0   :  { %v530_v42 = vpop.xlane.xlu0 %529 }
 0x2e1   :  { %v538_v43 = vsub.f32 %v518_v19, %v530_v42  ;;  %v631_v19 = vadd.f32 %v4397_v17, %v630_v6  ;;  %v635_v59 = vpop.f32.mrf.mxu3 }
 0x2e2   :  { %v636_v26 = vadd.f32 %v4397_v17, %v635_v59 }
 0x2e3   :  { %v4442_v45 = vpop.eup %4441  ;;  %v543_v46 = vmul.f32 1.442695, %v538_v43  ;;  %v716_v22 = vpack.c.bf16 %v633_v18, %v631_v19 }
 0x2e4   :  { %v549_v47 = vsel %vm92_vm1, %v4442_v45, 0.0 }
 0x2e5   :  { %4443 = vpow2.f32 %v543_v46  ;;  %550 = vadd.xlane.f32.xlu0 %v549_v47  ;;  %v5004_v47 = vld [vmem:[#allocation2 + $0x20] sm:$0xff] }
 0x2e8   :  { %v533_v48 = vpop.xlane.xlu1 %532 }
 0x2e9   :  { %v539_v49 = vsub.f32 %v521_v9, %v533_v48  ;;  %v637_v9 = vpop.f32.mrf.mxu3  ;;  %v146_v48 = vsel %vm92_vm1, %v5004_v47, 0.0 }
 0x2ea   :  { %v638_v23 = vadd.f32 %v4397_v17, %v637_v9 }
 0x2eb   :  { %v4444_v51 = vpop.eup %4443  ;;  %v545_v44 = vmul.f32 1.442695, %v539_v49  ;;  %v5008_v49 = vld [vmem:[#allocation2 + $0x28] sm:$0xff] }
 0x2ec   :  { %v552_v52 = vsel %vm92_vm1, %v4444_v51, 0.0  ;;  %v149_v6 = vsel %vm92_vm1, %v5008_v49, 0.0 }
 0x2ed   :  { %4445 = vpow2.f32 %v545_v44  ;;  %553 = vadd.xlane.f32.xlu1 %v552_v52  ;;  %v5013_v52 = vld [vmem:[#allocation2 + $0x30] sm:$0xff] }
 0x2ee   :  { %v172_v9 = vmul.f32 %v5013_v52, %v5013_v52 }
 0x2f0   :  { %v536_v53 = vpop.xlane.xlu2 %535 }
 0x2f1   :  { %v540_v54 = vsub.f32 %v523_v27, %v536_v53  ;;  %v717_v27 = vpack.c.bf16 %v638_v23, %v636_v26  ;;  %v152_v53 = vsel %vm92_vm1, %v5013_v52, 0.0  ;;  %v192_v23 = vsel %vm92_vm1, %v172_v9, 0.0 }
 0x2f3   :  { %v4446_v55 = vpop.eup %4445  ;;  %v547_v56 = vmul.f32 1.442695, %v540_v54 }
 0x2f4   :  { %v555_v57 = vsel %vm92_vm1, %v4446_v55, 0.0 }
 0x2f5   :  { %4447 = vpow2.f32 %v547_v56  ;;  %556 = vadd.xlane.f32.xlu2 %v555_v57  ;;  %v5017_v57 = vld [vmem:[#allocation2 + $0x38] sm:$0xff] }
 0x2f6   :  { %v155_v19 = vsel %vm92_vm1, %v5017_v57, 0.0 }
 0x2fb   :  { %v4448_v58 = vpop.eup %4447 }
 0x2fc   :  { %v558_v50 = vsel %vm92_vm1, %v4448_v58, 0.0 }
 0x2fd   :  { %559 = vadd.xlane.f32.xlu0 %v558_v50 }
 0x358   :  { %v551_v60 = vpop.xlane.xlu0 %550 }
 0x359   :  { %4449 = vrcp.f32 %v551_v60 }
 0x35f   :  { %v4450_v62 = vpop.eup %4449 }
 0x360   :  { %v554_v61 = vpop.xlane.xlu1 %553  ;;  %v565_v0 = vmul.f32 %v4450_v62, %v4442_v45 }
 0x361   :  { %4451 = vrcp.f32 %v554_v61 }
 0x367   :  { %v4452_v63 = vpop.eup %4451 }
 0x368   :  { %v566_v1 = vmul.f32 %v4452_v63, %v4444_v51  ;;  %v557_v3 = vpop.xlane.xlu2 %556  ;;  %v171_v51 = vmul.f32 %v5008_v49, %v5008_v49 }
 0x369   :  { %4453 = vrcp.f32 %v557_v3 }
 0x36a   :  { %v569_v2 = vpack.c.bf16 %v566_v1, %v565_v0  ;;  %v189_v44 = vsel %vm92_vm1, %v171_v51, 0.0 }
 0x36c   :  { %3815 = vmatmul.msk.bf16.vlgmr.msra.gmra.mxu2 %vm92_vm1, %v569_v2 }
 0x36f   :  { %v4454_v5 = vpop.eup %4453 }
 0x370   :  { %v560_v4 = vpop.xlane.xlu0 %559  ;;  %v567_v8 = vmul.f32 %v4454_v5, %v4446_v55 }
 0x371   :  { %4455 = vrcp.f32 %v560_v4 }
 0x377   :  { %v4456_v7 = vpop.eup %4455 }
 0x378   :  { %v568_v11 = vmul.f32 %v4456_v7, %v4448_v58  ;;  %v173_v58 = vmul.f32 %v5017_v57, %v5017_v57 }
 0x37a   :  { %v570_v14 = vpack.c.bf16 %v568_v11, %v567_v8  ;;  %v195_v50 = vsel %vm92_vm1, %v173_v58, 0.0  ;;  %v170_v8 = vmul.f32 %v5004_v47, %v5004_v47 }
 0x37c   :  { %3816 = vmatmul.msk.bf16.gmra.mxu2 %vm92_vm1, %v570_v14  ;;  %v186_v17 = vsel %vm92_vm1, %v170_v8, 0.0 }
 0x38c   :  { %3859 = vmatmul.msk.bf16.vlgmr.msrb.gmra.mxu2 %vm493_vm15, %v716_v22 }
 0x39c   :  { %3860 = vmatmul.msk.bf16.gmra.mxu2 %vm493_vm15, %v717_v27 }
 0x3ef   :  { %v588_v29 = vpop.f32.mrf.mxu2 }
 0x3f7   :  { %v590_v10 = vpop.f32.mrf.mxu2 }
 0x3f8   :  { %v598_v30 = vpack.c.bf16 %v590_v10, %v588_v29 }
 0x3fa   :  { %3875 = vmatmul.msk.bf16.vlgmr.msra.gmra.mxu1 %vm493_vm15, %v598_v30 }
 0x3ff   :  { %v593_v13 = vpop.f32.mrf.mxu2 }
 0x407   :  { %v595_v31 = vpop.f32.mrf.mxu2 }
 0x408   :  { %v599_v32 = vpack.c.bf16 %v595_v31, %v593_v13 }
 0x40a   :  { %3876 = vmatmul.msk.bf16.gmra.mxu1 %vm493_vm15, %v599_v32 }
 0x40f   :  { %v741_v34 = vpop.f32.mrf.mxu2 }
 0x410   :  { %v742_v35 = vadd.f32 %v741_v34, %v4967_v12 }
 0x412   :  { %v751_v36 = vsel %vm92_vm1, %v742_v35, -inf }
 0x413   :  { %752 = vmax.xlane.f32.xlu1 %v751_v36 }
 0x417   :  { %v743_v37 = vpop.f32.mrf.mxu2 }
 0x418   :  { %v744_v38 = vadd.f32 %v743_v37, %v4967_v12 }
 0x41a   :  { %v754_v39 = vsel %vm92_vm1, %v744_v38, -inf }
 0x41b   :  { %755 = vmax.xlane.f32.xlu2 %v754_v39  ;;  %v4328_v39 = vld [vmem:[%s6019_s3 + $0x28] sm:$0xff] }
 0x41c   :  { %972 = vmatpush.bf16.msrb.mxu3 %v4328_v39  ;;  %v4333_v39 = vld [vmem:[%s6019_s3 + $0x18] sm:$0xff] }
 0x41f   :  { %v746_v40 = vpop.f32.mrf.mxu2 }
 0x420   :  { %v747_v41 = vadd.f32 %v746_v40, %v4967_v12  ;;  %v4326_v40 = vld [vmem:[%s6019_s3 + $0x8] sm:$0xff] }
 0x421   :  { %935 = vmatpush.bf16.msra.mxu2 %v4326_v40 }
 0x422   :  { %v757_v42 = vsel %vm92_vm1, %v747_v41, -inf }
 0x423   :  { %758 = vmax.xlane.f32.xlu0 %v757_v42 }
 0x427   :  { %v748_v43 = vpop.f32.mrf.mxu2 }
 0x428   :  { %v749_v45 = vadd.f32 %v748_v43, %v4967_v12 }
 0x42a   :  { %v760_v46 = vsel %vm92_vm1, %v749_v45, -inf }
 0x42b   :  { %761 = vmax.xlane.f32.xlu1 %v760_v46 }
 0x433   :  { %147 = vadd.xlane.f32.xlu1 %v146_v48 }
 0x43b   :  { %190 = vadd.xlane.f32.xlu1 %v189_v44 }
 0x443   :  { %153 = vadd.xlane.f32.xlu1 %v152_v53 }
 0x44b   :  { %196 = vadd.xlane.f32.xlu1 %v195_v50 }
 0x486   :  { %v753_v54 = vpop.xlane.xlu1 %752 }
 0x487   :  { %v763_v55 = vsub.f32 %v742_v35, %v753_v54  ;;  %v4325_v54 = vld [vmem:[%s6019_s3] sm:$0xff] }
 0x488   :  { %936 = vmatpush.bf16.msra.mxu2 %v4325_v54 }
 0x489   :  { %v767_v56 = vmul.f32 1.442695, %v763_v55  ;;  %v4327_v55 = vld [vmem:[%s6019_s3 + $0x20] sm:$0xff] }
 0x48a   :  { %973 = vmatpush.bf16.msrb.mxu3 %v4327_v55 }
 0x48b   :  { %4457 = vpow2.f32 %v767_v56 }
 0x48e   :  { %v756_v60 = vpop.xlane.xlu2 %755 }
 0x48f   :  { %v764_v61 = vsub.f32 %v744_v38, %v756_v60 }
 0x491   :  { %v4458_v62 = vpop.eup %4457  ;;  %v769_v63 = vmul.f32 1.442695, %v764_v61 }
 0x492   :  { %v775_v0 = vsel %vm92_vm1, %v4458_v62, 0.0 }
 0x493   :  { %4459 = vpow2.f32 %v769_v63  ;;  %776 = vadd.xlane.f32.xlu2 %v775_v0 }
 0x496   :  { %v759_v1 = vpop.xlane.xlu0 %758 }
 0x497   :  { %v765_v2 = vsub.f32 %v747_v41, %v759_v1 }
 0x499   :  { %v4460_v3 = vpop.eup %4459  ;;  %v771_v4 = vmul.f32 1.442695, %v765_v2 }
 0x49a   :  { %v778_v5 = vsel %vm92_vm1, %v4460_v3, 0.0 }
 0x49b   :  { %4461 = vpow2.f32 %v771_v4  ;;  %779 = vadd.xlane.f32.xlu0 %v778_v5  ;;  %150 = vadd.xlane.f32.xlu2 %v149_v6 }
 0x49e   :  { %v762_v7 = vpop.xlane.xlu1 %761 }
 0x49f   :  { %v766_v11 = vsub.f32 %v749_v45, %v762_v7 }
 0x4a1   :  { %v5028_v14 = vpop.eup %4461  ;;  %v773_v15 = vmul.f32 1.442695, %v766_v11 }
 0x4a2   :  { %v781_v18 = vsel %vm92_vm1, %v5028_v14, 0.0 }
 0x4a3   :  { %4463 = vpow2.f32 %v773_v15  ;;  %187 = vadd.xlane.f32.xlu0 %v186_v17  ;;  %782 = vadd.xlane.f32.xlu2 %v781_v18 }
 0x4a6   :  { %v148_v26 = vpop.xlane.xlu1 %147 }
 0x4a7   :  { %v5046_v34 = vmul.f32 0.03125, %v148_v26 }
 0x4a9   :  { %v5035_v59 = vpop.eup %4463  ;;  %v210_v46 = vmul.f32 %v5046_v34, %v5046_v34 }
 0x4aa   :  { %v784_v22 = vsel %vm92_vm1, %v5035_v59, 0.0 }
 0x4ab   :  { %785 = vadd.xlane.f32.xlu0 %v784_v22  ;;  %156 = vadd.xlane.f32.xlu2 %v155_v19 }
 0x4ae   :  { %v191_v28 = vpop.xlane.xlu1 %190 }
 0x4af   :  { %v203_v13 = vmul.f32 0.03125, %v191_v28 }
 0x4b3   :  { %193 = vadd.xlane.f32.xlu0 %v192_v23 }
 0x4b6   :  { %v154_v36 = vpop.xlane.xlu1 %153 }
 0x4be   :  { %v197_v58 = vpop.xlane.xlu1 %196 }
 0x4bf   :  { %v205_v0 = vmul.f32 0.03125, %v197_v58 }
 0x506   :  { %v777_v27 = vpop.xlane.xlu2 %776 }
 0x507   :  { %4465 = vrcp.f32 %v777_v27 }
 0x50d   :  { %v4466_v32 = vpop.eup %4465 }
 0x50e   :  { %v780_v29 = vpop.xlane.xlu0 %779  ;;  %v151_v10 = vpop.xlane.xlu2 %150  ;;  %v791_v41 = vmul.f32 %v4466_v32, %v4458_v62 }
 0x50f   :  { %4467 = vrcp.f32 %v780_v29  ;;  %v5042_v30 = vmul.f32 0.03125, %v151_v10 }
 0x511   :  { %v211_v31 = vmul.f32 %v5042_v30, %v5042_v30  ;;  %v235_v10 = vsub.f32 %v5008_v49, %v5042_v30 }
 0x513   :  { %v219_v35 = vsub.f32 %v203_v13, %v211_v31 }
 0x515   :  { %v4468_v37 = vpop.eup %4467  ;;  %v227_v38 = vmax.f32 %v219_v35, 0.0 }
 0x516   :  { %v792_v42 = vmul.f32 %v4468_v37, %v4460_v3  ;;  %v188_v43 = vpop.xlane.xlu0 %187  ;;  %v783_v45 = vpop.xlane.xlu2 %782  ;;  %v5067_v3 = vmul.f32 0.03125, %v154_v36 }
 0x517   :  { %v243_v48 = vadd.f32 1e-12, %v227_v38  ;;  %v202_v51 = vmul.f32 0.03125, %v188_v43 }
 0x518   :  { %v795_v44 = vpack.c.bf16 %v792_v42, %v791_v41  ;;  %v212_v17 = vmul.f32 %v5067_v3, %v5067_v3  ;;  %v234_v41 = vsub.f32 %v5004_v47, %v5046_v34  ;;  %v4332_v42 = vld [vmem:[%s6019_s3 + $0x10] sm:$0xff] }
 0x519   :  { %4469 = vrsqrt.f32 %v243_v48  ;;  %v218_v53 = vsub.f32 %v202_v51, %v210_v46  ;;  %vm302_vm3 = vweird.f32 %v243_v48 }
 0x51a   :  { %3861 = vmatmul.msk.bf16.vlgmr.msra.gmra.mxu3 %vm92_vm1, %v795_v44  ;;  %4471 = vrcp.f32 %v783_v45 }
 0x51b   :  { %v226_v56 = vmax.f32 %v218_v53, 0.0  ;;  %1158 = vmatpush.bf16.msra.mxu3 %v4333_v39 }
 0x51d   :  { %v242_v50 = vadd.f32 1e-12, %v226_v56 }
 0x51e   :  { %v786_v60 = vpop.xlane.xlu0 %785  ;;  %v157_v61 = vpop.xlane.xlu2 %156 }
 0x51f   :  { %v4470_v62 = vpop.eup %4469  ;;  %4473 = vrsqrt.f32 %v242_v50  ;;  %v5063_v63 = vmul.f32 0.03125, %v157_v61  ;;  %vm292_vm6 = vweird.f32 %v242_v50  ;;  %1159 = vmatpush.bf16.msra.mxu3 %v4332_v42 }
 0x520   :  { %v297_v1 = vmul.f32 %v4470_v62, %v243_v48  ;;  %4475 = vrcp.f32 %v786_v60  ;;  %v4472_v6 = vpop.eup %4471  ;;  %vm303_vm2 = vweird.f32 %v4470_v62 }
 0x521   :  { %v213_v2 = vmul.f32 %v5063_v63, %v5063_v63  ;;  %v793_v26 = vmul.f32 %v4472_v6, %v5028_v14  ;;  %vm304_vm4 = vmor %vm302_vm3, %vm303_vm2 }
 0x522   :  { %v298_v4 = vmul.f32 %v4470_v62, %v297_v1  ;;  %v237_v1 = vsub.f32 %v5017_v57, %v5063_v63  ;;  %v236_v63 = vsub.f32 %v5013_v52, %v5067_v3 }
 0x523   :  { %v221_v5 = vsub.f32 %v205_v0, %v213_v2 }
 0x524   :  { %v299_v7 = vmul.f32 0.5, %v298_v4 }
 0x525   :  { %v4474_v8 = vpop.eup %4473  ;;  %v229_v11 = vmax.f32 %v221_v5, 0.0 }
 0x526   :  { %v4476_v15 = vpop.eup %4475  ;;  %v300_v18 = vsub.f32 1.5, %v299_v7  ;;  %v287_v19 = vmul.f32 %v4474_v8, %v242_v50  ;;  %v194_v22 = vpop.xlane.xlu0 %193  ;;  %vm293_vm5 = vweird.f32 %v4474_v8 }
 0x527   :  { %v245_v9 = vadd.f32 1e-12, %v229_v11  ;;  %v204_v23 = vmul.f32 0.03125, %v194_v22  ;;  %v794_v27 = vmul.f32 %v4476_v15, %v5035_v59  ;;  %vm294_vm7 = vmor %vm292_vm6, %vm293_vm5 }
 0x528   :  { %v301_v28 = vmul.f32 %v4470_v62, %v300_v18  ;;  %v288_v29 = vmul.f32 %v4474_v8, %v287_v19 }
 0x529   :  { %4477 = vrsqrt.f32 %v245_v9  ;;  %v220_v13 = vsub.f32 %v204_v23, %v212_v17  ;;  %v796_v31 = vpack.c.bf16 %v794_v27, %v793_v26  ;;  %vm322_vm8 = vweird.f32 %v245_v9 }
 0x52a   :  { %v305_v32 = vsel %vm304_vm4, %v4470_v62, %v301_v28  ;;  %v289_v35 = vmul.f32 0.5, %v288_v29  ;;  %v4329_v29 = vld [vmem:[%s6019_s3 + $0x40] sm:$0xff] }
 0x52b   :  { %v331_v36 = vmul.f32 %v305_v32, %v235_v10  ;;  %v228_v37 = vmax.f32 %v220_v13, 0.0  ;;  %3862 = vmatmul.msk.bf16.gmra.mxu3 %vm92_vm1, %v796_v31 }
 0x52c   :  { %v290_v38 = vsub.f32 1.5, %v289_v35 }
 0x52d   :  { %v340_v14 = vmul.f32 %v4877_v24, %v331_v36  ;;  %v244_v59 = vadd.f32 1e-12, %v228_v37  ;;  %v4335_v37 = vld [vmem:[%s6019_s3 + $0x38] sm:$0xff] }
 0x52e   :  { %v291_v30 = vmul.f32 %v4474_v8, %v290_v38  ;;  %v4334_v38 = vld [vmem:[%s6019_s3 + $0x30] sm:$0xff] }
 0x52f   :  { %v4478_v40 = vpop.eup %4477  ;;  %4479 = vrsqrt.f32 %v244_v59  ;;  %v349_v46 = vadd.f32 %v4885_v33, %v340_v14  ;;  %vm312_vm12 = vweird.f32 %v244_v59 }
 0x530   :  { %v295_v43 = vsel %vm294_vm7, %v4474_v8, %v291_v30  ;;  %v317_v45 = vmul.f32 %v4478_v40, %v245_v9  ;;  %vm323_vm9 = vweird.f32 %v4478_v40  ;;  %v4401_v30 = vld [vmem:[%s6020_s4 + $0x2] ss:$0 sm:$0xff] }
 0x531   :  { %v330_v48 = vmul.f32 %v295_v43, %v234_v41  ;;  %v357_v55 = vpack.c.bf16 %v349_v46, %v349_v46  ;;  %vm324_vm10 = vmor %vm322_vm8, %vm323_vm9 }
 0x532   :  { %v318_v51 = vmul.f32 %v4478_v40, %v317_v45 }
 0x533   :  { %v339_v44 = vmul.f32 %v4877_v24, %v330_v48  ;;  %v906_v62 = vunpack.c.l.b16 %v357_v55 }
 0x534   :  { %v319_v53 = vmul.f32 0.5, %v318_v51 }
 0x535   :  { %v4480_v54 = vpop.eup %4479  ;;  %v348_v34 = vadd.f32 %v4885_v33, %v339_v44 }
 0x536   :  { %v320_v56 = vsub.f32 1.5, %v319_v53  ;;  %v307_v58 = vmul.f32 %v4480_v54, %v244_v59  ;;  %vm313_vm11 = vweird.f32 %v4480_v54  ;;  %v4337_v53 = vld [vmem:[%s6019_s3 + $0x58] sm:$0xff] }
 0x537   :  { %v356_v50 = vpack.c.bf16 %v348_v34, %v348_v34  ;;  %vm314_vm13 = vmor %vm312_vm12, %vm313_vm11 }
 0x538   :  { %v321_v60 = vmul.f32 %v4478_v40, %v320_v56  ;;  %v308_v61 = vmul.f32 %v4480_v54, %v307_v58  ;;  %v4336_v56 = vld [vmem:[%s6019_s3 + $0x50] sm:$0xff] }
 0x539   :  { %v905_v0 = vunpack.c.l.b16 %v356_v50 }
 0x53a   :  { %v325_v2 = vsel %vm324_vm10, %v4478_v40, %v321_v60  ;;  %v309_v4 = vmul.f32 0.5, %v308_v61 }
 0x53b   :  { %v333_v5 = vmul.f32 %v325_v2, %v237_v1  ;;  %v5090_v6 = vpack.c.b16 %v906_v62, %v905_v0  ;;  %v881_v2 = vpop.f32.mrf.mxu1 }
 0x53c   :  { %v310_v7 = vsub.f32 1.5, %v309_v4 }
 0x53d   :  { %v342_v8 = vmul.f32 %v4877_v24, %v333_v5  ;;  %3885 = vmatmul.msk.bf16.vlgmr.msra.gmra.mxu2 %vm92_vm1, %v5090_v6  ;;  %3899 = vmatmul.msk.bf16.vlgmr.msrb.gmra.mxu3 %vm92_vm1, %v5090_v6 }
 0x53e   :  { %v311_v11 = vmul.f32 %v4480_v54, %v310_v7 }
 0x53f   :  { %v351_v17 = vadd.f32 %v4885_v33, %v342_v8 }
 0x540   :  { %v315_v15 = vsel %vm314_vm13, %v4480_v54, %v311_v11  ;;  %v4400_v54 = vld [vmem:[%s6020_s4] ss:$0 sm:$0xff] }
 0x541   :  { %v332_v18 = vmul.f32 %v315_v15, %v236_v63  ;;  %v359_v22 = vpack.c.bf16 %v351_v17, %v351_v17 }
 0x543   :  { %v341_v19 = vmul.f32 %v4877_v24, %v332_v18  ;;  %v908_v26 = vunpack.c.l.b16 %v359_v22  ;;  %v4324_v24 = vld [vmem:[%s6021_s5 + $0x8] sm:$0xff]  ;;  %v883_v7 = vpop.f32.mrf.mxu1 }
 0x544   :  { %848 = vmatpush.bf16.msrb.mxu0 %v4324_v24 }
 0x545   :  { %v350_v9 = vadd.f32 %v4885_v33, %v341_v19  ;;  %v4330_v33 = vld [vmem:[%s6019_s3 + $0x48] sm:$0xff] }
 0x547   :  { %v358_v23 = vpack.c.bf16 %v350_v9, %v350_v9 }
 0x548   :  { %1009 = vmatpush.bf16.msra.mxu0 %v4330_v33 }
 0x549   :  { %v907_v27 = vunpack.c.l.b16 %v358_v23 }
 0x54b   :  { %v910_v28 = vpack.c.b16 %v908_v26, %v907_v27  ;;  %v886_v63 = vpop.f32.mrf.mxu1  ;;  %v4403_v26 = vld [vmem:[%s6020_s4 + $0x4] ss:$0 sm:$0xff] }
 0x54c   :  { %1010 = vmatpush.bf16.msra.mxu0 %v4329_v29 }
 0x54d   :  { %3886 = vmatmul.msk.bf16.gmra.mxu2 %vm92_vm1, %v910_v28  ;;  %3900 = vmatmul.msk.bf16.gmra.mxu3 %vm92_vm1, %v910_v28 }
 0x553   :  { %v888_v18 = vpop.f32.mrf.mxu1 }
 0x55d   :  { %3931 = vmatmul.msk.bf16.vlgmr.msra.gmra.mxu3 %vm92_vm1, %v5090_v6 }
 0x56d   :  { %3932 = vmatmul.msk.bf16.gmra.mxu3 %vm92_vm1, %v910_v28 }
 0x59d   :  { %v814_v3 = vpop.f32.mrf.mxu3 }
 0x5a5   :  { %v816_v10 = vpop.f32.mrf.mxu3 }
 0x5a6   :  { %v824_v13 = vpack.c.bf16 %v816_v10, %v814_v3 }
 0x5a8   :  { %3869 = vmatmul.msk.bf16.vlgmr.msrb.gmra.mxu0 %vm493_vm15, %v824_v13 }
 0x5a9   :  { %1195 = vmatpush.bf16.msrb.mxu0 %v4335_v37 }
 0x5ad   :  { %1196 = vmatpush.bf16.msrb.mxu0 %v4334_v38 }
 0x5ae   :  { %v819_v31 = vpop.f32.mrf.mxu3 }
 0x5b6   :  { %v821_v32 = vpop.f32.mrf.mxu3 }
 0x5b7   :  { %v825_v35 = vpack.c.bf16 %v821_v32, %v819_v31 }
 0x5b9   :  { %3870 = vmatmul.msk.bf16.gmra.mxu0 %vm493_vm15, %v825_v35 }
 0x5c0   :  { %v975_v36 = vpop.f32.mrf.mxu3  ;;  %v938_v39 = vpop.f32.mrf.mxu2 }
 0x5c1   :  { %v976_v48 = vadd.f32 %v4401_v30, %v975_v36  ;;  %v939_v58 = vadd.f32 %v4400_v54, %v938_v39 }
 0x5c8   :  { %v977_v14 = vpop.f32.mrf.mxu3  ;;  %v940_v51 = vpop.f32.mrf.mxu2 }
 0x5c9   :  { %3913 = vmatmul.msk.bf16.vlgmr.msra.gmra.mxu0 %vm92_vm1, %v5090_v6  ;;  %v978_v45 = vadd.f32 %v4401_v30, %v977_v14  ;;  %v941_v34 = vadd.f32 %v4400_v54, %v940_v51 }
 0x5cb   :  { %v1024_v44 = vpack.c.bf16 %v978_v45, %v976_v48  ;;  %v1022_v60 = vpack.c.bf16 %v941_v34, %v939_v58 }
 0x5cd   :  { %v1033_v55 = vsel %vm493_vm15, %v1024_v44, 0 }
 0x5d0   :  { %v980_v59 = vpop.f32.mrf.mxu3  ;;  %v943_v50 = vpop.f32.mrf.mxu2 }
 0x5d1   :  { %v981_v41 = vadd.f32 %v4401_v30, %v980_v59  ;;  %v944_v0 = vadd.f32 %v4400_v54, %v943_v50 }
 0x5d8   :  { %v982_v40 = vpop.f32.mrf.mxu3  ;;  %v945_v61 = vpop.f32.mrf.mxu2 }
 0x5d9   :  { %v983_v42 = vadd.f32 %v4401_v30, %v982_v40  ;;  %3914 = vmatmul.msk.bf16.gmra.mxu0 %vm92_vm1, %v910_v28  ;;  %v946_v62 = vadd.f32 %v4400_v54, %v945_v61  ;;  %v4404_v40 = vld [vmem:[%s6020_s4 + $0x3] ss:$0 sm:$0xff]  ;;  %v4405_v61 = vld [vmem:[%s6020_s4 + $0x5] ss:$0 sm:$0xff] }
 0x5db   :  { %v1025_v43 = vpack.c.bf16 %v983_v42, %v981_v41  ;;  %v1023_v1 = vpack.c.bf16 %v946_v62, %v944_v0 }
 0x5dd   :  { %v1036_v46 = vsel %vm493_vm15, %v1025_v43, 0 }
 0x5de   :  { %1044 = vmatpush.bf16.xpose.msrb.mxu1 %v1036_v46 }
 0x5e6   :  { %1045 = vmatpush.bf16.xpose.msrb.mxu1 %v1033_v55 }
 0x5e9   :  { %3945 = vmatmul.msk.bf16.vlgmr.msrb.gmra.mxu0 %vm92_vm1, %v5090_v6 }
 0x5ed   :  { %3915 = vmatmul.msk.bf16.vlgmr.msrb.gmra.mxu1 %vm493_vm15, %v1022_v60 }
 0x5ee   :  { %1232 = vmatpush.bf16.msra.mxu1 %v4337_v53 }
 0x5f2   :  { %1233 = vmatpush.bf16.msra.mxu1 %v4336_v56 }
 0x5f9   :  { %3946 = vmatmul.msk.bf16.gmra.mxu0 %vm92_vm1, %v910_v28 }
 0x5fd   :  { %3916 = vmatmul.msk.bf16.gmra.mxu1 %vm493_vm15, %v1023_v1 }
 0x60d   :  { %3959 = vmatmul.msk.bf16.vlgmr.msra.gmra.mxu1 %vm92_vm1, %v5090_v6 }
 0x61d   :  { %3960 = vmatmul.msk.bf16.gmra.mxu1 %vm92_vm1, %v910_v28 }
 0x625   :  { %v850_v4 = vpop.f32.mrf.mxu0 }
 0x626   :  { %v882_v5 = vadd.f32 %v881_v2, %v850_v4 }
 0x628   :  { %891 = vst.msk [vmem:[#allocation2] sm:$0xff] %vm92_vm1, %v882_v5 }
 0x62d   :  { %v852_v8 = vpop.f32.mrf.mxu0 }
 0x62e   :  { %v884_v11 = vadd.f32 %v883_v7, %v852_v8 }
 0x630   :  { %892 = vst.msk [vmem:[#allocation2 + $0x8] sm:$0xff] %vm92_vm1, %v884_v11 }
 0x636   :  { %v855_v15 = vpop.f32.mrf.mxu0 }
 0x637   :  { %v887_v17 = vadd.f32 %v886_v63, %v855_v15 }
 0x639   :  { %893 = vst.msk [vmem:[#allocation2 + $0x10] sm:$0xff] %vm92_vm1, %v887_v17 }
 0x63e   :  { %v857_v19 = vpop.f32.mrf.mxu0 }
 0x63f   :  { %v889_v6 = vadd.f32 %v888_v18, %v857_v19 }
 0x641   :  { %894 = vst.msk [vmem:[#allocation2 + $0x18] sm:$0xff] %vm92_vm1, %v889_v6 }
 0x646   :  { %v1012_v22 = vpop.f32.mrf.mxu0 }
 0x647   :  { %v1013_v29 = vadd.f32 %v4403_v26, %v1012_v22 }
 0x64e   :  { %v1014_v9 = vpop.f32.mrf.mxu0 }
 0x64f   :  { %v1015_v3 = vadd.f32 %v4403_v26, %v1014_v9 }
 0x651   :  { %v1103_v10 = vpack.c.bf16 %v1015_v3, %v1013_v29  ;;  %v5178_v3 = vld [vmem:[%s6024_s8 + $0x2] ss:$0 sm:$0xff] }
 0x656   :  { %v1017_v23 = vpop.f32.mrf.mxu0 }
 0x657   :  { %v1018_v28 = vadd.f32 %v4403_v26, %v1017_v23  ;;  %v1423_v23 = vld [vmem:[#allocation2] sm:$0xff] }
 0x65e   :  { %v1019_v27 = vpop.f32.mrf.mxu0 }
 0x65f   :  { %v1020_v24 = vadd.f32 %v4403_v26, %v1019_v27 }
 0x661   :  { %v1104_v33 = vpack.c.bf16 %v1020_v24, %v1018_v28  ;;  %v1431_v24 = vadd.f32 %v1423_v23, %v4801_v16 }
 0x663   :  { %1117 = vmatpush.bf16.msrb.mxu2 %v1104_v33  ;;  %v1424_v33 = vld [vmem:[#allocation2 + $0x8] sm:$0xff] }
 0x666   :  { %v1198_v13 = vpop.f32.mrf.mxu0 }
 0x667   :  { %1118 = vmatpush.bf16.msrb.mxu2 %v1103_v10  ;;  %v1199_v54 = vadd.f32 %v4404_v40, %v1198_v13  ;;  %v5181_v10 = vadd.f32 %v5178_v3, %v1431_v24  ;;  %v1432_v13 = vadd.f32 %v1424_v33, %v4811_v21 }
 0x669   :  { %v1448_v16 = vsel %vm92_vm1, %v5181_v10, 0.0 }
 0x66a   :  { %v1047_v31 = vpop.f32.mrf.mxu1 }
 0x66b   :  { %v1048_v32 = vadd.f32 %v1047_v31, %v4967_v12 }
 0x66d   :  { %v1057_v35 = vsel %vm92_vm1, %v1048_v32, -inf }
 0x66e   :  { %v1200_v36 = vpop.f32.mrf.mxu0  ;;  %1058 = vmax.xlane.f32.xlu2 %v1057_v35 }
 0x66f   :  { %v1201_v51 = vadd.f32 %v4404_v40, %v1200_v36 }
 0x671   :  { %v1247_v34 = vpack.c.bf16 %v1201_v51, %v1199_v54 }
 0x672   :  { %v1049_v37 = vpop.f32.mrf.mxu1 }
 0x673   :  { %v1050_v38 = vadd.f32 %v1049_v37, %v4967_v12  ;;  %v1256_v58 = vsel %vm493_vm15, %v1247_v34, 0  ;;  %v5188_v37 = vadd.f32 %v5178_v3, %v1432_v13  ;;  %v4340_v13 = vld [vmem:[%s6022_s6 + $0x8] sm:$0xff] }
 0x675   :  { %v1060_v14 = vsel %vm92_vm1, %v1050_v38, -inf }
 0x676   :  { %v1203_v59 = vpop.f32.mrf.mxu0  ;;  %1061 = vmax.xlane.f32.xlu0 %v1060_v14  ;;  %v1481_v14 = vmul.f32 %v5188_v37, %v5188_v37 }
 0x677   :  { %v1204_v43 = vadd.f32 %v4404_v40, %v1203_v59 }
 0x67a   :  { %v1052_v39 = vpop.f32.mrf.mxu1 }
 0x67b   :  { %v1053_v30 = vadd.f32 %v1052_v39, %v4967_v12 }
 0x67d   :  { %v1063_v41 = vsel %vm92_vm1, %v1053_v30, -inf }
 0x67e   :  { %v1205_v42 = vpop.f32.mrf.mxu0  ;;  %1064 = vmax.xlane.f32.xlu1 %v1063_v41  ;;  %v1451_v41 = vsel %vm92_vm1, %v5188_v37, 0.0 }
 0x67f   :  { %v1206_v45 = vadd.f32 %v4404_v40, %v1205_v42  ;;  %v1426_v42 = vld [vmem:[#allocation2 + $0x18] sm:$0xff] }
 0x681   :  { %v1248_v46 = vpack.c.bf16 %v1206_v45, %v1204_v43  ;;  %v1480_v43 = vmul.f32 %v5181_v10, %v5181_v10  ;;  %v1434_v45 = vadd.f32 %v1426_v42, %v4819_v25  ;;  %v4402_v42 = vld [vmem:[%s6020_s4 + $0x1] ss:$0 sm:$0xff] }
 0x682   :  { %v1054_v48 = vpop.f32.mrf.mxu1 }
 0x683   :  { %v1055_v44 = vadd.f32 %v1054_v48, %v4967_v12  ;;  %v1259_v53 = vsel %vm493_vm15, %v1248_v46, 0  ;;  %v1488_v46 = vsel %vm92_vm1, %v1480_v43, 0.0 }
 0x684   :  { %1267 = vmatpush.bf16.xpose.msra.mxu2 %v1259_v53 }
 0x685   :  { %v1066_v55 = vsel %vm92_vm1, %v1055_v44, -inf }
 0x686   :  { %1067 = vmax.xlane.f32.xlu2 %v1066_v55 }
 0x68a   :  { %v1235_v56 = vpop.f32.mrf.mxu1 }
 0x68b   :  { %v1236_v5 = vadd.f32 %v4405_v61, %v1235_v56 }
 0x68c   :  { %1268 = vmatpush.bf16.xpose.msra.mxu2 %v1256_v58 }
 0x692   :  { %v1237_v50 = vpop.f32.mrf.mxu1 }
 0x693   :  { %v1238_v2 = vadd.f32 %v4405_v61, %v1237_v50 }
 0x695   :  { %v1326_v7 = vpack.c.bf16 %v1238_v2, %v1236_v5 }
 0x69a   :  { %v1240_v60 = vpop.f32.mrf.mxu1 }
 0x69b   :  { %v1241_v0 = vadd.f32 %v4405_v61, %v1240_v60 }
 0x6a2   :  { %v1242_v62 = vpop.f32.mrf.mxu1 }
 0x6a3   :  { %v1243_v1 = vadd.f32 %v4405_v61, %v1242_v62 }
 0x6a5   :  { %v1327_v4 = vpack.c.bf16 %v1243_v1, %v1241_v0 }
 0x6a7   :  { %1340 = vmatpush.bf16.msrb.mxu3 %v1327_v4 }
 0x6ab   :  { %1341 = vmatpush.bf16.msrb.mxu3 %v1326_v7 }
 0x6e1   :  { %v1059_v8 = vpop.xlane.xlu2 %1058 }
 0x6e2   :  { %v1069_v11 = vsub.f32 %v1048_v32, %v1059_v8 }
 0x6e4   :  { %v1073_v63 = vmul.f32 1.442695, %v1069_v11 }
 0x6e6   :  { %4481 = vpow2.f32 %v1073_v63  ;;  %v1161_v63 = vpop.f32.mrf.mxu3 }
 0x6e9   :  { %v1062_v15 = vpop.xlane.xlu0 %1061 }
 0x6ea   :  { %v1070_v17 = vsub.f32 %v1050_v38, %v1062_v15  ;;  %v1425_v38 = vld [vmem:[#allocation2 + $0x10] sm:$0xff] }
 0x6eb   :  { %v1433_v21 = vadd.f32 %v1425_v38, %v4809_v20 }
 0x6ec   :  { %v4482_v18 = vpop.eup %4481  ;;  %v1075_v19 = vmul.f32 1.442695, %v1070_v17 }
 0x6ed   :  { %v1081_v6 = vsel %vm92_vm1, %v4482_v18, 0.0  ;;  %v5196_v40 = vadd.f32 %v5178_v3, %v1433_v21 }
 0x6ee   :  { %4483 = vpow2.f32 %v1075_v19  ;;  %1082 = vadd.xlane.f32.xlu0 %v1081_v6 }
 0x6ef   :  { %v1482_v20 = vmul.f32 %v5196_v40, %v5196_v40  ;;  %v1454_v51 = vsel %vm92_vm1, %v5196_v40, 0.0 }
 0x6f1   :  { %v1065_v22 = vpop.xlane.xlu1 %1064  ;;  %v1494_v48 = vsel %vm92_vm1, %v1482_v20, 0.0 }
 0x6f2   :  { %v1071_v9 = vsub.f32 %v1053_v30, %v1065_v22  ;;  %v1491_v30 = vsel %vm92_vm1, %v1481_v14, 0.0 }
 0x6f4   :  { %v4484_v26 = vpop.eup %4483  ;;  %v1077_v27 = vmul.f32 1.442695, %v1071_v9 }
 0x6f5   :  { %v1084_v28 = vsel %vm92_vm1, %v4484_v26, 0.0 }
 0x6f6   :  { %4485 = vpow2.f32 %v1077_v27  ;;  %1085 = vadd.xlane.f32.xlu1 %v1084_v28 }
 0x6f9   :  { %v1068_v29 = vpop.xlane.xlu2 %1067 }
 0x6fa   :  { %v1072_v31 = vsub.f32 %v1055_v44, %v1068_v29  ;;  %v5210_v44 = vadd.f32 %v5178_v3, %v1434_v45 }
 0x6fc   :  { %v4486_v32 = vpop.eup %4485  ;;  %v1079_v35 = vmul.f32 1.442695, %v1072_v31  ;;  %v1483_v53 = vmul.f32 %v5210_v44, %v5210_v44  ;;  %v1457_v54 = vsel %vm92_vm1, %v5210_v44, 0.0 }
 0x6fd   :  { %v1087_v36 = vsel %vm92_vm1, %v4486_v32, 0.0 }
 0x6fe   :  { %4487 = vpow2.f32 %v1079_v35  ;;  %1449 = vadd.xlane.f32.xlu1 %v1448_v16  ;;  %1088 = vadd.xlane.f32.xlu2 %v1087_v36  ;;  %v1497_v25 = vsel %vm92_vm1, %v1483_v53, 0.0  ;;  %v1163_v35 = vpop.f32.mrf.mxu3  ;;  %v1162_v53 = vadd.f32 %v4402_v42, %v1161_v63 }
 0x704   :  { %v4488_v59 = vpop.eup %4487 }
 0x705   :  { %v1090_v39 = vsel %vm92_vm1, %v4488_v59, 0.0 }
 0x706   :  { %1091 = vadd.xlane.f32.xlu0 %v1090_v39  ;;  %1492 = vadd.xlane.f32.xlu1 %v1491_v30 }
 0x707   :  { %1452 = vadd.xlane.f32.xlu2 %v1451_v41 }
 0x70e   :  { %1489 = vadd.xlane.f32.xlu0 %v1488_v46  ;;  %1495 = vadd.xlane.f32.xlu1 %v1494_v48  ;;  %v1164_v46 = vadd.f32 %v4402_v42, %v1163_v35 }
 0x70f   :  { %1455 = vadd.xlane.f32.xlu2 %v1454_v51 }
 0x716   :  { %1458 = vadd.xlane.f32.xlu0 %v1457_v54 }
 0x717   :  { %1498 = vadd.xlane.f32.xlu2 %v1497_v25 }
 0x761   :  { %v1083_v55 = vpop.xlane.xlu0 %1082 }
 0x762   :  { %4489 = vrcp.f32 %v1083_v55  ;;  %v1166_v55 = vpop.f32.mrf.mxu3 }
 0x768   :  { %v4490_v56 = vpop.eup %4489 }
 0x769   :  { %v1086_v34 = vpop.xlane.xlu1 %1085  ;;  %v1097_v50 = vmul.f32 %v4490_v56, %v4482_v18  ;;  %v1245_v56 = vpack.c.bf16 %v1164_v46, %v1162_v53 }
 0x76a   :  { %4491 = vrcp.f32 %v1086_v34 }
 0x770   :  { %v4492_v58 = vpop.eup %4491 }
 0x771   :  { %v1098_v60 = vmul.f32 %v4492_v58, %v4484_v26  ;;  %v1089_v61 = vpop.xlane.xlu2 %1088  ;;  %v1450_v62 = vpop.xlane.xlu1 %1449 }
 0x772   :  { %4493 = vrcp.f32 %v1089_v61  ;;  %v5222_v15 = vmul.f32 0.03125, %v1450_v62 }
 0x773   :  { %v1101_v0 = vpack.c.bf16 %v1098_v60, %v1097_v50 }
 0x774   :  { %v1520_v23 = vmul.f32 %v5222_v15, %v5222_v15 }
 0x775   :  { %3917 = vmatmul.msk.bf16.vlgmr.msrb.gmra.mxu2 %vm92_vm1, %v1101_v0 }
 0x776   :  { %1705 = vmatpush.bf16.msrb.mxu2 %v4340_v13 }
 0x778   :  { %v4494_v11 = vpop.eup %4493 }
 0x779   :  { %v1092_v1 = vpop.xlane.xlu0 %1091  ;;  %v1493_v4 = vpop.xlane.xlu1 %1492  ;;  %v1099_v22 = vmul.f32 %v4494_v11, %v4486_v32  ;;  %v4339_v32 = vld [vmem:[%s6022_s6] sm:$0xff] }
 0x77a   :  { %4495 = vrcp.f32 %v1092_v1  ;;  %v1453_v2 = vpop.xlane.xlu2 %1452  ;;  %v1513_v8 = vmul.f32 0.03125, %v1493_v4  ;;  %1706 = vmatpush.bf16.msrb.mxu2 %v4339_v32  ;;  %v1168_v1 = vpop.f32.mrf.mxu3  ;;  %v5253_v32 = vld [vmem:[%s6024_s8 + $0x3] ss:$0 sm:$0xff] }
 0x77b   :  { %v5218_v5 = vmul.f32 0.03125, %v1453_v2  ;;  %v1169_v11 = vadd.f32 %v4402_v42, %v1168_v1 }
 0x77d   :  { %v1521_v7 = vmul.f32 %v5218_v5, %v5218_v5 }
 0x77f   :  { %v1529_v17 = vsub.f32 %v1513_v8, %v1521_v7 }
 0x780   :  { %v4496_v18 = vpop.eup %4495 }
 0x781   :  { %v1537_v19 = vmax.f32 %v1529_v17, 0.0  ;;  %v1490_v6 = vpop.xlane.xlu0 %1489  ;;  %v1100_v9 = vmul.f32 %v4496_v18, %v4488_v59  ;;  %v1496_v36 = vpop.xlane.xlu1 %1495  ;;  %v1167_v18 = vadd.f32 %v4402_v42, %v1166_v55 }
 0x782   :  { %v1512_v26 = vmul.f32 0.03125, %v1490_v6  ;;  %v1456_v27 = vpop.xlane.xlu2 %1455  ;;  %v1514_v39 = vmul.f32 0.03125, %v1496_v36 }
 0x783   :  { %v1102_v28 = vpack.c.bf16 %v1100_v9, %v1099_v22  ;;  %v1553_v33 = vadd.f32 1e-12, %v1537_v19  ;;  %v5226_v29 = vmul.f32 0.03125, %v1456_v27  ;;  %v1246_v22 = vpack.c.bf16 %v1169_v11, %v1167_v18 }
 0x784   :  { %v1528_v24 = vsub.f32 %v1512_v26, %v1520_v23  ;;  %v1544_v26 = vsub.f32 %v5181_v10, %v5222_v15 }
 0x785   :  { %3918 = vmatmul.msk.bf16.gmra.mxu2 %vm92_vm1, %v1102_v28  ;;  %4497 = vrsqrt.f32 %v1553_v33  ;;  %v1522_v38 = vmul.f32 %v5226_v29, %v5226_v29  ;;  %vm1576_vm4 = vweird.f32 %v1553_v33 }
 0x786   :  { %v1536_v31 = vmax.f32 %v1528_v24, 0.0  ;;  %v1545_v24 = vsub.f32 %v5188_v37, %v5218_v5 }
 0x787   :  { %v1530_v43 = vsub.f32 %v1514_v39, %v1522_v38  ;;  %v5260_v38 = vld [vmem:[%s6024_s8 + $0x4] ss:$0 sm:$0xff] }
 0x788   :  { %v1552_v16 = vadd.f32 1e-12, %v1536_v31 }
 0x789   :  { %v1459_v14 = vpop.xlane.xlu0 %1458  ;;  %v1538_v25 = vmax.f32 %v1530_v43, 0.0 }
 0x78a   :  { %4499 = vrsqrt.f32 %v1552_v16  ;;  %v5237_v21 = vmul.f32 0.03125, %v1459_v14  ;;  %v1499_v59 = vpop.xlane.xlu2 %1498  ;;  %vm1566_vm2 = vweird.f32 %v1552_v16 }
 0x78b   :  { %v1515_v41 = vmul.f32 0.03125, %v1499_v59  ;;  %v4498_v45 = vpop.eup %4497  ;;  %v1554_v60 = vadd.f32 1e-12, %v1538_v25 }
 0x78c   :  { %v1523_v30 = vmul.f32 %v5237_v21, %v5237_v21  ;;  %v1571_v34 = vmul.f32 %v4498_v45, %v1553_v33  ;;  %vm1577_vm0 = vweird.f32 %v4498_v45  ;;  %v1547_v43 = vsub.f32 %v5210_v44, %v5237_v21  ;;  %v4331_v21 = vld [vmem:[%s6021_s5] sm:$0xff] }
 0x78d   :  { %vm1578_vm5 = vmor %vm1576_vm4, %vm1577_vm0  ;;  %vm1586_vm10 = vweird.f32 %v1554_v60  ;;  %1407 = vmatpush.bf16.msrb.mxu1 %v4331_v21 }
 0x78e   :  { %v1531_v20 = vsub.f32 %v1515_v41, %v1523_v30  ;;  %v1572_v61 = vmul.f32 %v4498_v45, %v1571_v34 }
 0x790   :  { %v4500_v48 = vpop.eup %4499  ;;  %v1539_v51 = vmax.f32 %v1531_v20, 0.0  ;;  %v1573_v0 = vmul.f32 0.5, %v1572_v61 }
 0x791   :  { %v1561_v54 = vmul.f32 %v4500_v48, %v1552_v16  ;;  %vm1567_vm14 = vweird.f32 %v4500_v48 }
 0x792   :  { %v1555_v58 = vadd.f32 1e-12, %v1539_v51  ;;  %v1574_v7 = vsub.f32 1.5, %v1573_v0  ;;  %vm1568_vm3 = vmor %vm1566_vm2, %vm1567_vm14 }
 0x793   :  { %v1562_v50 = vmul.f32 %v4500_v48, %v1561_v54 }
 0x794   :  { %4501 = vrsqrt.f32 %v1555_v58  ;;  %v1575_v19 = vmul.f32 %v4498_v45, %v1574_v7  ;;  %vm1596_vm8 = vweird.f32 %v1555_v58 }
 0x795   :  { %3961 = vmatmul.msk.bf16.vlgmr.msra.gmra.mxu2 %vm493_vm15, %v1245_v56  ;;  %v1563_v62 = vmul.f32 0.5, %v1562_v50  ;;  %4503 = vrsqrt.f32 %v1554_v60 }
 0x796   :  { %v1579_v27 = vsel %vm1578_vm5, %v4498_v45, %v1575_v19  ;;  %v1546_v45 = vsub.f32 %v5196_v40, %v5226_v29 }
 0x797   :  { %v1564_v2 = vsub.f32 1.5, %v1563_v62  ;;  %v1641_v33 = vmul.f32 %v1579_v27, %v1545_v24 }
 0x799   :  { %v1565_v63 = vmul.f32 %v4500_v48, %v1564_v2  ;;  %v1650_v36 = vmul.f32 %v5253_v32, %v1641_v33 }
 0x79a   :  { %v4502_v4 = vpop.eup %4501 }
 0x79b   :  { %v4504_v8 = vpop.eup %4503  ;;  %v1591_v17 = vmul.f32 %v4502_v4, %v1555_v58  ;;  %v1569_v9 = vsel %vm1568_vm3, %v4500_v48, %v1565_v63  ;;  %vm1597_vm6 = vweird.f32 %v4502_v4  ;;  %v1659_v39 = vadd.f32 %v5260_v38, %v1650_v36 }
 0x79c   :  { %v1581_v6 = vmul.f32 %v4504_v8, %v1554_v60  ;;  %v1640_v13 = vmul.f32 %v1569_v9, %v1544_v26  ;;  %vm1587_vm7 = vweird.f32 %v4504_v8  ;;  %vm1598_vm9 = vmor %vm1596_vm8, %vm1597_vm6 }
 0x79d   :  { %v1592_v23 = vmul.f32 %v4502_v4, %v1591_v17  ;;  %vm1588_vm11 = vmor %vm1586_vm10, %vm1587_vm7 }
 0x79e   :  { %v1582_v28 = vmul.f32 %v4504_v8, %v1581_v6  ;;  %v1649_v16 = vmul.f32 %v5253_v32, %v1640_v13 }
 0x79f   :  { %v1593_v31 = vmul.f32 0.5, %v1592_v23 }
 0x7a0   :  { %v1583_v35 = vmul.f32 0.5, %v1582_v28  ;;  %v1658_v14 = vadd.f32 %v5260_v38, %v1649_v16 }
 0x7a1   :  { %v1594_v15 = vsub.f32 1.5, %v1593_v31 }
 0x7a2   :  { %v1584_v5 = vsub.f32 1.5, %v1583_v35  ;;  %v1666_v41 = vpack.c.bf16 %v1659_v39, %v1658_v14 }
 0x7a3   :  { %v1595_v59 = vmul.f32 %v4502_v4, %v1594_v15 }
 0x7a4   :  { %v1585_v30 = vmul.f32 %v4504_v8, %v1584_v5 }
 0x7a5   :  { %3962 = vmatmul.msk.bf16.gmra.mxu2 %vm493_vm15, %v1246_v22  ;;  %v1599_v42 = vsel %vm1598_vm9, %v4502_v4, %v1595_v59 }
 0x7a6   :  { %v1589_v20 = vsel %vm1588_vm11, %v4504_v8, %v1585_v30  ;;  %v1643_v46 = vmul.f32 %v1599_v42, %v1547_v43  ;;  %v4347_v42 = vld [vmem:[%s6023_s7 + $0x30] sm:$0xff]  ;;  %v4346_v43 = vld [vmem:[%s6023_s7 + $0x28] sm:$0xff] }
 0x7a7   :  { %v1642_v48 = vmul.f32 %v1589_v20, %v1546_v45  ;;  %v4345_v45 = vld [vmem:[%s6023_s7 + $0x20] sm:$0xff] }
 0x7a8   :  { %v1652_v51 = vmul.f32 %v5253_v32, %v1643_v46  ;;  %v5309_v46 = vld [vmem:[%s6024_s8 + $0x5] ss:$0 sm:$0xff] }
 0x7a9   :  { %v1651_v53 = vmul.f32 %v5253_v32, %v1642_v48 }
 0x7aa   :  { %v1661_v54 = vadd.f32 %v5260_v38, %v1652_v51  ;;  %v4344_v51 = vld [vmem:[%s6023_s7 + $0x18] sm:$0xff] }
 0x7ab   :  { %v1660_v25 = vadd.f32 %v5260_v38, %v1651_v53 }
 0x7ad   :  { %v1667_v55 = vpack.c.bf16 %v1661_v54, %v1660_v25  ;;  %v4343_v54 = vld [vmem:[%s6023_s7 + $0x10] sm:$0xff] }
 0x7b5   :  { %3987 = vmatmul.msk.bf16.vlgmr.msrb.gmra.mxu2 %vm92_vm1, %v1666_v41  ;;  %v4348_v41 = vld [vmem:[%s6023_s7 + $0x38] sm:$0xff] }
 0x7b6   :  { %1868 = vmatpush.bf16.msra.mxu3 %v4348_v41 }
 0x7ba   :  { %1869 = vmatpush.bf16.msra.mxu3 %v4347_v42 }
 0x7be   :  { %1870 = vmatpush.bf16.msra.mxu3 %v4346_v43 }
 0x7c2   :  { %1871 = vmatpush.bf16.msra.mxu3 %v4345_v45 }
 0x7c5   :  { %3988 = vmatmul.msk.bf16.gmra.mxu2 %vm92_vm1, %v1667_v55 }
 0x7c6   :  { %1872 = vmatpush.bf16.msra.mxu3 %v4344_v51 }
 0x7ca   :  { %1873 = vmatpush.bf16.msra.mxu3 %v4343_v54 }
 0x7f8   :  { %v1120_v34 = vpop.f32.mrf.mxu2 }
 0x800   :  { %v1122_v29 = vpop.f32.mrf.mxu2 }
 0x801   :  { %v1130_v56 = vpack.c.bf16 %v1122_v29, %v1120_v34  ;;  %v4342_v29 = vld [vmem:[%s6023_s7 + $0x8] sm:$0xff] }
 0x802   :  { %1874 = vmatpush.bf16.msra.mxu3 %v4342_v29 }
 0x803   :  { %3977 = vmatmul.msk.bf16.vlgmr.msrb.gmra.mxu1 %vm493_vm15, %v1130_v56 }
 0x808   :  { %v1125_v58 = vpop.f32.mrf.mxu2 }
 0x810   :  { %v1127_v50 = vpop.f32.mrf.mxu2 }
 0x811   :  { %v1131_v60 = vpack.c.bf16 %v1127_v50, %v1125_v58 }
 0x813   :  { %3978 = vmatmul.msk.bf16.gmra.mxu1 %vm493_vm15, %v1131_v60  ;;  %v4341_v60 = vld [vmem:[%s6023_s7] sm:$0xff] }
 0x814   :  { %1875 = vmatpush.bf16.msra.mxu3 %v4341_v60 }
 0x818   :  { %v1270_v61 = vpop.f32.mrf.mxu2 }
 0x819   :  { %v1271_v62 = vadd.f32 %v1270_v61, %v4967_v12 }
 0x81b   :  { %v1280_v0 = vsel %vm92_vm1, %v1271_v62, -inf }
 0x81c   :  { %1281 = vmax.xlane.f32.xlu0 %v1280_v0 }
 0x820   :  { %v1272_v1 = vpop.f32.mrf.mxu2 }
 0x821   :  { %v1273_v2 = vadd.f32 %v1272_v1, %v4967_v12 }
 0x823   :  { %v1283_v4 = vsel %vm92_vm1, %v1273_v2, -inf }
 0x824   :  { %1284 = vmax.xlane.f32.xlu1 %v1283_v4 }
 0x828   :  { %v1275_v7 = vpop.f32.mrf.mxu2 }
 0x829   :  { %v1276_v8 = vadd.f32 %v1275_v7, %v4967_v12 }
 0x82b   :  { %v1286_v11 = vsel %vm92_vm1, %v1276_v8, -inf }
 0x82c   :  { %1287 = vmax.xlane.f32.xlu2 %v1286_v11 }
 0x830   :  { %v1277_v63 = vpop.f32.mrf.mxu2 }
 0x831   :  { %v1278_v17 = vadd.f32 %v1277_v63, %v4967_v12 }
 0x833   :  { %v1289_v18 = vsel %vm92_vm1, %v1278_v17, -inf }
 0x834   :  { %1290 = vmax.xlane.f32.xlu0 %v1289_v18 }
 0x838   :  { %v1708_v30 = vpop.f32.mrf.mxu2 }
 0x839   :  { %v1709_v25 = vadd.f32 %v5309_v46, %v1708_v30 }
 0x83b   :  { %v1728_v56 = vmul.f32 %v1709_v25, %v1709_v25 }
 0x840   :  { %v1710_v20 = vpop.f32.mrf.mxu2 }
 0x841   :  { %v1711_v53 = vadd.f32 %v5309_v46, %v1710_v20 }
 0x843   :  { %v1729_v34 = vmul.f32 %v1711_v53, %v1711_v53 }
 0x845   :  { %v1737_v50 = vmul.f32 %v1729_v34, %v1711_v53 }
 0x848   :  { %v1713_v55 = vpop.f32.mrf.mxu2 }
 0x850   :  { %v1715_v4 = vpop.f32.mrf.mxu2 }
 0x88f   :  { %v1282_v19 = vpop.xlane.xlu0 %1281 }
 0x890   :  { %v1292_v6 = vsub.f32 %v1271_v62, %v1282_v19  ;;  %v1736_v62 = vmul.f32 %v1728_v56, %v1709_v25  ;;  %v1714_v19 = vadd.f32 %v5309_v46, %v1713_v55 }
 0x892   :  { %v1296_v22 = vmul.f32 1.442695, %v1292_v6 }
 0x894   :  { %4505 = vpow2.f32 %v1296_v22 }
 0x897   :  { %v1285_v9 = vpop.xlane.xlu1 %1284 }
 0x898   :  { %v1293_v23 = vsub.f32 %v1273_v2, %v1285_v9  ;;  %v1745_v2 = vmul.f32 0.044715, %v1737_v50 }
 0x89a   :  { %v4506_v26 = vpop.eup %4505  ;;  %v1298_v27 = vmul.f32 1.442695, %v1293_v23  ;;  %v1753_v63 = vadd.f32 %v1745_v2, %v1711_v53 }
 0x89b   :  { %v1304_v28 = vsel %vm92_vm1, %v4506_v26, 0.0 }
 0x89c   :  { %4507 = vpow2.f32 %v1298_v27  ;;  %1305 = vadd.xlane.f32.xlu1 %v1304_v28  ;;  %v1761_v22 = vmul.f32 0.7978846, %v1753_v63 }
 0x89f   :  { %v1288_v24 = vpop.xlane.xlu2 %1287 }
 0x8a0   :  { %v1294_v13 = vsub.f32 %v1276_v8, %v1288_v24  ;;  %v1744_v8 = vmul.f32 0.044715, %v1736_v62 }
 0x8a2   :  { %v4508_v31 = vpop.eup %4507  ;;  %v1300_v33 = vmul.f32 1.442695, %v1294_v13  ;;  %v1752_v18 = vadd.f32 %v1744_v8, %v1709_v25 }
 0x8a3   :  { %v1307_v35 = vsel %vm92_vm1, %v4508_v31, 0.0 }
 0x8a4   :  { %4509 = vpow2.f32 %v1300_v33  ;;  %1308 = vadd.xlane.f32.xlu2 %v1307_v35  ;;  %v1760_v23 = vmul.f32 0.7978846, %v1752_v18 }
 0x8a7   :  { %v1291_v16 = vpop.xlane.xlu0 %1290 }
 0x8a8   :  { %v1295_v15 = vsub.f32 %v1278_v17, %v1291_v16  ;;  %v1716_v17 = vadd.f32 %v5309_v46, %v1715_v4  ;;  %v4410_v4 = vld [vmem:[%s6024_s8 + $0x6] ss:$0 sm:$0xff] }
 0x8aa   :  { %v5289_v36 = vpop.eup %4509  ;;  %v1302_v5 = vmul.f32 1.442695, %v1295_v15  ;;  %v1731_v9 = vmul.f32 %v1716_v17, %v1716_v17 }
 0x8ab   :  { %v1310_v14 = vsel %vm92_vm1, %v5289_v36, 0.0 }
 0x8ac   :  { %4511 = vpow2.f32 %v1302_v5  ;;  %1311 = vadd.xlane.f32.xlu0 %v1310_v14  ;;  %v1739_v28 = vmul.f32 %v1731_v9, %v1716_v17 }
 0x8ae   :  { %v1747_v35 = vmul.f32 0.044715, %v1739_v28 }
 0x8b2   :  { %v4512_v59 = vpop.eup %4511 }
 0x8b3   :  { %v1313_v39 = vsel %vm92_vm1, %v4512_v59, 0.0 }
 0x8b4   :  { %1314 = vadd.xlane.f32.xlu1 %v1313_v39  ;;  %v1755_v39 = vadd.f32 %v1747_v35, %v1716_v17 }
 0x8b6   :  { %v1763_v43 = vmul.f32 0.7978846, %v1755_v39 }
 0x90f   :  { %v1306_v48 = vpop.xlane.xlu1 %1305 }
 0x910   :  { %4513 = vrcp.f32 %v1306_v48 }
 0x916   :  { %v4514_v58 = vpop.eup %4513 }
 0x917   :  { %v1309_v21 = vpop.xlane.xlu2 %1308  ;;  %v1320_v0 = vmul.f32 %v4514_v58, %v4506_v26  ;;  %v1730_v26 = vmul.f32 %v1714_v19, %v1714_v19 }
 0x918   :  { %4515 = vrcp.f32 %v1309_v21 }
 0x919   :  { %v1738_v13 = vmul.f32 %v1730_v26, %v1714_v19 }
 0x91b   :  { %v1746_v5 = vmul.f32 0.044715, %v1738_v13 }
 0x91d   :  { %v1754_v41 = vadd.f32 %v1746_v5, %v1714_v19  ;;  %v1409_v5 = vpop.f32.mrf.mxu1 }
 0x91e   :  { %v4516_v61 = vpop.eup %4515 }
 0x91f   :  { %v1321_v1 = vmul.f32 %v4516_v61, %v4508_v31  ;;  %v1312_v11 = vpop.xlane.xlu0 %1311  ;;  %v1762_v45 = vmul.f32 0.7978846, %v1754_v41  ;;  %v4338_v61 = vld [vmem:[%s6021_s5 + $0x8] sm:$0xff] }
 0x920   :  { %4517 = vrcp.f32 %v1312_v11  ;;  %1376 = vmatpush.bf16.msra.mxu0 %v4338_v61 }
 0x921   :  { %v1324_v7 = vpack.c.bf16 %v1321_v1, %v1320_v0 }
 0x923   :  { %3963 = vmatmul.msk.bf16.vlgmr.msrb.gmra.mxu3 %vm92_vm1, %v1324_v7 }
 0x926   :  { %v4518_v27 = vpop.eup %4517 }
 0x927   :  { %v1315_v6 = vpop.xlane.xlu1 %1314  ;;  %v1322_v31 = vmul.f32 %v4518_v27, %v5289_v36 }
 0x928   :  { %4519 = vrcp.f32 %v1315_v6 }
 0x929   :  { %4521 = vtanh.f32 %v1761_v22 }
 0x92a   :  { %4523 = vtanh.f32 %v1760_v23 }
 0x92b   :  { %4525 = vtanh.f32 %v1763_v43 }
 0x92c   :  { %4527 = vtanh.f32 %v1762_v45 }
 0x92e   :  { %v4520_v24 = vpop.eup %4519 }
 0x92f   :  { %v1323_v33 = vmul.f32 %v4520_v24, %v4512_v59  ;;  %v4522_v15 = vpop.eup %4521 }
 0x930   :  { %v4524_v14 = vpop.eup %4523  ;;  %v1777_v30 = vadd.f32 1.0, %v4522_v15 }
 0x931   :  { %v1325_v16 = vpack.c.bf16 %v1323_v33, %v1322_v31  ;;  %v1776_v42 = vadd.f32 1.0, %v4524_v14  ;;  %v4526_v54 = vpop.eup %4525 }
 0x932   :  { %v1785_v20 = vmul.f32 0.5, %v1777_v30  ;;  %v4528_v55 = vpop.eup %4527  ;;  %v1779_v21 = vadd.f32 1.0, %v4526_v54  ;;  %v1411_v30 = vpop.f32.mrf.mxu1 }
 0x933   :  { %3964 = vmatmul.msk.bf16.gmra.mxu3 %vm92_vm1, %v1325_v16  ;;  %v1784_v48 = vmul.f32 0.5, %v1776_v42  ;;  %v1778_v34 = vadd.f32 1.0, %v4528_v55 }
 0x934   :  { %v1793_v51 = vmul.f32 %v1785_v20, %v1711_v53  ;;  %v1787_v29 = vmul.f32 0.5, %v1779_v21 }
 0x935   :  { %v1792_v36 = vmul.f32 %v1784_v48, %v1709_v25  ;;  %v1786_v56 = vmul.f32 0.5, %v1778_v34 }
 0x936   :  { %v1795_v58 = vmul.f32 %v1787_v29, %v1716_v17 }
 0x937   :  { %v1800_v59 = vpack.c.bf16 %v1793_v51, %v1792_v36  ;;  %v1794_v50 = vmul.f32 %v1786_v56, %v1714_v19 }
 0x939   :  { %v1801_v60 = vpack.c.bf16 %v1795_v58, %v1794_v50 }
 0x93a   :  { %v1414_v45 = vpop.f32.mrf.mxu1 }
 0x943   :  { %1876 = vmatmul.bf16.vlgmr.msra.gmra.mxu3 %v1800_v59 }
 0x953   :  { %1881 = vmatmul.bf16.gmra.mxu3 %v1801_v60 }
 0x9a6   :  { %v1343_v53 = vpop.f32.mrf.mxu3 }
 0x9ae   :  { %v1345_v62 = vpop.f32.mrf.mxu3 }
 0x9af   :  { %v1353_v25 = vpack.c.bf16 %v1345_v62, %v1343_v53  ;;  %v1416_v62 = vpop.f32.mrf.mxu1 }
 0x9b1   :  { %3971 = vmatmul.msk.bf16.vlgmr.msra.gmra.mxu0 %vm493_vm15, %v1353_v25 }
 0x9b6   :  { %v1348_v0 = vpop.f32.mrf.mxu3 }
 0x9be   :  { %v1350_v1 = vpop.f32.mrf.mxu3 }
 0x9bf   :  { %v1354_v2 = vpack.c.bf16 %v1350_v1, %v1348_v0 }
 0x9c1   :  { %3972 = vmatmul.msk.bf16.gmra.mxu0 %vm493_vm15, %v1354_v2 }
 0x9c6   :  { %v1877_v7 = vpop.f32.mrf.mxu3 }
 0x9c7   :  { %v1897_v8 = vadd.f32 %v1877_v7, %v5181_v10 }
 0x9c9   :  { %v5339_v11 = vadd.f32 %v4410_v4, %v1897_v8 }
 0x9cb   :  { %v1922_v63 = vsel %vm92_vm1, %v5339_v11, 0.0  ;;  %v1954_v17 = vmul.f32 %v5339_v11, %v5339_v11 }
 0x9cc   :  { %1923 = vadd.xlane.f32.xlu2 %v1922_v63  ;;  %v4352_v63 = vld [vmem:[%s6019_s3 + $0x88] sm:$0xff] }
 0x9cd   :  { %v1962_v18 = vsel %vm92_vm1, %v1954_v17, 0.0  ;;  %v4350_v17 = vld [vmem:[%s6019_s3 + $0x68] sm:$0xff]  ;;  %2227 = vmatpush.bf16.msra.mxu1 %v4352_v63 }
 0x9ce   :  { %1963 = vadd.xlane.f32.xlu1 %v1962_v18  ;;  %v1879_v19 = vpop.f32.mrf.mxu3  ;;  %2189 = vmatpush.bf16.msrb.mxu0 %v4350_v17 }
 0x9cf   :  { %v1898_v6 = vadd.f32 %v1879_v19, %v5188_v37 }
 0x9d1   :  { %v5347_v22 = vadd.f32 %v4410_v4, %v1898_v6 }
 0x9d3   :  { %v1925_v10 = vsel %vm92_vm1, %v5347_v22, 0.0  ;;  %v1955_v9 = vmul.f32 %v5347_v22, %v5347_v22 }
 0x9d4   :  { %1926 = vadd.xlane.f32.xlu0 %v1925_v10 }
 0x9d5   :  { %v1965_v23 = vsel %vm92_vm1, %v1955_v9, 0.0 }
 0x9d6   :  { %1966 = vadd.xlane.f32.xlu2 %v1965_v23  ;;  %v1882_v26 = vpop.f32.mrf.mxu3  ;;  %v4349_v23 = vld [vmem:[%s6019_s3 + $0x60] sm:$0xff] }
 0x9d7   :  { %v1899_v27 = vadd.f32 %v1882_v26, %v5196_v40  ;;  %v4351_v26 = vld [vmem:[%s6019_s3 + $0x80] sm:$0xff]  ;;  %2190 = vmatpush.bf16.msrb.mxu0 %v4349_v23 }
 0x9d8   :  { %2228 = vmatpush.bf16.msra.mxu1 %v4351_v26  ;;  %v4353_v26 = vld [vmem:[%s6019_s3 + $0xa0] sm:$0xff] }
 0x9d9   :  { %v5355_v28 = vadd.f32 %v4410_v4, %v1899_v27 }
 0x9db   :  { %v1928_v37 = vsel %vm92_vm1, %v5355_v28, 0.0  ;;  %v1956_v24 = vmul.f32 %v5355_v28, %v5355_v28 }
 0x9dc   :  { %1929 = vadd.xlane.f32.xlu0 %v1928_v37 }
 0x9dd   :  { %v1968_v13 = vsel %vm92_vm1, %v1956_v24, 0.0 }
 0x9de   :  { %1969 = vadd.xlane.f32.xlu2 %v1968_v13  ;;  %v1884_v31 = vpop.f32.mrf.mxu3 }
 0x9df   :  { %v1900_v33 = vadd.f32 %v1884_v31, %v5210_v44 }
 0x9e1   :  { %v5363_v35 = vadd.f32 %v4410_v4, %v1900_v33 }
 0x9e3   :  { %v1931_v40 = vsel %vm92_vm1, %v5363_v35, 0.0  ;;  %v1957_v16 = vmul.f32 %v5363_v35, %v5363_v35 }
 0x9e4   :  { %1932 = vadd.xlane.f32.xlu1 %v1931_v40 }
 0x9e5   :  { %v1971_v15 = vsel %vm92_vm1, %v1957_v16, 0.0 }
 0x9e6   :  { %1972 = vadd.xlane.f32.xlu0 %v1971_v15 }
 0xa2e   :  { %v1378_v14 = vpop.f32.mrf.mxu0 }
 0xa2f   :  { %v1410_v39 = vadd.f32 %v1409_v5, %v1378_v14 }
 0xa31   :  { %1419 = vst.msk [vmem:[#allocation2 + $0x20] sm:$0xff] %vm92_vm1, %v1410_v39 }
 0xa36   :  { %v1380_v41 = vpop.f32.mrf.mxu0 }
 0xa37   :  { %v1412_v44 = vadd.f32 %v1411_v30, %v1380_v41 }
 0xa38   :  { %v1427_v42 = vld [vmem:[#allocation2 + $0x20] sm:$0xff] }
 0xa39   :  { %1420 = vst.msk [vmem:[#allocation2 + $0x28] sm:$0xff] %vm92_vm1, %v1412_v44  ;;  %v1435_v43 = vadd.f32 %v1427_v42, %v5004_v47 }
 0xa3b   :  { %v5374_v20 = vadd.f32 %v5178_v3, %v1435_v43 }
 0xa3d   :  { %v1460_v48 = vsel %vm92_vm1, %v5374_v20, 0.0  ;;  %v1484_v51 = vmul.f32 %v5374_v20, %v5374_v20 }
 0xa3e   :  { %1461 = vadd.xlane.f32.xlu1 %v1460_v48  ;;  %v1383_v36 = vpop.f32.mrf.mxu0 }
 0xa3f   :  { %v1415_v59 = vadd.f32 %v1414_v45, %v1383_v36  ;;  %v1924_v54 = vpop.xlane.xlu2 %1923  ;;  %v1500_v55 = vsel %vm92_vm1, %v1484_v51, 0.0 }
 0xa40   :  { %v5381_v21 = vmul.f32 0.03125, %v1924_v54  ;;  %1501 = vadd.xlane.f32.xlu0 %v1500_v55  ;;  %v1428_v47 = vld [vmem:[#allocation2 + $0x28] sm:$0xff] }
 0xa41   :  { %1421 = vst.msk [vmem:[#allocation2 + $0x30] sm:$0xff] %vm92_vm1, %v1415_v59  ;;  %v1964_v34 = vpop.xlane.xlu1 %1963  ;;  %v1436_v29 = vadd.f32 %v1428_v47, %v5008_v49 }
 0xa42   :  { %v1994_v56 = vmul.f32 %v5381_v21, %v5381_v21  ;;  %v1986_v58 = vmul.f32 0.03125, %v1964_v34 }
 0xa43   :  { %v5388_v50 = vadd.f32 %v5178_v3, %v1436_v29 }
 0xa44   :  { %v2002_v60 = vsub.f32 %v1986_v58, %v1994_v56  ;;  %v2018_v58 = vsub.f32 %v5339_v11, %v5381_v21  ;;  %v4412_v21 = vld [vmem:[%s6024_s8 + $0x9] ss:$0 sm:$0xff] }
 0xa45   :  { %v1463_v61 = vsel %vm92_vm1, %v5388_v50, 0.0  ;;  %v1485_v53 = vmul.f32 %v5388_v50, %v5388_v50 }
 0xa46   :  { %v2010_v25 = vmax.f32 %v2002_v60, 0.0  ;;  %1464 = vadd.xlane.f32.xlu2 %v1463_v61  ;;  %v1385_v0 = vpop.f32.mrf.mxu0 }
 0xa47   :  { %v1417_v1 = vadd.f32 %v1416_v62, %v1385_v0  ;;  %v1927_v49 = vpop.xlane.xlu0 %1926  ;;  %v1503_v2 = vsel %vm92_vm1, %v1485_v53, 0.0 }
 0xa48   :  { %v2026_v4 = vadd.f32 1e-12, %v2010_v25  ;;  %v5395_v7 = vmul.f32 0.03125, %v1927_v49  ;;  %1504 = vadd.xlane.f32.xlu1 %v1503_v2  ;;  %v1429_v8 = vld [vmem:[#allocation2 + $0x30] sm:$0xff]  ;;  %v4411_v25 = vld [vmem:[%s6024_s8 + $0x8] ss:$0 sm:$0xff] }
 0xa49   :  { %1422 = vst.msk [vmem:[#allocation2 + $0x38] sm:$0xff] %vm92_vm1, %v1417_v1  ;;  %v1967_v18 = vpop.xlane.xlu2 %1966  ;;  %v1437_v19 = vadd.f32 %v1429_v8, %v5013_v52 }
 0xa4a   :  { %4529 = vrsqrt.f32 %v2026_v4  ;;  %v1995_v6 = vmul.f32 %v5395_v7, %v5395_v7  ;;  %v1987_v10 = vmul.f32 0.03125, %v1967_v18  ;;  %vm2040_vm13 = vweird.f32 %v2026_v4 }
 0xa4b   :  { %v5408_v9 = vadd.f32 %v5178_v3, %v1437_v19  ;;  %v4354_v19 = vld [vmem:[%s6019_s3 + $0xa8] sm:$0xff] }
 0xa4c   :  { %v2003_v27 = vsub.f32 %v1987_v10, %v1995_v6  ;;  %v2019_v10 = vsub.f32 %v5347_v22, %v5395_v7  ;;  %2265 = vmatpush.bf16.msra.mxu0 %v4354_v19 }
 0xa4d   :  { %v1466_v52 = vsel %vm92_vm1, %v5408_v9, 0.0  ;;  %v1486_v37 = vmul.f32 %v5408_v9, %v5408_v9 }
 0xa4e   :  { %1467 = vadd.xlane.f32.xlu2 %v1466_v52  ;;  %v2011_v24 = vmax.f32 %v2003_v27, 0.0 }
 0xa4f   :  { %v1930_v13 = vpop.xlane.xlu0 %1929  ;;  %v1506_v31 = vsel %vm92_vm1, %v1486_v37, 0.0 }
 0xa50   :  { %v4530_v33 = vpop.eup %4529  ;;  %v5421_v40 = vmul.f32 0.03125, %v1930_v13  ;;  %1507 = vadd.xlane.f32.xlu1 %v1506_v31  ;;  %v1430_v16 = vld [vmem:[#allocation2 + $0x38] sm:$0xff]  ;;  %v2027_v5 = vadd.f32 1e-12, %v2011_v24  ;;  %2266 = vmatpush.bf16.msra.mxu0 %v4353_v26 }
 0xa51   :  { %v2035_v15 = vmul.f32 %v4530_v33, %v2026_v4  ;;  %v1970_v14 = vpop.xlane.xlu2 %1969  ;;  %v1438_v39 = vadd.f32 %v1430_v16, %v5017_v57  ;;  %vm2041_vm12 = vweird.f32 %v4530_v33 }
 0xa52   :  { %v1996_v30 = vmul.f32 %v5421_v40, %v5421_v40  ;;  %v1988_v41 = vmul.f32 0.03125, %v1970_v14  ;;  %4531 = vrsqrt.f32 %v2027_v5  ;;  %vm2042_vm14 = vmor %vm2040_vm13, %vm2041_vm12  ;;  %vm2050_vm2 = vweird.f32 %v2027_v5 }
 0xa53   :  { %v2036_v44 = vmul.f32 %v4530_v33, %v2035_v15  ;;  %v5427_v42 = vadd.f32 %v5178_v3, %v1438_v39  ;;  %v2020_v39 = vsub.f32 %v5355_v28, %v5421_v40 }
 0xa54   :  { %v2004_v43 = vsub.f32 %v1988_v41, %v1996_v30 }
 0xa55   :  { %v2037_v45 = vmul.f32 0.5, %v2036_v44  ;;  %v1469_v48 = vsel %vm92_vm1, %v5427_v42, 0.0  ;;  %v1487_v51 = vmul.f32 %v5427_v42, %v5427_v42 }
 0xa56   :  { %v2012_v36 = vmax.f32 %v2004_v43, 0.0  ;;  %1470 = vadd.xlane.f32.xlu0 %v1469_v48 }
 0xa57   :  { %v2038_v57 = vsub.f32 1.5, %v2037_v45  ;;  %v1933_v59 = vpop.xlane.xlu1 %1932  ;;  %v1509_v54 = vsel %vm92_vm1, %v1487_v51, 0.0 }
 0xa58   :  { %v2028_v55 = vadd.f32 1e-12, %v2012_v36  ;;  %v5434_v47 = vmul.f32 0.03125, %v1933_v59  ;;  %1510 = vadd.xlane.f32.xlu2 %v1509_v54  ;;  %v4532_v3 = vpop.eup %4531 }
 0xa59   :  { %v2039_v34 = vmul.f32 %v4530_v33, %v2038_v57  ;;  %v1973_v29 = vpop.xlane.xlu0 %1972  ;;  %v2045_v56 = vmul.f32 %v4532_v3, %v2027_v5  ;;  %vm2051_vm0 = vweird.f32 %v4532_v3 }
 0xa5a   :  { %4533 = vrsqrt.f32 %v2028_v55  ;;  %v1997_v61 = vmul.f32 %v5434_v47, %v5434_v47  ;;  %v1989_v53 = vmul.f32 0.03125, %v1973_v29  ;;  %vm2052_vm3 = vmor %vm2050_vm2, %vm2051_vm0  ;;  %vm2060_vm5 = vweird.f32 %v2028_v55 }
 0xa5b   :  { %v2043_v60 = vsel %vm2042_vm14, %v4530_v33, %v2039_v34  ;;  %v2046_v62 = vmul.f32 %v4532_v3, %v2045_v56  ;;  %v2021_v40 = vsub.f32 %v5363_v35, %v5434_v47  ;;  %v4359_v47 = vld [vmem:[%s6019_s3 + $0x98] sm:$0xff] }
 0xa5c   :  { %v2114_v0 = vmul.f32 %v2043_v60, %v2018_v58  ;;  %v2005_v1 = vsub.f32 %v1989_v53, %v1997_v61 }
 0xa5d   :  { %v2047_v49 = vmul.f32 0.5, %v2046_v62  ;;  %v4358_v62 = vld [vmem:[%s6019_s3 + $0x90] sm:$0xff] }
 0xa5e   :  { %v2013_v2 = vmax.f32 %v2005_v1, 0.0  ;;  %v2123_v63 = vmul.f32 %v4411_v25, %v2114_v0 }
 0xa5f   :  { %v2048_v8 = vsub.f32 1.5, %v2047_v49 }
 0xa60   :  { %v4534_v4 = vpop.eup %4533  ;;  %v2029_v18 = vadd.f32 1e-12, %v2013_v2  ;;  %v2132_v52 = vadd.f32 %v4412_v21, %v2123_v63 }
 0xa61   :  { %v2055_v17 = vmul.f32 %v4534_v4, %v2028_v55  ;;  %v2049_v6 = vmul.f32 %v4532_v3, %v2048_v8  ;;  %vm2061_vm4 = vweird.f32 %v4534_v4 }
 0xa62   :  { %4535 = vrsqrt.f32 %v2029_v18  ;;  %v2140_v16 = vpack.c.bf16 %v2132_v52, %v2132_v52  ;;  %vm2062_vm6 = vmor %vm2060_vm5, %vm2061_vm4  ;;  %vm2070_vm8 = vweird.f32 %v2029_v18 }
 0xa63   :  { %v2056_v23 = vmul.f32 %v4534_v4, %v2055_v17  ;;  %v2053_v27 = vsel %vm2052_vm3, %v4532_v3, %v2049_v6 }
 0xa64   :  { %v2115_v37 = vmul.f32 %v2053_v27, %v2019_v10  ;;  %v2159_v44 = vunpack.c.l.b16 %v2140_v16 }
 0xa65   :  { %v2057_v24 = vmul.f32 0.5, %v2056_v23 }
 0xa66   :  { %v2124_v13 = vmul.f32 %v4411_v25, %v2115_v37 }
 0xa67   :  { %v2058_v31 = vsub.f32 1.5, %v2057_v24 }
 0xa68   :  { %v4536_v33 = vpop.eup %4535  ;;  %v2133_v15 = vadd.f32 %v4412_v21, %v2124_v13 }
 0xa69   :  { %v2059_v7 = vmul.f32 %v4534_v4, %v2058_v31  ;;  %v2065_v5 = vmul.f32 %v4536_v33, %v2029_v18  ;;  %vm2071_vm7 = vweird.f32 %v4536_v33 }
 0xa6a   :  { %v2141_v14 = vpack.c.bf16 %v2133_v15, %v2133_v15  ;;  %vm2072_vm9 = vmor %vm2070_vm8, %vm2071_vm7 }
 0xa6b   :  { %v2063_v30 = vsel %vm2062_vm6, %v4534_v4, %v2059_v7  ;;  %v2066_v41 = vmul.f32 %v4536_v33, %v2065_v5 }
 0xa6c   :  { %v2160_v43 = vunpack.c.l.b16 %v2141_v14  ;;  %v2116_v45 = vmul.f32 %v2063_v30, %v2020_v39 }
 0xa6d   :  { %v2067_v48 = vmul.f32 0.5, %v2066_v41 }
 0xa6e   :  { %v5456_v51 = vpack.c.b16 %v2160_v43, %v2159_v44  ;;  %v2125_v57 = vmul.f32 %v4411_v25, %v2116_v45 }
 0xa6f   :  { %v2068_v36 = vsub.f32 1.5, %v2067_v48 }
 0xa70   :  { %4042 = vmatmul.msk.bf16.vlgmr.msrb.gmra.mxu0 %vm92_vm1, %v5456_v51  ;;  %4056 = vmatmul.msk.bf16.vlgmr.msra.gmra.mxu1 %vm92_vm1, %v5456_v51  ;;  %v2134_v55 = vadd.f32 %v4412_v21, %v2125_v57 }
 0xa71   :  { %v2069_v59 = vmul.f32 %v4536_v33, %v2068_v36  ;;  %2454 = vmatpush.bf16.msrb.mxu0 %v4359_v47 }
 0xa72   :  { %v2142_v29 = vpack.c.bf16 %v2134_v55, %v2134_v55 }
 0xa73   :  { %v2073_v54 = vsel %vm2072_vm9, %v4536_v33, %v2069_v59 }
 0xa74   :  { %v2117_v3 = vmul.f32 %v2073_v54, %v2021_v40  ;;  %v2161_v60 = vunpack.c.l.b16 %v2142_v29 }
 0xa75   :  { %2455 = vmatpush.bf16.msrb.mxu0 %v4358_v62 }
 0xa76   :  { %v2126_v34 = vmul.f32 %v4411_v25, %v2117_v3 }
 0xa78   :  { %v2135_v56 = vadd.f32 %v4412_v21, %v2126_v34 }
 0xa7a   :  { %v2143_v58 = vpack.c.bf16 %v2135_v56, %v2135_v56 }
 0xa7c   :  { %v2162_v61 = vunpack.c.l.b16 %v2143_v58 }
 0xa7e   :  { %v5464_v53 = vpack.c.b16 %v2162_v61, %v2161_v60 }
 0xa80   :  { %4043 = vmatmul.msk.bf16.gmra.mxu0 %vm92_vm1, %v5464_v53  ;;  %4057 = vmatmul.msk.bf16.gmra.mxu1 %vm92_vm1, %v5464_v53 }
 0xa90   :  { %4070 = vmatmul.msk.bf16.vlgmr.msra.gmra.mxu0 %vm92_vm1, %v5456_v51 }
 0xaa0   :  { %4071 = vmatmul.msk.bf16.gmra.mxu0 %vm92_vm1, %v5464_v53 }
 0xab0   :  { %4104 = vmatmul.msk.bf16.vlgmr.msrb.gmra.mxu0 %vm92_vm1, %v5456_v51 }
 0xab1   :  { %v1462_v25 = vpop.xlane.xlu1 %1461 }
 0xab2   :  { %v1476_v0 = vmul.f32 0.03125, %v1462_v25 }
 0xab3   :  { %v1502_v1 = vpop.xlane.xlu0 %1501 }
 0xab4   :  { %v1524_v49 = vmul.f32 %v1476_v0, %v1476_v0  ;;  %v1516_v2 = vmul.f32 0.03125, %v1502_v1  ;;  %v1548_v3 = vsub.f32 %v5374_v20, %v1476_v0 }
 0xab6   :  { %v1532_v4 = vsub.f32 %v1516_v2, %v1524_v49 }
 0xab8   :  { %v1540_v8 = vmax.f32 %v1532_v4, 0.0 }
 0xab9   :  { %v1465_v21 = vpop.xlane.xlu2 %1464 }
 0xaba   :  { %v1556_v63 = vadd.f32 1e-12, %v1540_v8  ;;  %v1477_v17 = vmul.f32 0.03125, %v1465_v21 }
 0xabb   :  { %v1505_v18 = vpop.xlane.xlu1 %1504 }
 0xabc   :  { %4537 = vrsqrt.f32 %v1556_v63  ;;  %v1525_v19 = vmul.f32 %v1477_v17, %v1477_v17  ;;  %v1517_v6 = vmul.f32 0.03125, %v1505_v18  ;;  %vm1606_vm11 = vweird.f32 %v1556_v63 }
 0xabd   :  { %v1549_v62 = vsub.f32 %v5388_v50, %v1477_v17 }
 0xabe   :  { %v1533_v10 = vsub.f32 %v1517_v6, %v1525_v19 }
 0xac0   :  { %v1541_v23 = vmax.f32 %v1533_v10, 0.0  ;;  %4105 = vmatmul.msk.bf16.gmra.mxu0 %vm92_vm1, %v5464_v53 }
 0xac1   :  { %v1468_v26 = vpop.xlane.xlu2 %1467 }
 0xac2   :  { %v4538_v27 = vpop.eup %4537  ;;  %v5484_v52 = vmul.f32 0.03125, %v1468_v26  ;;  %v1557_v24 = vadd.f32 1e-12, %v1541_v23 }
 0xac3   :  { %v1601_v37 = vmul.f32 %v4538_v27, %v1556_v63  ;;  %v1508_v13 = vpop.xlane.xlu1 %1507  ;;  %vm1607_vm10 = vweird.f32 %v4538_v27 }
 0xac4   :  { %v1526_v31 = vmul.f32 %v5484_v52, %v5484_v52  ;;  %v1518_v33 = vmul.f32 0.03125, %v1508_v13  ;;  %4539 = vrsqrt.f32 %v1557_v24  ;;  %vm1608_vm12 = vmor %vm1606_vm11, %vm1607_vm10  ;;  %vm1616_vm14 = vweird.f32 %v1557_v24 }
 0xac5   :  { %v1602_v16 = vmul.f32 %v4538_v27, %v1601_v37 }
 0xac6   :  { %v1534_v15 = vsub.f32 %v1518_v33, %v1526_v31 }
 0xac7   :  { %v1603_v7 = vmul.f32 0.5, %v1602_v16 }
 0xac8   :  { %v1542_v5 = vmax.f32 %v1534_v15, 0.0 }
 0xac9   :  { %v1604_v14 = vsub.f32 1.5, %v1603_v7  ;;  %v1471_v39 = vpop.xlane.xlu0 %1470 }
 0xaca   :  { %v1558_v30 = vadd.f32 1e-12, %v1542_v5  ;;  %v1479_v41 = vmul.f32 0.03125, %v1471_v39  ;;  %v4540_v44 = vpop.eup %4539 }
 0xacb   :  { %v1511_v43 = vpop.xlane.xlu2 %1510  ;;  %v1605_v45 = vmul.f32 %v4538_v27, %v1604_v14  ;;  %v1611_v48 = vmul.f32 %v4540_v44, %v1557_v24  ;;  %vm1617_vm13 = vweird.f32 %v4540_v44 }
 0xacc   :  { %4541 = vrsqrt.f32 %v1558_v30  ;;  %v1527_v36 = vmul.f32 %v1479_v41, %v1479_v41  ;;  %v1519_v57 = vmul.f32 0.03125, %v1511_v43  ;;  %vm1618_vm0 = vmor %vm1616_vm14, %vm1617_vm13  ;;  %vm1626_vm3 = vweird.f32 %v1558_v30 }
 0xacd   :  { %v1612_v59 = vmul.f32 %v4540_v44, %v1611_v48  ;;  %v1609_v54 = vsel %vm1608_vm12, %v4538_v27, %v1605_v45  ;;  %v1550_v27 = vsub.f32 %v5408_v9, %v5484_v52  ;;  %v1551_v31 = vsub.f32 %v5427_v42, %v1479_v41  ;;  %v4414_v48 = vld [vmem:[%s6020_s4 + $0x8] ss:$0 sm:$0xff] }
 0xace   :  { %v1535_v40 = vsub.f32 %v1519_v57, %v1527_v36  ;;  %v1644_v58 = vmul.f32 %v1609_v54, %v1548_v3 }
 0xacf   :  { %v1613_v55 = vmul.f32 0.5, %v1612_v59 }
 0xad0   :  { %v1543_v34 = vmax.f32 %v1535_v40, 0.0  ;;  %v1653_v4 = vmul.f32 %v5253_v32, %v1644_v58 }
 0xad1   :  { %v1614_v56 = vsub.f32 1.5, %v1613_v55 }
 0xad2   :  { %v4542_v29 = vpop.eup %4541  ;;  %v1559_v61 = vadd.f32 1e-12, %v1543_v34  ;;  %v1662_v63 = vadd.f32 %v5260_v38, %v1653_v4 }
 0xad3   :  { %v1621_v60 = vmul.f32 %v4542_v29, %v1558_v30  ;;  %v1615_v47 = vmul.f32 %v4540_v44, %v1614_v56  ;;  %vm1627_vm2 = vweird.f32 %v4542_v29  ;;  %v4413_v56 = vld [vmem:[%s6020_s4 + $0x6] ss:$0 sm:$0xff] }
 0xad4   :  { %4543 = vrsqrt.f32 %v1559_v61  ;;  %vm1628_vm4 = vmor %vm1626_vm3, %vm1627_vm2  ;;  %vm1636_vm6 = vweird.f32 %v1559_v61 }
 0xad5   :  { %v1622_v25 = vmul.f32 %v4542_v29, %v1621_v60  ;;  %v1619_v1 = vsel %vm1618_vm0, %v4540_v44, %v1615_v47  ;;  %v4360_v47 = vld [vmem:[%s6019_s3 + $0xb0] sm:$0xff] }
 0xad6   :  { %v1645_v49 = vmul.f32 %v1619_v1, %v1549_v62 }
 0xad7   :  { %v1623_v2 = vmul.f32 0.5, %v1622_v25 }
 0xad8   :  { %v1654_v8 = vmul.f32 %v5253_v32, %v1645_v49 }
 0xad9   :  { %v1624_v0 = vsub.f32 1.5, %v1623_v2  ;;  %v4415_v2 = vld [vmem:[%s6020_s4 + $0xa] ss:$0 sm:$0xff] }
 0xada   :  { %v4544_v21 = vpop.eup %4543  ;;  %v1663_v18 = vadd.f32 %v5260_v38, %v1654_v8 }
 0xadb   :  { %v1625_v19 = vmul.f32 %v4542_v29, %v1624_v0  ;;  %v1631_v6 = vmul.f32 %v4544_v21, %v1559_v61  ;;  %vm1637_vm5 = vweird.f32 %v4544_v21 }
 0xadc   :  { %v1668_v17 = vpack.c.bf16 %v1663_v18, %v1662_v63  ;;  %vm1638_vm7 = vmor %vm1636_vm6, %vm1637_vm5 }
 0xadd   :  { %v1632_v10 = vmul.f32 %v4544_v21, %v1631_v6  ;;  %v1629_v23 = vsel %vm1628_vm4, %v4542_v29, %v1625_v19  ;;  %v4361_v29 = vld [vmem:[%s6019_s3 + $0xb8] sm:$0xff] }
 0xade   :  { %3989 = vmatmul.msk.bf16.gmra.mxu2 %vm92_vm1, %v1668_v17  ;;  %v1646_v24 = vmul.f32 %v1629_v23, %v1550_v27  ;;  %v4416_v27 = vld [vmem:[%s6020_s4 + $0x9] ss:$0 sm:$0xff] }
 0xadf   :  { %v1633_v26 = vmul.f32 0.5, %v1632_v10 }
 0xae0   :  { %v1655_v15 = vmul.f32 %v5253_v32, %v1646_v24 }
 0xae1   :  { %v1634_v37 = vsub.f32 1.5, %v1633_v26 }
 0xae2   :  { %v1664_v5 = vadd.f32 %v5260_v38, %v1655_v15 }
 0xae3   :  { %v1635_v13 = vmul.f32 %v4544_v21, %v1634_v37 }
 0xae5   :  { %v1639_v33 = vsel %vm1638_vm7, %v4544_v21, %v1635_v13 }
 0xae6   :  { %v1647_v16 = vmul.f32 %v1639_v33, %v1551_v31 }
 0xae8   :  { %v1656_v7 = vmul.f32 %v5253_v32, %v1647_v16 }
 0xaea   :  { %v1665_v14 = vadd.f32 %v5260_v38, %v1656_v7 }
 0xaec   :  { %v1669_v39 = vpack.c.bf16 %v1665_v14, %v1664_v5 }
 0xaed   :  { %v2192_v52 = vpop.f32.mrf.mxu0  ;;  %v2230_v30 = vpop.f32.mrf.mxu1 }
 0xaee   :  { %3990 = vmatmul.msk.bf16.gmra.mxu2 %vm92_vm1, %v1669_v39  ;;  %v2231_v55 = vadd.f32 %v4414_v48, %v2230_v30  ;;  %v2193_v62 = vadd.f32 %v4413_v56, %v2192_v52 }
 0xaf5   :  { %v2194_v44 = vpop.f32.mrf.mxu0  ;;  %v2232_v43 = vpop.f32.mrf.mxu1 }
 0xaf6   :  { %v2233_v54 = vadd.f32 %v4414_v48, %v2232_v43  ;;  %v2195_v60 = vadd.f32 %v4413_v56, %v2194_v44 }
 0xaf8   :  { %v2280_v34 = vpack.c.bf16 %v2233_v54, %v2231_v55  ;;  %v2278_v25 = vpack.c.bf16 %v2195_v60, %v2193_v62 }
 0xafa   :  { %v2289_v58 = vsel %vm493_vm15, %v2280_v34, 0 }
 0xafd   :  { %v2197_v45 = vpop.f32.mrf.mxu0  ;;  %v2235_v41 = vpop.f32.mrf.mxu1 }
 0xafe   :  { %v2236_v32 = vadd.f32 %v4414_v48, %v2235_v41  ;;  %v2198_v0 = vadd.f32 %v4413_v56, %v2197_v45 }
 0xb05   :  { %v2199_v36 = vpop.f32.mrf.mxu0  ;;  %v2237_v57 = vpop.f32.mrf.mxu1 }
 0xb06   :  { %v2238_v59 = vadd.f32 %v4414_v48, %v2237_v57  ;;  %v2200_v49 = vadd.f32 %v4413_v56, %v2199_v36 }
 0xb08   :  { %v2281_v40 = vpack.c.bf16 %v2238_v59, %v2236_v32  ;;  %v2279_v63 = vpack.c.bf16 %v2200_v49, %v2198_v0 }
 0xb0a   :  { %v2292_v38 = vsel %vm493_vm15, %v2281_v40, 0 }
 0xb0b   :  { %2300 = vmatpush.bf16.xpose.msrb.mxu1 %v2292_v38 }
 0xb0d   :  { %v2268_v3 = vpop.f32.mrf.mxu0 }
 0xb0e   :  { %v2269_v6 = vadd.f32 %v4415_v2, %v2268_v3 }
 0xb13   :  { %2301 = vmatpush.bf16.xpose.msrb.mxu1 %v2289_v58 }
 0xb15   :  { %v2270_v61 = vpop.f32.mrf.mxu0 }
 0xb16   :  { %v2271_v18 = vadd.f32 %v4415_v2, %v2270_v61 }
 0xb18   :  { %v2359_v17 = vpack.c.bf16 %v2271_v18, %v2269_v6 }
 0xb1a   :  { %4072 = vmatmul.msk.bf16.vlgmr.msrb.gmra.mxu1 %vm493_vm15, %v2278_v25 }
 0xb1b   :  { %2492 = vmatpush.bf16.msra.mxu1 %v4361_v29 }
 0xb1d   :  { %v2273_v1 = vpop.f32.mrf.mxu0 }
 0xb1e   :  { %v2274_v8 = vadd.f32 %v4415_v2, %v2273_v1 }
 0xb1f   :  { %2493 = vmatpush.bf16.msra.mxu1 %v4360_v47  ;;  %v4357_v47 = vld [vmem:[%s6019_s3 + $0x78] sm:$0xff] }
 0xb20   :  { %2416 = vmatpush.bf16.msrb.mxu3 %v4357_v47 }
 0xb25   :  { %v2275_v4 = vpop.f32.mrf.mxu0 }
 0xb26   :  { %v2276_v21 = vadd.f32 %v4415_v2, %v2275_v4 }
 0xb28   :  { %v2360_v19 = vpack.c.bf16 %v2276_v21, %v2274_v8  ;;  %v4356_v21 = vld [vmem:[%s6019_s3 + $0x70] sm:$0xff] }
 0xb29   :  { %2417 = vmatpush.bf16.msrb.mxu3 %v4356_v21 }
 0xb2a   :  { %4073 = vmatmul.msk.bf16.gmra.mxu1 %vm493_vm15, %v2279_v63  ;;  %2373 = vmatpush.bf16.msra.mxu2 %v2360_v19 }
 0xb2d   :  { %v2457_v10 = vpop.f32.mrf.mxu0 }
 0xb2e   :  { %2374 = vmatpush.bf16.msra.mxu2 %v2359_v17  ;;  %v2458_v15 = vadd.f32 %v4416_v27, %v2457_v10 }
 0xb35   :  { %v2459_v23 = vpop.f32.mrf.mxu0 }
 0xb36   :  { %v2460_v33 = vadd.f32 %v4416_v27, %v2459_v23 }
 0xb38   :  { %v2507_v7 = vpack.c.bf16 %v2460_v33, %v2458_v15 }
 0xb3a   :  { %4118 = vmatmul.msk.bf16.vlgmr.msra.gmra.mxu1 %vm92_vm1, %v5456_v51  ;;  %v2516_v5 = vsel %vm493_vm15, %v2507_v7, 0 }
 0xb3d   :  { %v2462_v26 = vpop.f32.mrf.mxu0 }
 0xb3e   :  { %v2463_v24 = vadd.f32 %v4416_v27, %v2462_v26 }
 0xb45   :  { %v2464_v37 = vpop.f32.mrf.mxu0 }
 0xb46   :  { %v2465_v13 = vadd.f32 %v4416_v27, %v2464_v37 }
 0xb48   :  { %v2508_v31 = vpack.c.bf16 %v2465_v13, %v2463_v24 }
 0xb4a   :  { %4119 = vmatmul.msk.bf16.gmra.mxu1 %vm92_vm1, %v5464_v53  ;;  %v2519_v16 = vsel %vm493_vm15, %v2508_v31, 0 }
 0xb4b   :  { %2527 = vmatpush.bf16.xpose.msrb.mxu2 %v2519_v16 }
 0xb53   :  { %2528 = vmatpush.bf16.xpose.msrb.mxu2 %v2516_v5 }
 0xb61   :  { %v1718_v14 = vpop.f32.mrf.mxu2 }
 0xb62   :  { %v1719_v39 = vadd.f32 %v5309_v46, %v1718_v14 }
 0xb64   :  { %v1732_v52 = vmul.f32 %v1719_v39, %v1719_v39 }
 0xb66   :  { %v1740_v30 = vmul.f32 %v1732_v52, %v1719_v39 }
 0xb68   :  { %v1748_v44 = vmul.f32 0.044715, %v1740_v30 }
 0xb69   :  { %v1720_v43 = vpop.f32.mrf.mxu2 }
 0xb6a   :  { %v1756_v45 = vadd.f32 %v1748_v44, %v1719_v39  ;;  %v1721_v41 = vadd.f32 %v5309_v46, %v1720_v43 }
 0xb6c   :  { %v1764_v48 = vmul.f32 0.7978846, %v1756_v45  ;;  %v1733_v36 = vmul.f32 %v1721_v41, %v1721_v41 }
 0xb6e   :  { %v1741_v57 = vmul.f32 %v1733_v36, %v1721_v41  ;;  %4545 = vtanh.f32 %v1764_v48 }
 0xb70   :  { %v1749_v32 = vmul.f32 0.044715, %v1741_v57 }
 0xb71   :  { %v1723_v59 = vpop.f32.mrf.mxu2 }
 0xb72   :  { %v1757_v40 = vadd.f32 %v1749_v32, %v1721_v41  ;;  %v1724_v54 = vadd.f32 %v5309_v46, %v1723_v59 }
 0xb74   :  { %v1765_v38 = vmul.f32 0.7978846, %v1757_v40  ;;  %v1734_v55 = vmul.f32 %v1724_v54, %v1724_v54  ;;  %v4546_v3 = vpop.eup %4545 }
 0xb75   :  { %v1780_v58 = vadd.f32 1.0, %v4546_v3 }
 0xb76   :  { %v1742_v34 = vmul.f32 %v1734_v55, %v1724_v54  ;;  %4547 = vtanh.f32 %v1765_v38 }
 0xb77   :  { %v1788_v2 = vmul.f32 0.5, %v1780_v58 }
 0xb78   :  { %v1750_v29 = vmul.f32 0.044715, %v1742_v34 }
 0xb79   :  { %v1725_v56 = vpop.f32.mrf.mxu2  ;;  %v1796_v63 = vmul.f32 %v1788_v2, %v1719_v39 }
 0xb7a   :  { %v1758_v60 = vadd.f32 %v1750_v29, %v1724_v54  ;;  %v1726_v61 = vadd.f32 %v5309_v46, %v1725_v56 }
 0xb7c   :  { %v4548_v62 = vpop.eup %4547  ;;  %v1766_v25 = vmul.f32 0.7978846, %v1758_v60  ;;  %v1735_v1 = vmul.f32 %v1726_v61, %v1726_v61 }
 0xb7d   :  { %v1781_v49 = vadd.f32 1.0, %v4548_v62 }
 0xb7e   :  { %v1743_v4 = vmul.f32 %v1735_v1, %v1726_v61  ;;  %4549 = vtanh.f32 %v1766_v25 }
 0xb7f   :  { %v1789_v0 = vmul.f32 0.5, %v1781_v49 }
 0xb80   :  { %v1751_v8 = vmul.f32 0.044715, %v1743_v4 }
 0xb81   :  { %v1797_v46 = vmul.f32 %v1789_v0, %v1721_v41 }
 0xb82   :  { %v1759_v18 = vadd.f32 %v1751_v8, %v1726_v61 }
 0xb83   :  { %v1802_v19 = vpack.c.bf16 %v1797_v46, %v1796_v63 }
 0xb84   :  { %v1767_v6 = vmul.f32 0.7978846, %v1759_v18  ;;  %v4550_v17 = vpop.eup %4549 }
 0xb85   :  { %1886 = vmatmul.bf16.gmra.mxu3 %v1802_v19  ;;  %v1782_v10 = vadd.f32 1.0, %v4550_v17 }
 0xb86   :  { %4551 = vtanh.f32 %v1767_v6 }
 0xb87   :  { %v1790_v27 = vmul.f32 0.5, %v1782_v10 }
 0xb89   :  { %v1798_v24 = vmul.f32 %v1790_v27, %v1724_v54 }
 0xb8c   :  { %v4552_v23 = vpop.eup %4551 }
 0xb8d   :  { %v1783_v26 = vadd.f32 1.0, %v4552_v23 }
 0xb8f   :  { %v1791_v37 = vmul.f32 0.5, %v1783_v26 }
 0xb91   :  { %v1799_v13 = vmul.f32 %v1791_v37, %v1726_v61 }
 0xb93   :  { %v1803_v31 = vpack.c.bf16 %v1799_v13, %v1798_v24 }
 0xb95   :  { %1891 = vmatmul.bf16.gmra.mxu3 %v1803_v31 }
 0xb97   :  { %v2303_v33 = vpop.f32.mrf.mxu1 }
 0xb98   :  { %v2304_v16 = vadd.f32 %v2303_v33, %v4967_v12 }
 0xb9a   :  { %v2313_v15 = vsel %vm92_vm1, %v2304_v16, -inf }
 0xb9b   :  { %2314 = vmax.xlane.f32.xlu0 %v2313_v15 }
 0xb9f   :  { %v2305_v7 = vpop.f32.mrf.mxu1 }
 0xba0   :  { %v2306_v5 = vadd.f32 %v2305_v7, %v4967_v12 }
 0xba2   :  { %v2316_v14 = vsel %vm92_vm1, %v2306_v5, -inf }
 0xba3   :  { %2317 = vmax.xlane.f32.xlu1 %v2316_v14 }
 0xba5   :  { %4090 = vmatmul.msk.bf16.vlgmr.msrb.gmra.mxu3 %vm92_vm1, %v5456_v51  ;;  %v4417_v51 = vld [vmem:[%s6020_s4 + $0xb] ss:$0 sm:$0xff] }
 0xba7   :  { %v2308_v39 = vpop.f32.mrf.mxu1 }
 0xba8   :  { %v2309_v52 = vadd.f32 %v2308_v39, %v4967_v12 }
 0xbaa   :  { %v2319_v30 = vsel %vm92_vm1, %v2309_v52, -inf }
 0xbab   :  { %2320 = vmax.xlane.f32.xlu2 %v2319_v30  ;;  %v4418_v30 = vld [vmem:[%s6020_s4 + $0x7] ss:$0 sm:$0xff] }
 0xbaf   :  { %v2310_v44 = vpop.f32.mrf.mxu1 }
 0xbb0   :  { %v2311_v43 = vadd.f32 %v2310_v44, %v4967_v12 }
 0xbb2   :  { %v2322_v45 = vsel %vm92_vm1, %v2311_v43, -inf }
 0xbb3   :  { %2323 = vmax.xlane.f32.xlu0 %v2322_v45 }
 0xbb5   :  { %4091 = vmatmul.msk.bf16.gmra.mxu3 %vm92_vm1, %v5464_v53 }
 0xbb7   :  { %v2495_v41 = vpop.f32.mrf.mxu1 }
 0xbb8   :  { %v2496_v38 = vadd.f32 %v4417_v51, %v2495_v41 }
 0xbbf   :  { %v2497_v48 = vpop.f32.mrf.mxu1 }
 0xbc0   :  { %v2498_v40 = vadd.f32 %v4417_v51, %v2497_v48 }
 0xbc2   :  { %v2586_v55 = vpack.c.bf16 %v2498_v40, %v2496_v38 }
 0xbc7   :  { %v2500_v36 = vpop.f32.mrf.mxu1 }
 0xbc8   :  { %v2501_v32 = vadd.f32 %v4417_v51, %v2500_v36 }
 0xbcf   :  { %v2502_v57 = vpop.f32.mrf.mxu1 }
 0xbd0   :  { %v2503_v59 = vadd.f32 %v4417_v51, %v2502_v57 }
 0xbd2   :  { %v2587_v54 = vpack.c.bf16 %v2503_v59, %v2501_v32  ;;  %v4355_v32 = vld [vmem:[%s6021_s5 + $0x10] sm:$0xff] }
 0xbd3   :  { %2668 = vmatpush.bf16.msrb.mxu1 %v4355_v32 }
 0xbd4   :  { %2600 = vmatpush.bf16.msra.mxu3 %v2587_v54 }
 0xbd8   :  { %2601 = vmatpush.bf16.msra.mxu3 %v2586_v55 }
 0xc08   :  { %v1887_v18 = vpop.f32.mrf.mxu3 }
 0xc0e   :  { %v2315_v3 = vpop.xlane.xlu0 %2314 }
 0xc0f   :  { %v2325_v34 = vsub.f32 %v2304_v16, %v2315_v3 }
 0xc10   :  { %v5560_v19 = vpop.f32.mrf.mxu3 }
 0xc11   :  { %v2329_v29 = vmul.f32 1.442695, %v2325_v34 }
 0xc13   :  { %4553 = vpow2.f32 %v2329_v29 }
 0xc16   :  { %v2318_v53 = vpop.xlane.xlu1 %2317 }
 0xc17   :  { %v2326_v56 = vsub.f32 %v2306_v5, %v2318_v53 }
 0xc18   :  { %v5562_v10 = vpop.f32.mrf.mxu3 }
 0xc19   :  { %v4554_v58 = vpop.eup %4553  ;;  %v2331_v60 = vmul.f32 1.442695, %v2326_v56 }
 0xc1a   :  { %v2337_v61 = vsel %vm92_vm1, %v4554_v58, 0.0 }
 0xc1b   :  { %4555 = vpow2.f32 %v2331_v60  ;;  %2338 = vadd.xlane.f32.xlu1 %v2337_v61 }
 0xc1e   :  { %v2321_v47 = vpop.xlane.xlu2 %2320 }
 0xc1f   :  { %v2327_v62 = vsub.f32 %v2309_v52, %v2321_v47 }
 0xc20   :  { %v5564_v13 = vpop.f32.mrf.mxu3 }
 0xc21   :  { %v4556_v25 = vpop.eup %4555  ;;  %v2333_v1 = vmul.f32 1.442695, %v2327_v62 }
 0xc22   :  { %v2340_v49 = vsel %vm92_vm1, %v4556_v25, 0.0 }
 0xc23   :  { %4557 = vpow2.f32 %v2333_v1  ;;  %2341 = vadd.xlane.f32.xlu2 %v2340_v49  ;;  %v1901_v49 = vadd.f32 %v1887_v18, %v5374_v20 }
 0xc26   :  { %v2324_v2 = vpop.xlane.xlu0 %2323 }
 0xc27   :  { %v2328_v4 = vsub.f32 %v2311_v43, %v2324_v2 }
 0xc28   :  { %v2419_v15 = vpop.f32.mrf.mxu3 }
 0xc29   :  { %v4558_v0 = vpop.eup %4557  ;;  %v2335_v8 = vmul.f32 1.442695, %v2328_v4  ;;  %v2420_v43 = vadd.f32 %v4418_v30, %v2419_v15  ;;  %v4659_v4 = vld [vmem:[%s6024_s8 + $0x6] ss:$0 sm:$0xff] }
 0xc2a   :  { %v2343_v21 = vsel %vm92_vm1, %v4558_v0, 0.0 }
 0xc2b   :  { %4559 = vpow2.f32 %v2335_v8  ;;  %2344 = vadd.xlane.f32.xlu0 %v2343_v21  ;;  %v1902_v8 = vadd.f32 %v5560_v19, %v5388_v50  ;;  %v1904_v50 = vadd.f32 %v5564_v13, %v5427_v42 }
 0xc2d   :  { %v5594_v21 = vadd.f32 %v4659_v4, %v1902_v8  ;;  %v5607_v19 = vadd.f32 %v4659_v4, %v1904_v50  ;;  %v4363_v50 = vld [vmem:[%s6019_s3 + $0x60] sm:$0xff] }
 0xc2f   :  { %v1959_v20 = vmul.f32 %v5594_v21, %v5594_v21 }
 0xc30   :  { %v2421_v52 = vpop.f32.mrf.mxu3 }
 0xc31   :  { %v4560_v63 = vpop.eup %4559  ;;  %v2422_v44 = vadd.f32 %v4418_v30, %v2421_v52  ;;  %v1977_v18 = vsel %vm92_vm1, %v1959_v20, 0.0 }
 0xc32   :  { %v2346_v46 = vsel %vm92_vm1, %v4560_v63, 0.0 }
 0xc33   :  { %2347 = vadd.xlane.f32.xlu1 %v2346_v46  ;;  %v2505_v41 = vpack.c.bf16 %v2422_v44, %v2420_v43  ;;  %v1903_v46 = vadd.f32 %v5562_v10, %v5408_v9 }
 0xc38   :  { %v2424_v45 = vpop.f32.mrf.mxu3 }
 0xc39   :  { %v2425_v51 = vadd.f32 %v4418_v30, %v2424_v45 }
 0xc40   :  { %v2426_v48 = vpop.f32.mrf.mxu3 }
 0xc41   :  { %v2427_v36 = vadd.f32 %v4418_v30, %v2426_v48 }
 0xc43   :  { %v2506_v57 = vpack.c.bf16 %v2427_v36, %v2425_v51  ;;  %v1943_v36 = vsel %vm92_vm1, %v5607_v19, 0.0 }
 0xc8e   :  { %v2339_v6 = vpop.xlane.xlu1 %2338 }
 0xc8f   :  { %4561 = vrcp.f32 %v2339_v6  ;;  %v5603_v6 = vadd.f32 %v4659_v4, %v1903_v46 }
 0xc95   :  { %v4562_v23 = vpop.eup %4561 }
 0xc96   :  { %v2342_v17 = vpop.xlane.xlu2 %2341  ;;  %v2353_v27 = vmul.f32 %v4562_v23, %v4554_v58  ;;  %v1961_v23 = vmul.f32 %v5607_v19, %v5607_v19 }
 0xc97   :  { %4563 = vrcp.f32 %v2342_v17  ;;  %v1940_v17 = vsel %vm92_vm1, %v5603_v6, 0.0 }
 0xc9d   :  { %v4564_v26 = vpop.eup %4563 }
 0xc9e   :  { %v2354_v37 = vmul.f32 %v4564_v26, %v4556_v25  ;;  %v2345_v31 = vpop.xlane.xlu0 %2344  ;;  %v1983_v26 = vsel %vm92_vm1, %v1961_v23, 0.0 }
 0xc9f   :  { %4565 = vrcp.f32 %v2345_v31 }
 0xca0   :  { %v2357_v24 = vpack.c.bf16 %v2354_v37, %v2353_v27 }
 0xca2   :  { %4074 = vmatmul.msk.bf16.vlgmr.msra.gmra.mxu2 %vm92_vm1, %v2357_v24 }
 0xca5   :  { %v4566_v16 = vpop.eup %4565 }
 0xca6   :  { %v2348_v33 = vpop.xlane.xlu1 %2347  ;;  %v2355_v5 = vmul.f32 %v4566_v16, %v4558_v0  ;;  %v5590_v0 = vadd.f32 %v4659_v4, %v1901_v49 }
 0xca7   :  { %4567 = vrcp.f32 %v2348_v33 }
 0xca8   :  { %v1958_v52 = vmul.f32 %v5590_v0, %v5590_v0 }
 0xcaa   :  { %v1974_v45 = vsel %vm92_vm1, %v1958_v52, 0.0 }
 0xcad   :  { %v4568_v7 = vpop.eup %4567 }
 0xcae   :  { %v2356_v14 = vmul.f32 %v4568_v7, %v4560_v63  ;;  %v1934_v63 = vsel %vm92_vm1, %v5590_v0, 0.0 }
 0xcb0   :  { %v2358_v39 = vpack.c.bf16 %v2356_v14, %v2355_v5  ;;  %v1937_v14 = vsel %vm92_vm1, %v5594_v21, 0.0 }
 0xcb2   :  { %4075 = vmatmul.msk.bf16.gmra.mxu2 %vm92_vm1, %v2358_v39 }
 0xcc2   :  { %4120 = vmatmul.msk.bf16.vlgmr.msrb.gmra.mxu2 %vm493_vm15, %v2505_v41 }
 0xcd2   :  { %4121 = vmatmul.msk.bf16.gmra.mxu2 %vm493_vm15, %v2506_v57  ;;  %v1960_v57 = vmul.f32 %v5603_v6, %v5603_v6 }
 0xcd4   :  { %v1980_v32 = vsel %vm92_vm1, %v1960_v57, 0.0 }
 0xd25   :  { %v2376_v59 = vpop.f32.mrf.mxu2 }
 0xd2d   :  { %v2378_v40 = vpop.f32.mrf.mxu2 }
 0xd2e   :  { %v2386_v54 = vpack.c.bf16 %v2378_v40, %v2376_v59 }
 0xd30   :  { %4136 = vmatmul.msk.bf16.vlgmr.msrb.gmra.mxu1 %vm493_vm15, %v2386_v54 }
 0xd35   :  { %v2381_v38 = vpop.f32.mrf.mxu2 }
 0xd3d   :  { %v2383_v55 = vpop.f32.mrf.mxu2 }
 0xd3e   :  { %v2387_v3 = vpack.c.bf16 %v2383_v55, %v2381_v38 }
 0xd40   :  { %4137 = vmatmul.msk.bf16.gmra.mxu1 %vm493_vm15, %v2387_v3 }
 0xd45   :  { %v2530_v34 = vpop.f32.mrf.mxu2 }
 0xd46   :  { %v2531_v29 = vadd.f32 %v2530_v34, %v4967_v12 }
 0xd48   :  { %v2540_v53 = vsel %vm92_vm1, %v2531_v29, -inf }
 0xd49   :  { %2541 = vmax.xlane.f32.xlu2 %v2540_v53 }
 0xd4d   :  { %v2532_v56 = vpop.f32.mrf.mxu2 }
 0xd4e   :  { %v2533_v58 = vadd.f32 %v2532_v56, %v4967_v12 }
 0xd50   :  { %v2543_v60 = vsel %vm92_vm1, %v2533_v58, -inf }
 0xd51   :  { %2544 = vmax.xlane.f32.xlu0 %v2543_v60 }
 0xd55   :  { %v2535_v61 = vpop.f32.mrf.mxu2 }
 0xd56   :  { %v2536_v47 = vadd.f32 %v2535_v61, %v4967_v12 }
 0xd58   :  { %v2546_v62 = vsel %vm92_vm1, %v2536_v47, -inf }
 0xd59   :  { %2547 = vmax.xlane.f32.xlu1 %v2546_v62  ;;  %v4366_v62 = vld [vmem:[%s6019_s3 + $0x88] sm:$0xff] }
 0xd5a   :  { %2761 = vmatpush.bf16.msrb.mxu3 %v4366_v62 }
 0xd5d   :  { %v2537_v25 = vpop.f32.mrf.mxu2 }
 0xd5e   :  { %v2538_v1 = vadd.f32 %v2537_v25, %v4967_v12  ;;  %v4364_v25 = vld [vmem:[%s6019_s3 + $0x68] sm:$0xff] }
 0xd5f   :  { %2724 = vmatpush.bf16.msra.mxu2 %v4364_v25 }
 0xd60   :  { %v2549_v2 = vsel %vm92_vm1, %v2538_v1, -inf }
 0xd61   :  { %2550 = vmax.xlane.f32.xlu2 %v2549_v2 }
 0xd63   :  { %2725 = vmatpush.bf16.msra.mxu2 %v4363_v50 }
 0xd69   :  { %1935 = vadd.xlane.f32.xlu2 %v1934_v63 }
 0xd71   :  { %1978 = vadd.xlane.f32.xlu2 %v1977_v18 }
 0xd79   :  { %1941 = vadd.xlane.f32.xlu2 %v1940_v17  ;;  %v4365_v17 = vld [vmem:[%s6019_s3 + $0x80] sm:$0xff] }
 0xd7a   :  { %2762 = vmatpush.bf16.msrb.mxu3 %v4365_v17 }
 0xd81   :  { %1984 = vadd.xlane.f32.xlu2 %v1983_v26 }
 0xdbc   :  { %v2542_v9 = vpop.xlane.xlu2 %2541 }
 0xdbd   :  { %v2552_v10 = vsub.f32 %v2531_v29, %v2542_v9 }
 0xdbf   :  { %v2556_v27 = vmul.f32 1.442695, %v2552_v10 }
 0xdc1   :  { %4569 = vpow2.f32 %v2556_v27 }
 0xdc4   :  { %v2545_v37 = vpop.xlane.xlu0 %2544 }
 0xdc5   :  { %v2553_v24 = vsub.f32 %v2533_v58, %v2545_v37 }
 0xdc7   :  { %v4570_v31 = vpop.eup %4569  ;;  %v2558_v42 = vmul.f32 1.442695, %v2553_v24 }
 0xdc8   :  { %v2564_v13 = vsel %vm92_vm1, %v4570_v31, 0.0 }
 0xdc9   :  { %4571 = vpow2.f32 %v2558_v42  ;;  %2565 = vadd.xlane.f32.xlu0 %v2564_v13 }
 0xdcc   :  { %v2548_v33 = vpop.xlane.xlu1 %2547 }
 0xdcd   :  { %v2554_v16 = vsub.f32 %v2536_v47, %v2548_v33 }
 0xdcf   :  { %v4572_v15 = vpop.eup %4571  ;;  %v2560_v7 = vmul.f32 1.442695, %v2554_v16 }
 0xdd0   :  { %v2567_v5 = vsel %vm92_vm1, %v4572_v15, 0.0 }
 0xdd1   :  { %4573 = vpow2.f32 %v2560_v7  ;;  %2568 = vadd.xlane.f32.xlu1 %v2567_v5  ;;  %1938 = vadd.xlane.f32.xlu0 %v1937_v14 }
 0xdd4   :  { %v2551_v39 = vpop.xlane.xlu2 %2550 }
 0xdd5   :  { %v2555_v30 = vsub.f32 %v2538_v1, %v2551_v39 }
 0xdd7   :  { %v5620_v44 = vpop.eup %4573  ;;  %v2562_v43 = vmul.f32 1.442695, %v2555_v30 }
 0xdd8   :  { %v2570_v41 = vsel %vm92_vm1, %v5620_v44, 0.0 }
 0xdd9   :  { %4575 = vpow2.f32 %v2562_v43  ;;  %1975 = vadd.xlane.f32.xlu1 %v1974_v45  ;;  %2571 = vadd.xlane.f32.xlu0 %v2570_v41 }
 0xddc   :  { %v1936_v59 = vpop.xlane.xlu2 %1935 }
 0xddd   :  { %v5638_v56 = vmul.f32 0.03125, %v1936_v59 }
 0xddf   :  { %v5625_v48 = vpop.eup %4575  ;;  %v1998_v8 = vmul.f32 %v5638_v56, %v5638_v56  ;;  %v2022_v25 = vsub.f32 %v5590_v0, %v5638_v56 }
 0xde0   :  { %v2573_v51 = vsel %vm92_vm1, %v5625_v48, 0.0 }
 0xde1   :  { %1944 = vadd.xlane.f32.xlu0 %v1943_v36  ;;  %2574 = vadd.xlane.f32.xlu1 %v2573_v51 }
 0xde4   :  { %v1979_v54 = vpop.xlane.xlu2 %1978 }
 0xde5   :  { %v1991_v34 = vmul.f32 0.03125, %v1979_v54 }
 0xde9   :  { %1981 = vadd.xlane.f32.xlu1 %v1980_v32 }
 0xdec   :  { %v1942_v58 = vpop.xlane.xlu2 %1941 }
 0xded   :  { %v5659_v33 = vmul.f32 0.03125, %v1942_v58 }
 0xdef   :  { %v2000_v30 = vmul.f32 %v5659_v33, %v5659_v33 }
 0xdf4   :  { %v1985_v26 = vpop.xlane.xlu2 %1984 }
 0xdf5   :  { %v1993_v42 = vmul.f32 0.03125, %v1985_v26 }
 0xe3c   :  { %v2566_v40 = vpop.xlane.xlu0 %2565 }
 0xe3d   :  { %4577 = vrcp.f32 %v2566_v40 }
 0xe43   :  { %v4578_v53 = vpop.eup %4577 }
 0xe44   :  { %v2569_v38 = vpop.xlane.xlu1 %2568  ;;  %v1939_v55 = vpop.xlane.xlu0 %1938  ;;  %v2580_v1 = vmul.f32 %v4578_v53, %v4570_v31 }
 0xe45   :  { %4579 = vrcp.f32 %v2569_v38  ;;  %v5634_v3 = vmul.f32 0.03125, %v1939_v55 }
 0xe47   :  { %v1999_v29 = vmul.f32 %v5634_v3, %v5634_v3  ;;  %v2023_v54 = vsub.f32 %v5594_v21, %v5634_v3  ;;  %v4371_v3 = vld [vmem:[%s6019_s3 + $0x78] sm:$0xff] }
 0xe49   :  { %v2007_v60 = vsub.f32 %v1991_v34, %v1999_v29 }
 0xe4b   :  { %v4580_v61 = vpop.eup %4579  ;;  %v2015_v47 = vmax.f32 %v2007_v60, 0.0 }
 0xe4c   :  { %v2581_v49 = vmul.f32 %v4580_v61, %v4572_v15  ;;  %v1976_v2 = vpop.xlane.xlu1 %1975  ;;  %v2572_v4 = vpop.xlane.xlu0 %2571 }
 0xe4d   :  { %v2031_v63 = vadd.f32 1e-12, %v2015_v47  ;;  %v1990_v20 = vmul.f32 0.03125, %v1976_v2 }
 0xe4e   :  { %v2584_v46 = vpack.c.bf16 %v2581_v49, %v2580_v1  ;;  %v4370_v1 = vld [vmem:[%s6019_s3 + $0x70] sm:$0xff] }
 0xe4f   :  { %4581 = vrsqrt.f32 %v2031_v63  ;;  %v2006_v18 = vsub.f32 %v1990_v20, %v1998_v8  ;;  %vm2090_vm9 = vweird.f32 %v2031_v63 }
 0xe50   :  { %4122 = vmatmul.msk.bf16.vlgmr.msra.gmra.mxu3 %vm92_vm1, %v2584_v46  ;;  %4583 = vrcp.f32 %v2572_v4  ;;  %v4661_v4 = vld [vmem:[%s6024_s8 + $0x9] ss:$0 sm:$0xff] }
 0xe51   :  { %v2014_v23 = vmax.f32 %v2006_v18, 0.0  ;;  %2947 = vmatpush.bf16.msra.mxu3 %v4371_v3 }
 0xe53   :  { %v2030_v9 = vadd.f32 1e-12, %v2014_v23 }
 0xe54   :  { %v1945_v10 = vpop.xlane.xlu0 %1944  ;;  %v2575_v27 = vpop.xlane.xlu1 %2574 }
 0xe55   :  { %v4582_v37 = vpop.eup %4581  ;;  %4585 = vrsqrt.f32 %v2030_v9  ;;  %v5655_v24 = vmul.f32 0.03125, %v1945_v10  ;;  %vm2080_vm12 = vweird.f32 %v2030_v9  ;;  %2948 = vmatpush.bf16.msra.mxu3 %v4370_v1 }
 0xe56   :  { %v2085_v31 = vmul.f32 %v4582_v37, %v2031_v63  ;;  %4587 = vrcp.f32 %v2575_v27  ;;  %v4584_v7 = vpop.eup %4583  ;;  %vm2091_vm8 = vweird.f32 %v4582_v37 }
 0xe57   :  { %v2001_v13 = vmul.f32 %v5655_v24, %v5655_v24  ;;  %v2582_v36 = vmul.f32 %v4584_v7, %v5620_v44  ;;  %vm2092_vm10 = vmor %vm2090_vm9, %vm2091_vm8 }
 0xe58   :  { %v2086_v16 = vmul.f32 %v4582_v37, %v2085_v31 }
 0xe59   :  { %v2009_v15 = vsub.f32 %v1993_v42, %v2001_v13  ;;  %v2025_v42 = vsub.f32 %v5607_v19, %v5655_v24  ;;  %v2024_v24 = vsub.f32 %v5603_v6, %v5659_v33  ;;  %v4362_v33 = vld [vmem:[%s6021_s5 + $0x18] sm:$0xff] }
 0xe5a   :  { %v2087_v5 = vmul.f32 0.5, %v2086_v16  ;;  %2637 = vmatpush.bf16.msra.mxu0 %v4362_v33 }
 0xe5b   :  { %v4586_v14 = vpop.eup %4585  ;;  %v2017_v39 = vmax.f32 %v2009_v15, 0.0 }
 0xe5c   :  { %v4588_v52 = vpop.eup %4587  ;;  %v2088_v43 = vsub.f32 1.5, %v2087_v5  ;;  %v2075_v45 = vmul.f32 %v4586_v14, %v2030_v9  ;;  %v1982_v41 = vpop.xlane.xlu1 %1981  ;;  %vm2081_vm11 = vweird.f32 %v4586_v14 }
 0xe5d   :  { %v2033_v51 = vadd.f32 1e-12, %v2017_v39  ;;  %v2583_v57 = vmul.f32 %v4588_v52, %v5625_v48  ;;  %v1992_v32 = vmul.f32 0.03125, %v1982_v41  ;;  %v4660_v48 = vld [vmem:[%s6024_s8 + $0x8] ss:$0 sm:$0xff]  ;;  %vm2082_vm13 = vmor %vm2080_vm12, %vm2081_vm11 }
 0xe5e   :  { %v2089_v59 = vmul.f32 %v4582_v37, %v2088_v43  ;;  %v2076_v40 = vmul.f32 %v4586_v14, %v2075_v45 }
 0xe5f   :  { %4589 = vrsqrt.f32 %v2033_v51  ;;  %v2008_v38 = vsub.f32 %v1992_v32, %v2000_v30  ;;  %v2585_v55 = vpack.c.bf16 %v2583_v57, %v2582_v36  ;;  %vm2110_vm0 = vweird.f32 %v2033_v51 }
 0xe60   :  { %v2093_v34 = vsel %vm2092_vm10, %v4582_v37, %v2089_v59  ;;  %v2077_v29 = vmul.f32 0.5, %v2076_v40 }
 0xe61   :  { %v2119_v53 = vmul.f32 %v2093_v34, %v2023_v54  ;;  %v2016_v58 = vmax.f32 %v2008_v38, 0.0  ;;  %4123 = vmatmul.msk.bf16.gmra.mxu3 %vm92_vm1, %v2585_v55  ;;  %v4368_v54 = vld [vmem:[%s6019_s3 + $0xa8] sm:$0xff]  ;;  %v4367_v38 = vld [vmem:[%s6019_s3 + $0xa0] sm:$0xff] }
 0xe62   :  { %v2078_v44 = vsub.f32 1.5, %v2077_v29  ;;  %2798 = vmatpush.bf16.msrb.mxu0 %v4368_v54 }
 0xe63   :  { %v2128_v60 = vmul.f32 %v4660_v48, %v2119_v53  ;;  %v2032_v61 = vadd.f32 1e-12, %v2016_v58 }
 0xe64   :  { %v2079_v47 = vmul.f32 %v4586_v14, %v2078_v44 }
 0xe65   :  { %v4590_v62 = vpop.eup %4589  ;;  %4591 = vrsqrt.f32 %v2032_v61  ;;  %v2137_v8 = vadd.f32 %v4661_v4, %v2128_v60  ;;  %vm2100_vm4 = vweird.f32 %v2032_v61  ;;  %v4372_v60 = vld [vmem:[%s6019_s3 + $0x90] sm:$0xff] }
 0xe66   :  { %v2083_v49 = vsel %vm2082_vm13, %v4586_v14, %v2079_v47  ;;  %v2105_v2 = vmul.f32 %v4590_v62, %v2033_v51  ;;  %vm2111_vm14 = vweird.f32 %v4590_v62  ;;  %2799 = vmatpush.bf16.msrb.mxu0 %v4367_v38 }
 0xe67   :  { %v2118_v63 = vmul.f32 %v2083_v49, %v2022_v25  ;;  %v2145_v50 = vpack.c.bf16 %v2137_v8, %v2137_v8  ;;  %vm2112_vm2 = vmor %vm2110_vm0, %vm2111_vm14 }
 0xe68   :  { %v2106_v20 = vmul.f32 %v4590_v62, %v2105_v2 }
 0xe69   :  { %v2127_v46 = vmul.f32 %v4660_v48, %v2118_v63  ;;  %v2695_v37 = vunpack.c.l.b16 %v2145_v50 }
 0xe6a   :  { %v2107_v18 = vmul.f32 0.5, %v2106_v20 }
 0xe6b   :  { %v4592_v56 = vpop.eup %4591  ;;  %v2136_v17 = vadd.f32 %v4661_v4, %v2127_v46 }
 0xe6c   :  { %v2108_v23 = vsub.f32 1.5, %v2107_v18  ;;  %v2095_v26 = vmul.f32 %v4592_v56, %v2032_v61  ;;  %vm2101_vm3 = vweird.f32 %v4592_v56  ;;  %v4375_v18 = vld [vmem:[%s6019_s3 + $0xb8] sm:$0xff] }
 0xe6d   :  { %v2144_v9 = vpack.c.bf16 %v2136_v17, %v2136_v17  ;;  %vm2102_vm5 = vmor %vm2100_vm4, %vm2101_vm3 }
 0xe6e   :  { %v2109_v10 = vmul.f32 %v4590_v62, %v2108_v23  ;;  %v2096_v27 = vmul.f32 %v4592_v56, %v2095_v26  ;;  %v4374_v23 = vld [vmem:[%s6019_s3 + $0xb0] sm:$0xff] }
 0xe6f   :  { %v2694_v31 = vunpack.c.l.b16 %v2144_v9 }
 0xe70   :  { %v2113_v13 = vsel %vm2112_vm2, %v4590_v62, %v2109_v10  ;;  %v2097_v16 = vmul.f32 0.5, %v2096_v27  ;;  %v4420_v62 = vld [vmem:[%s6020_s4 + $0x8] ss:$0 sm:$0xff] }
 0xe71   :  { %v2121_v15 = vmul.f32 %v2113_v13, %v2025_v42  ;;  %v5684_v7 = vpack.c.b16 %v2695_v37, %v2694_v31  ;;  %v2670_v13 = vpop.f32.mrf.mxu1 }
 0xe72   :  { %v2098_v5 = vsub.f32 1.5, %v2097_v16 }
 0xe73   :  { %v2130_v14 = vmul.f32 %v4660_v48, %v2121_v15  ;;  %4150 = vmatmul.msk.bf16.vlgmr.msra.gmra.mxu2 %vm92_vm1, %v5684_v7  ;;  %4164 = vmatmul.msk.bf16.vlgmr.msrb.gmra.mxu3 %vm92_vm1, %v5684_v7 }
 0xe74   :  { %v2099_v39 = vmul.f32 %v4592_v56, %v2098_v5 }
 0xe75   :  { %v2139_v30 = vadd.f32 %v4661_v4, %v2130_v14 }
 0xe76   :  { %v2103_v52 = vsel %vm2102_vm5, %v4592_v56, %v2099_v39  ;;  %v4419_v56 = vld [vmem:[%s6020_s4 + $0x6] ss:$0 sm:$0xff] }
 0xe77   :  { %v2120_v43 = vmul.f32 %v2103_v52, %v2024_v24  ;;  %v2147_v41 = vpack.c.bf16 %v2139_v30, %v2139_v30 }
 0xe79   :  { %v2129_v45 = vmul.f32 %v4660_v48, %v2120_v43  ;;  %v2697_v57 = vunpack.c.l.b16 %v2147_v41  ;;  %v4373_v48 = vld [vmem:[%s6019_s3 + $0x98] sm:$0xff]  ;;  %v2672_v5 = vpop.f32.mrf.mxu1 }
 0xe7b   :  { %v2138_v36 = vadd.f32 %v4661_v4, %v2129_v45 }
 0xe7d   :  { %v2146_v51 = vpack.c.bf16 %v2138_v36, %v2138_v36 }
 0xe7f   :  { %v2696_v32 = vunpack.c.l.b16 %v2146_v51 }
 0xe81   :  { %v2699_v59 = vpack.c.b16 %v2697_v57, %v2696_v32  ;;  %v2675_v24 = vpop.f32.mrf.mxu1  ;;  %v4422_v57 = vld [vmem:[%s6020_s4 + $0xa] ss:$0 sm:$0xff] }
 0xe83   :  { %4151 = vmatmul.msk.bf16.gmra.mxu2 %vm92_vm1, %v2699_v59  ;;  %4165 = vmatmul.msk.bf16.gmra.mxu3 %vm92_vm1, %v2699_v59 }
 0xe89   :  { %v2677_v43 = vpop.f32.mrf.mxu1 }
 0xe93   :  { %4198 = vmatmul.msk.bf16.vlgmr.msra.gmra.mxu3 %vm92_vm1, %v5684_v7 }
 0xea3   :  { %4199 = vmatmul.msk.bf16.gmra.mxu3 %vm92_vm1, %v2699_v59 }
 0xed3   :  { %v2603_v40 = vpop.f32.mrf.mxu3 }
 0xedb   :  { %v2605_v55 = vpop.f32.mrf.mxu3 }
 0xedc   :  { %v2613_v34 = vpack.c.bf16 %v2605_v55, %v2603_v40 }
 0xede   :  { %4130 = vmatmul.msk.bf16.vlgmr.msra.gmra.mxu0 %vm493_vm15, %v2613_v34 }
 0xedf   :  { %2984 = vmatpush.bf16.msra.mxu0 %v4373_v48 }
 0xee3   :  { %2985 = vmatpush.bf16.msra.mxu0 %v4372_v60 }
 0xee4   :  { %v2608_v29 = vpop.f32.mrf.mxu3 }
 0xeec   :  { %v2610_v53 = vpop.f32.mrf.mxu3 }
 0xeed   :  { %v2614_v58 = vpack.c.bf16 %v2610_v53, %v2608_v29 }
 0xeef   :  { %4131 = vmatmul.msk.bf16.gmra.mxu0 %vm493_vm15, %v2614_v58 }
 0xef6   :  { %v2764_v44 = vpop.f32.mrf.mxu3  ;;  %v2727_v47 = vpop.f32.mrf.mxu2 }
 0xef7   :  { %v2765_v63 = vadd.f32 %v4420_v62, %v2764_v44  ;;  %v2728_v26 = vadd.f32 %v4419_v56, %v2727_v47 }
 0xefe   :  { %v2766_v61 = vpop.f32.mrf.mxu3  ;;  %v2729_v20 = vpop.f32.mrf.mxu2 }
 0xeff   :  { %4178 = vmatmul.msk.bf16.vlgmr.msrb.gmra.mxu0 %vm92_vm1, %v5684_v7  ;;  %v2767_v4 = vadd.f32 %v4420_v62, %v2766_v61  ;;  %v2730_v17 = vadd.f32 %v4419_v56, %v2729_v20 }
 0xf01   :  { %v2813_v46 = vpack.c.bf16 %v2767_v4, %v2765_v63  ;;  %v2811_v10 = vpack.c.bf16 %v2730_v17, %v2728_v26 }
 0xf03   :  { %v2822_v50 = vsel %vm493_vm15, %v2813_v46, 0 }
 0xf06   :  { %v2769_v3 = vpop.f32.mrf.mxu3  ;;  %v2732_v9 = vpop.f32.mrf.mxu2 }
 0xf07   :  { %v2770_v1 = vadd.f32 %v4420_v62, %v2769_v3  ;;  %v2733_v31 = vadd.f32 %v4419_v56, %v2732_v9 }
 0xf0e   :  { %v2771_v25 = vpop.f32.mrf.mxu3  ;;  %v2734_v27 = vpop.f32.mrf.mxu2 }
 0xf0f   :  { %v2772_v49 = vadd.f32 %v4420_v62, %v2771_v25  ;;  %4179 = vmatmul.msk.bf16.gmra.mxu0 %vm92_vm1, %v2699_v59  ;;  %v2735_v37 = vadd.f32 %v4419_v56, %v2734_v27  ;;  %v4423_v25 = vld [vmem:[%s6020_s4 + $0x9] ss:$0 sm:$0xff]  ;;  %v4424_v27 = vld [vmem:[%s6020_s4 + $0xb] ss:$0 sm:$0xff] }
 0xf11   :  { %v2814_v2 = vpack.c.bf16 %v2772_v49, %v2770_v1  ;;  %v2812_v42 = vpack.c.bf16 %v2735_v37, %v2733_v31 }
 0xf13   :  { %v2825_v8 = vsel %vm493_vm15, %v2814_v2, 0 }
 0xf14   :  { %2833 = vmatpush.bf16.xpose.msra.mxu1 %v2825_v8 }
 0xf1c   :  { %2834 = vmatpush.bf16.xpose.msra.mxu1 %v2822_v50 }
 0xf1f   :  { %4212 = vmatmul.msk.bf16.vlgmr.msra.gmra.mxu0 %vm92_vm1, %v5684_v7 }
 0xf23   :  { %4180 = vmatmul.msk.bf16.vlgmr.msra.gmra.mxu1 %vm493_vm15, %v2811_v10 }
 0xf24   :  { %3021 = vmatpush.bf16.msrb.mxu1 %v4375_v18 }
 0xf28   :  { %3022 = vmatpush.bf16.msrb.mxu1 %v4374_v23 }
 0xf2f   :  { %4213 = vmatmul.msk.bf16.gmra.mxu0 %vm92_vm1, %v2699_v59 }
 0xf33   :  { %4181 = vmatmul.msk.bf16.gmra.mxu1 %vm493_vm15, %v2812_v42 }
 0xf43   :  { %4226 = vmatmul.msk.bf16.vlgmr.msrb.gmra.mxu1 %vm92_vm1, %v5684_v7 }
 0xf53   :  { %4227 = vmatmul.msk.bf16.gmra.mxu1 %vm92_vm1, %v2699_v59 }
 0xf5b   :  { %v2639_v16 = vpop.f32.mrf.mxu0 }
 0xf5c   :  { %v2671_v15 = vadd.f32 %v2670_v13, %v2639_v16 }
 0xf5e   :  { %2680 = vst.msk [vmem:[#allocation2] sm:$0xff] %vm92_vm1, %v2671_v15 }
 0xf63   :  { %v2641_v14 = vpop.f32.mrf.mxu0 }
 0xf64   :  { %v2673_v39 = vadd.f32 %v2672_v5, %v2641_v14 }
 0xf66   :  { %2681 = vst.msk [vmem:[#allocation2 + $0x8] sm:$0xff] %vm92_vm1, %v2673_v39 }
 0xf6c   :  { %v2644_v52 = vpop.f32.mrf.mxu0 }
 0xf6d   :  { %v2676_v30 = vadd.f32 %v2675_v24, %v2644_v52 }
 0xf6f   :  { %2682 = vst.msk [vmem:[#allocation2 + $0x10] sm:$0xff] %vm92_vm1, %v2676_v30 }
 0xf74   :  { %v2646_v45 = vpop.f32.mrf.mxu0 }
 0xf75   :  { %v2678_v7 = vadd.f32 %v2677_v43, %v2646_v45 }
 0xf77   :  { %2683 = vst.msk [vmem:[#allocation2 + $0x18] sm:$0xff] %vm92_vm1, %v2678_v7 }
 0xf7c   :  { %v2801_v41 = vpop.f32.mrf.mxu0 }
 0xf7d   :  { %v2802_v38 = vadd.f32 %v4422_v57, %v2801_v41 }
 0xf84   :  { %v2803_v36 = vpop.f32.mrf.mxu0 }
 0xf85   :  { %v2804_v40 = vadd.f32 %v4422_v57, %v2803_v36 }
 0xf87   :  { %v2892_v55 = vpack.c.bf16 %v2804_v40, %v2802_v38 }
 0xf8c   :  { %v2806_v51 = vpop.f32.mrf.mxu0 }
 0xf8d   :  { %v2807_v59 = vadd.f32 %v4422_v57, %v2806_v51 }
 0xf94   :  { %v2808_v32 = vpop.f32.mrf.mxu0 }
 0xf95   :  { %v2809_v33 = vadd.f32 %v4422_v57, %v2808_v32 }
 0xf97   :  { %v2893_v54 = vpack.c.bf16 %v2809_v33, %v2807_v59 }
 0xf99   :  { %2906 = vmatpush.bf16.msrb.mxu2 %v2893_v54 }
 0xf9c   :  { %v2987_v34 = vpop.f32.mrf.mxu0 }
 0xf9d   :  { %2907 = vmatpush.bf16.msrb.mxu2 %v2892_v55  ;;  %v2988_v56 = vadd.f32 %v4423_v25, %v2987_v34 }
 0xfa0   :  { %v2836_v29 = vpop.f32.mrf.mxu1 }
 0xfa1   :  { %v2837_v53 = vadd.f32 %v2836_v29, %v4967_v12 }
 0xfa3   :  { %v2846_v58 = vsel %vm92_vm1, %v2837_v53, -inf }
 0xfa4   :  { %v2989_v44 = vpop.f32.mrf.mxu0  ;;  %2847 = vmax.xlane.f32.xlu0 %v2846_v58 }
 0xfa5   :  { %v2990_v20 = vadd.f32 %v4423_v25, %v2989_v44 }
 0xfa7   :  { %v3036_v17 = vpack.c.bf16 %v2990_v20, %v2988_v56 }
 0xfa8   :  { %v2838_v48 = vpop.f32.mrf.mxu1 }
 0xfa9   :  { %v2839_v60 = vadd.f32 %v2838_v48, %v4967_v12  ;;  %v3045_v26 = vsel %vm493_vm15, %v3036_v17, 0 }
 0xfab   :  { %v2849_v61 = vsel %vm92_vm1, %v2839_v60, -inf }
 0xfac   :  { %v2992_v3 = vpop.f32.mrf.mxu0  ;;  %2850 = vmax.xlane.f32.xlu1 %v2849_v61 }
 0xfad   :  { %v2993_v2 = vadd.f32 %v4423_v25, %v2992_v3 }
 0xfb0   :  { %v2841_v47 = vpop.f32.mrf.mxu1 }
 0xfb1   :  { %v2842_v62 = vadd.f32 %v2841_v47, %v4967_v12 }
 0xfb3   :  { %v2852_v1 = vsel %vm92_vm1, %v2842_v62, -inf }
 0xfb4   :  { %v2994_v49 = vpop.f32.mrf.mxu0  ;;  %2853 = vmax.xlane.f32.xlu2 %v2852_v1 }
 0xfb5   :  { %v2995_v4 = vadd.f32 %v4423_v25, %v2994_v49  ;;  %v2950_v25 = vpop.f32.mrf.mxu3 }
 0xfb7   :  { %v3037_v8 = vpack.c.bf16 %v2995_v4, %v2993_v2 }
 0xfb8   :  { %v2843_v63 = vpop.f32.mrf.mxu1 }
 0xfb9   :  { %v2844_v46 = vadd.f32 %v2843_v63, %v4967_v12  ;;  %v3048_v18 = vsel %vm493_vm15, %v3037_v8, 0  ;;  %v4421_v63 = vld [vmem:[%s6020_s4 + $0x7] ss:$0 sm:$0xff] }
 0xfba   :  { %3056 = vmatpush.bf16.xpose.msra.mxu2 %v3048_v18 }
 0xfbb   :  { %v2855_v50 = vsel %vm92_vm1, %v2844_v46, -inf }
 0xfbc   :  { %2856 = vmax.xlane.f32.xlu0 %v2855_v50 }
 0xfbd   :  { %v2952_v8 = vpop.f32.mrf.mxu3 }
 0xfbe   :  { %v2953_v20 = vadd.f32 %v4421_v63, %v2952_v8  ;;  %v3215_v8 = vld [vmem:[#allocation2 + $0x18] sm:$0xff] }
 0xfc0   :  { %v3024_v23 = vpop.f32.mrf.mxu1 }
 0xfc1   :  { %v3025_v15 = vadd.f32 %v4424_v27, %v3024_v23 }
 0xfc2   :  { %3057 = vmatpush.bf16.xpose.msra.mxu2 %v3045_v26 }
 0xfc5   :  { %v2955_v18 = vpop.f32.mrf.mxu3 }
 0xfc6   :  { %v2956_v23 = vadd.f32 %v4421_v63, %v2955_v18 }
 0xfc8   :  { %v3026_v9 = vpop.f32.mrf.mxu1 }
 0xfc9   :  { %v3027_v13 = vadd.f32 %v4424_v27, %v3026_v9  ;;  %v4369_v9 = vld [vmem:[%s6021_s5 + $0x10] sm:$0xff] }
 0xfca   :  { %3196 = vmatpush.bf16.msra.mxu1 %v4369_v9 }
 0xfcb   :  { %v3115_v5 = vpack.c.bf16 %v3027_v13, %v3025_v15 }
 0xfcd   :  { %v2957_v50 = vpop.f32.mrf.mxu3 }
 0xfce   :  { %v2958_v17 = vadd.f32 %v4421_v63, %v2957_v50 }
 0xfd0   :  { %v3029_v10 = vpop.f32.mrf.mxu1  ;;  %v3035_v26 = vpack.c.bf16 %v2958_v17, %v2956_v23 }
 0xfd1   :  { %v3030_v31 = vadd.f32 %v4424_v27, %v3029_v10 }
 0xfd8   :  { %v3031_v37 = vpop.f32.mrf.mxu1 }
 0xfd9   :  { %v3032_v42 = vadd.f32 %v4424_v27, %v3031_v37 }
 0xfdb   :  { %v3116_v16 = vpack.c.bf16 %v3032_v42, %v3030_v31 }
 0xfdd   :  { %3129 = vmatpush.bf16.msrb.mxu3 %v3116_v16 }
 0xfe1   :  { %3130 = vmatpush.bf16.msrb.mxu3 %v3115_v5 }
0x1017   :  { %v2848_v14 = vpop.xlane.xlu0 %2847 }
0x1018   :  { %v2858_v39 = vsub.f32 %v2837_v53, %v2848_v14 }
0x101a   :  { %v2862_v24 = vmul.f32 1.442695, %v2858_v39 }
0x101c   :  { %4593 = vpow2.f32 %v2862_v24 }
0x101f   :  { %v2851_v52 = vpop.xlane.xlu1 %2850 }
0x1020   :  { %v2859_v30 = vsub.f32 %v2839_v60, %v2851_v52 }
0x1022   :  { %v4594_v43 = vpop.eup %4593  ;;  %v2864_v45 = vmul.f32 1.442695, %v2859_v30 }
0x1023   :  { %v2870_v7 = vsel %vm92_vm1, %v4594_v43, 0.0 }
0x1024   :  { %4595 = vpow2.f32 %v2864_v45  ;;  %2871 = vadd.xlane.f32.xlu1 %v2870_v7 }
0x1027   :  { %v2854_v41 = vpop.xlane.xlu2 %2853 }
0x1028   :  { %v2860_v36 = vsub.f32 %v2842_v62, %v2854_v41 }
0x102a   :  { %v4596_v51 = vpop.eup %4595  ;;  %v2866_v57 = vmul.f32 1.442695, %v2860_v36 }
0x102b   :  { %v2873_v32 = vsel %vm92_vm1, %v4596_v51, 0.0 }
0x102c   :  { %4597 = vpow2.f32 %v2866_v57  ;;  %2874 = vadd.xlane.f32.xlu2 %v2873_v32 }
0x102f   :  { %v2857_v59 = vpop.xlane.xlu0 %2856 }
0x1030   :  { %v2861_v33 = vsub.f32 %v2844_v46, %v2857_v59  ;;  %v2951_v46 = vadd.f32 %v4421_v63, %v2950_v25  ;;  %v3214_v25 = vld [vmem:[#allocation2 + $0x10] sm:$0xff] }
0x1032   :  { %v4598_v40 = vpop.eup %4597  ;;  %v2868_v54 = vmul.f32 1.442695, %v2861_v33  ;;  %v3034_v56 = vpack.c.bf16 %v2953_v20, %v2951_v46  ;;  %v3223_v20 = vadd.f32 %v3215_v8, %v5363_v35 }
0x1033   :  { %v2876_v38 = vsel %vm92_vm1, %v4598_v40, 0.0 }
0x1034   :  { %4599 = vpow2.f32 %v2868_v54  ;;  %2877 = vadd.xlane.f32.xlu0 %v2876_v38 }
0x103a   :  { %v4600_v55 = vpop.eup %4599 }
0x103b   :  { %v2879_v34 = vsel %vm92_vm1, %v4600_v55, 0.0 }
0x103c   :  { %2880 = vadd.xlane.f32.xlu1 %v2879_v34 }
0x1097   :  { %v2872_v29 = vpop.xlane.xlu1 %2871 }
0x1098   :  { %4601 = vrcp.f32 %v2872_v29 }
0x109e   :  { %v4602_v58 = vpop.eup %4601 }
0x109f   :  { %v2875_v53 = vpop.xlane.xlu2 %2874  ;;  %v2886_v48 = vmul.f32 %v4602_v58, %v4594_v43 }
0x10a0   :  { %4603 = vrcp.f32 %v2875_v53 }
0x10a6   :  { %v4604_v44 = vpop.eup %4603 }
0x10a7   :  { %v2887_v60 = vmul.f32 %v4604_v44, %v4596_v51  ;;  %v2878_v3 = vpop.xlane.xlu0 %2877 }
0x10a8   :  { %4605 = vrcp.f32 %v2878_v3 }
0x10a9   :  { %v2890_v61 = vpack.c.bf16 %v2887_v60, %v2886_v48  ;;  %v5792_v48 = vld [vmem:[%s6024_s8 + $0xa] ss:$0 sm:$0xff] }
0x10aa   :  { %v5823_v18 = vadd.f32 %v5792_v48, %v3223_v20 }
0x10ab   :  { %4182 = vmatmul.msk.bf16.vlgmr.msrb.gmra.mxu2 %vm92_vm1, %v2890_v61 }
0x10ae   :  { %v4606_v62 = vpop.eup %4605 }
0x10af   :  { %v2881_v47 = vpop.xlane.xlu1 %2880  ;;  %v2888_v49 = vmul.f32 %v4606_v62, %v4598_v40 }
0x10b0   :  { %4607 = vrcp.f32 %v2881_v47 }
0x10b6   :  { %v4608_v1 = vpop.eup %4607 }
0x10b7   :  { %v2889_v2 = vmul.f32 %v4608_v1, %v4600_v55  ;;  %v3212_v55 = vld [vmem:[#allocation2] sm:$0xff] }
0x10b8   :  { %v3220_v44 = vadd.f32 %v3212_v55, %v5339_v11 }
0x10b9   :  { %v2891_v4 = vpack.c.bf16 %v2889_v2, %v2888_v49  ;;  %v3222_v49 = vadd.f32 %v3214_v25, %v5355_v28 }
0x10ba   :  { %v5795_v60 = vadd.f32 %v5792_v48, %v3220_v44 }
0x10bb   :  { %4183 = vmatmul.msk.bf16.gmra.mxu2 %vm92_vm1, %v2891_v4  ;;  %v5814_v4 = vadd.f32 %v5792_v48, %v3222_v49 }
0x10bc   :  { %v3237_v11 = vsel %vm92_vm1, %v5795_v60, 0.0 }
0x10bd   :  { %v3271_v63 = vmul.f32 %v5814_v4, %v5814_v4  ;;  %v3243_v28 = vsel %vm92_vm1, %v5814_v4, 0.0 }
0x10bf   :  { %v3283_v46 = vsel %vm92_vm1, %v3271_v63, 0.0 }
0x10cb   :  { %4228 = vmatmul.msk.bf16.vlgmr.msra.gmra.mxu2 %vm493_vm15, %v3034_v56  ;;  %v3272_v56 = vmul.f32 %v5823_v18, %v5823_v18 }
0x10cd   :  { %v3286_v50 = vsel %vm92_vm1, %v3272_v56, 0.0 }
0x10db   :  { %4229 = vmatmul.msk.bf16.gmra.mxu2 %vm493_vm15, %v3035_v26 }
0x112e   :  { %v2909_v10 = vpop.f32.mrf.mxu2 }
0x1136   :  { %v2911_v27 = vpop.f32.mrf.mxu2 }
0x1137   :  { %v2919_v37 = vpack.c.bf16 %v2911_v27, %v2909_v10 }
0x1139   :  { %4244 = vmatmul.msk.bf16.vlgmr.msra.gmra.mxu1 %vm493_vm15, %v2919_v37 }
0x113e   :  { %v2914_v31 = vpop.f32.mrf.mxu2 }
0x1146   :  { %v2916_v42 = vpop.f32.mrf.mxu2 }
0x1147   :  { %v2920_v13 = vpack.c.bf16 %v2916_v42, %v2914_v31 }
0x1149   :  { %4245 = vmatmul.msk.bf16.gmra.mxu1 %vm493_vm15, %v2920_v13 }
0x114e   :  { %v3059_v16 = vpop.f32.mrf.mxu2 }
0x114f   :  { %v3060_v15 = vadd.f32 %v3059_v16, %v4967_v12 }
0x1151   :  { %v3069_v5 = vsel %vm92_vm1, %v3060_v15, -inf }
0x1152   :  { %3070 = vmax.xlane.f32.xlu2 %v3069_v5 }
0x1156   :  { %v3061_v14 = vpop.f32.mrf.mxu2 }
0x1157   :  { %v3062_v39 = vadd.f32 %v3061_v14, %v4967_v12  ;;  %v3246_v14 = vsel %vm92_vm1, %v5823_v18, 0.0 }
0x1159   :  { %v3072_v24 = vsel %vm92_vm1, %v3062_v39, -inf }
0x115a   :  { %3073 = vmax.xlane.f32.xlu0 %v3072_v24 }
0x115e   :  { %v3064_v52 = vpop.f32.mrf.mxu2 }
0x115f   :  { %v3065_v30 = vadd.f32 %v3064_v52, %v4967_v12 }
0x1161   :  { %v3075_v43 = vsel %vm92_vm1, %v3065_v30, -inf }
0x1162   :  { %3076 = vmax.xlane.f32.xlu0 %v3075_v43 }
0x1166   :  { %v3066_v33 = vpop.f32.mrf.mxu2 }
0x1167   :  { %v3067_v40 = vadd.f32 %v3066_v33, %v4967_v12  ;;  %v3213_v12 = vld [vmem:[#allocation2 + $0x8] sm:$0xff] }
0x1168   :  { %v3221_v61 = vadd.f32 %v3213_v12, %v5347_v22 }
0x1169   :  { %v3078_v58 = vsel %vm92_vm1, %v3067_v40, -inf }
0x116a   :  { %v5805_v62 = vadd.f32 %v5792_v48, %v3221_v61  ;;  %v4377_v61 = vld [vmem:[%s6022_s6 + $0x10] sm:$0xff] }
0x116c   :  { %v3270_v1 = vmul.f32 %v5805_v62, %v5805_v62  ;;  %v3240_v22 = vsel %vm92_vm1, %v5805_v62, 0.0 }
0x116e   :  { %v3280_v2 = vsel %vm92_vm1, %v3270_v1, 0.0 }
0x11c5   :  { %v3071_v45 = vpop.xlane.xlu2 %3070 }
0x11c6   :  { %v3081_v7 = vsub.f32 %v3060_v15, %v3071_v45  ;;  %v3269_v15 = vmul.f32 %v5795_v60, %v5795_v60 }
0x11c8   :  { %v3085_v41 = vmul.f32 1.442695, %v3081_v7  ;;  %v3277_v5 = vsel %vm92_vm1, %v3269_v15, 0.0 }
0x11ca   :  { %4609 = vpow2.f32 %v3085_v41 }
0x11cd   :  { %v3074_v36 = vpop.xlane.xlu0 %3073 }
0x11ce   :  { %v3082_v51 = vsub.f32 %v3062_v39, %v3074_v36  ;;  %v4376_v36 = vld [vmem:[%s6021_s5 + $0x18] sm:$0xff] }
0x11cf   :  { %3165 = vmatpush.bf16.msrb.mxu0 %v4376_v36 }
0x11d0   :  { %v4610_v57 = vpop.eup %4609  ;;  %v3087_v32 = vmul.f32 1.442695, %v3082_v51 }
0x11d1   :  { %v3093_v59 = vsel %vm92_vm1, %v4610_v57, 0.0 }
0x11d2   :  { %4611 = vpow2.f32 %v3087_v32  ;;  %3094 = vadd.xlane.f32.xlu1 %v3093_v59 }
0x11d5   :  { %v3077_v54 = vpop.xlane.xlu0 %3076 }
0x11d6   :  { %v3083_v38 = vsub.f32 %v3065_v30, %v3077_v54 }
0x11d8   :  { %v4612_v34 = vpop.eup %4611  ;;  %v3089_v29 = vmul.f32 1.442695, %v3083_v38 }
0x11d9   :  { %v3096_v53 = vsel %vm92_vm1, %v4612_v34, 0.0 }
0x11da   :  { %4613 = vpow2.f32 %v3089_v29  ;;  %3097 = vadd.xlane.f32.xlu2 %v3096_v53  ;;  %3079 = vmax.xlane.f32.xlu1 %v3078_v58 }
0x11e0   :  { %v5798_v3 = vpop.eup %4613 }
0x11e1   :  { %v3099_v47 = vsel %vm92_vm1, %v5798_v3, 0.0 }
0x11e2   :  { %3100 = vadd.xlane.f32.xlu2 %v3099_v47  ;;  %3238 = vadd.xlane.f32.xlu1 %v3237_v11 }
0x11ea   :  { %3241 = vadd.xlane.f32.xlu2 %v3240_v22  ;;  %3281 = vadd.xlane.f32.xlu1 %v3280_v2 }
0x11f2   :  { %3284 = vadd.xlane.f32.xlu1 %v3283_v46  ;;  %3244 = vadd.xlane.f32.xlu2 %v3243_v28 }
0x11fa   :  { %3287 = vadd.xlane.f32.xlu2 %v3286_v50 }
0x1245   :  { %v3095_v17 = vpop.xlane.xlu1 %3094 }
0x1246   :  { %4615 = vrcp.f32 %v3095_v17 }
0x124c   :  { %v4616_v10 = vpop.eup %4615 }
0x124d   :  { %v3080_v23 = vpop.xlane.xlu1 %3079  ;;  %v3098_v35 = vpop.xlane.xlu2 %3097  ;;  %v3109_v37 = vmul.f32 %v4616_v10, %v4610_v57 }
0x124e   :  { %v3084_v26 = vsub.f32 %v3067_v40, %v3080_v23  ;;  %4617 = vrcp.f32 %v3098_v35 }
0x1250   :  { %v3091_v9 = vmul.f32 1.442695, %v3084_v26 }
0x1252   :  { %4619 = vpow2.f32 %v3091_v9 }
0x1254   :  { %v4618_v27 = vpop.eup %4617 }
0x1255   :  { %v3110_v31 = vmul.f32 %v4618_v27, %v4612_v34  ;;  %v3101_v39 = vpop.xlane.xlu2 %3100  ;;  %v3239_v24 = vpop.xlane.xlu1 %3238  ;;  %v4378_v34 = vld [vmem:[%s6022_s6 + $0x18] sm:$0xff] }
0x1256   :  { %4621 = vrcp.f32 %v3101_v39  ;;  %v5849_v58 = vmul.f32 0.03125, %v3239_v24  ;;  %3495 = vmatpush.bf16.msrb.mxu2 %v4378_v34 }
0x1257   :  { %v3113_v42 = vpack.c.bf16 %v3110_v31, %v3109_v37 }
0x1258   :  { %v4620_v13 = vpop.eup %4619  ;;  %v3309_v49 = vmul.f32 %v5849_v58, %v5849_v58 }
0x1259   :  { %4230 = vmatmul.msk.bf16.vlgmr.msrb.gmra.mxu3 %vm92_vm1, %v3113_v42  ;;  %v3102_v16 = vsel %vm92_vm1, %v4620_v13, 0.0 }
0x125a   :  { %3103 = vadd.xlane.f32.xlu0 %v3102_v16  ;;  %3496 = vmatpush.bf16.msrb.mxu2 %v4377_v61 }
0x125c   :  { %v4622_v29 = vpop.eup %4621 }
0x125d   :  { %v3242_v52 = vpop.xlane.xlu2 %3241  ;;  %v3282_v43 = vpop.xlane.xlu1 %3281  ;;  %v3111_v47 = vmul.f32 %v4622_v29, %v5798_v3 }
0x125e   :  { %v5835_v30 = vmul.f32 0.03125, %v3242_v52  ;;  %v3302_v7 = vmul.f32 0.03125, %v3282_v43 }
0x1260   :  { %v3310_v45 = vmul.f32 %v5835_v30, %v5835_v30 }
0x1262   :  { %3278 = vadd.xlane.f32.xlu0 %v3277_v5  ;;  %v3318_v41 = vsub.f32 %v3302_v7, %v3310_v45  ;;  %v3334_v45 = vsub.f32 %v5805_v62, %v5835_v30  ;;  %v5875_v62 = vld [vmem:[%s6024_s8 + $0xc] ss:$0 sm:$0xff] }
0x1264   :  { %v3326_v51 = vmax.f32 %v3318_v41, 0.0  ;;  %v5868_v41 = vld [vmem:[%s6024_s8 + $0xb] ss:$0 sm:$0xff] }
0x1265   :  { %v3245_v57 = vpop.xlane.xlu2 %3244  ;;  %v3285_v33 = vpop.xlane.xlu1 %3284 }
0x1266   :  { %v3342_v32 = vadd.f32 1e-12, %v3326_v51  ;;  %v5842_v59 = vmul.f32 0.03125, %v3245_v57  ;;  %v3303_v38 = vmul.f32 0.03125, %v3285_v33  ;;  %v3333_v33 = vsub.f32 %v5795_v60, %v5849_v58 }
0x1268   :  { %4623 = vrsqrt.f32 %v3342_v32  ;;  %v3311_v40 = vmul.f32 %v5842_v59, %v5842_v59  ;;  %vm3365_vm7 = vweird.f32 %v3342_v32 }
0x126a   :  { %3247 = vadd.xlane.f32.xlu0 %v3246_v14  ;;  %v3319_v55 = vsub.f32 %v3303_v38, %v3311_v40 }
0x126c   :  { %v3327_v12 = vmax.f32 %v3319_v55, 0.0 }
0x126d   :  { %v3288_v50 = vpop.xlane.xlu2 %3287 }
0x126e   :  { %v4624_v53 = vpop.eup %4623  ;;  %v5857_v8 = vadd.f32 1e-12, %v3327_v12  ;;  %v3304_v35 = vmul.f32 0.03125, %v3288_v50 }
0x126f   :  { %v3360_v11 = vmul.f32 %v4624_v53, %v3342_v32  ;;  %vm3366_vm6 = vweird.f32 %v4624_v53 }
0x1270   :  { %vm3367_vm8 = vmor %vm3365_vm7, %vm3366_vm6  ;;  %vm3375_vm14 = vweird.f32 %v5857_v8 }
0x1271   :  { %v3361_v20 = vmul.f32 %v4624_v53, %v3360_v11 }
0x1273   :  { %v3362_v56 = vmul.f32 0.5, %v3361_v20 }
0x1275   :  { %v3363_v9 = vsub.f32 1.5, %v3362_v56  ;;  %v4386_v56 = vld [vmem:[%s6023_s7 + $0x78] sm:$0xff] }
0x1276   :  { %3659 = vmatpush.bf16.msra.mxu3 %v4386_v56 }
0x12cd   :  { %v3104_v54 = vpop.xlane.xlu0 %3103 }
0x12ce   :  { %4625 = vrcp.f32 %v3104_v54 }
0x12cf   :  { %4627 = vrsqrt.f32 %v5857_v8 }
0x12d4   :  { %v4626_v44 = vpop.eup %4625 }
0x12d5   :  { %v3112_v25 = vmul.f32 %v4626_v44, %v4620_v13  ;;  %v3279_v1 = vpop.xlane.xlu0 %3278  ;;  %v4628_v10 = vpop.eup %4627  ;;  %v3364_v13 = vmul.f32 %v4624_v53, %v3363_v9  ;;  %v4383_v9 = vld [vmem:[%s6023_s7 + $0x60] sm:$0xff] }
0x12d6   :  { %v3301_v22 = vmul.f32 0.03125, %v3279_v1  ;;  %v3370_v16 = vmul.f32 %v4628_v10, %v5857_v8  ;;  %vm3376_vm12 = vweird.f32 %v4628_v10 }
0x12d7   :  { %v3114_v2 = vpack.c.bf16 %v3112_v25, %v3111_v47  ;;  %v3368_v24 = vsel %vm3367_vm8, %v4624_v53, %v3364_v13  ;;  %vm3377_vm0 = vmor %vm3375_vm14, %vm3376_vm12  ;;  %v4382_v13 = vld [vmem:[%s6023_s7 + $0x58] sm:$0xff] }
0x12d8   :  { %v3317_v63 = vsub.f32 %v3301_v22, %v3309_v49  ;;  %v3371_v52 = vmul.f32 %v4628_v10, %v3370_v16  ;;  %v3430_v36 = vmul.f32 %v3368_v24, %v3334_v45  ;;  %v3335_v22 = vsub.f32 %v5814_v4, %v5842_v59  ;;  %v3198_v4 = vpop.f32.mrf.mxu1  ;;  %v4385_v59 = vld [vmem:[%s6023_s7 + $0x70] sm:$0xff] }
0x12d9   :  { %4231 = vmatmul.msk.bf16.gmra.mxu3 %vm92_vm1, %v3114_v2 }
0x12da   :  { %v3325_v46 = vmax.f32 %v3317_v63, 0.0  ;;  %v3372_v51 = vmul.f32 0.5, %v3371_v52  ;;  %v3439_v30 = vmul.f32 %v5868_v41, %v3430_v36  ;;  %3660 = vmatpush.bf16.msra.mxu3 %v4385_v59  ;;  %v4380_v52 = vld [vmem:[%s6023_s7 + $0x48] sm:$0xff] }
0x12dc   :  { %v3341_v28 = vadd.f32 1e-12, %v3325_v46  ;;  %v3132_v3 = vpop.f32.mrf.mxu3  ;;  %v3373_v55 = vsub.f32 1.5, %v3372_v51  ;;  %v3448_v44 = vadd.f32 %v5875_v62, %v3439_v30  ;;  %v4379_v51 = vld [vmem:[%s6023_s7 + $0x40] sm:$0xff] }
0x12dd   :  { %v3248_v17 = vpop.xlane.xlu0 %3247 }
0x12de   :  { %4629 = vrsqrt.f32 %v3341_v28  ;;  %v3264_v23 = vmul.f32 0.03125, %v3248_v17  ;;  %vm3355_vm10 = vweird.f32 %v3341_v28  ;;  %v3374_v12 = vmul.f32 %v4628_v10, %v3373_v55 }
0x12e0   :  { %v3312_v26 = vmul.f32 %v3264_v23, %v3264_v23  ;;  %v3336_v25 = vsub.f32 %v5823_v18, %v3264_v23  ;;  %v3378_v1 = vsel %vm3377_vm0, %v4628_v10, %v3374_v12  ;;  %v3200_v10 = vpop.f32.mrf.mxu1  ;;  %vm3690_vm0 = vcmask 1040384  }
0x12e1   :  { %v3431_v63 = vmul.f32 %v3378_v1, %v3335_v22 }
0x12e2   :  { %v3320_v27 = vsub.f32 %v3304_v35, %v3312_v26  ;;  %v4384_v26 = vld [vmem:[%s6023_s7 + $0x68] sm:$0xff] }
0x12e3   :  { %v3440_v8 = vmul.f32 %v5868_v41, %v3431_v63  ;;  %3661 = vmatpush.bf16.msra.mxu3 %v4384_v26 }
0x12e4   :  { %v4630_v37 = vpop.eup %4629  ;;  %v3328_v31 = vmax.f32 %v3320_v27, 0.0  ;;  %v3134_v42 = vpop.f32.mrf.mxu3 }
0x12e5   :  { %v3350_v15 = vmul.f32 %v4630_v37, %v3341_v28  ;;  %v3142_v5 = vpack.c.bf16 %v3134_v42, %v3132_v3  ;;  %vm3356_vm9 = vweird.f32 %v4630_v37  ;;  %v3449_v28 = vadd.f32 %v5875_v62, %v3440_v8 }
0x12e6   :  { %v3344_v14 = vadd.f32 1e-12, %v3328_v31  ;;  %vm3357_vm11 = vmor %vm3355_vm10, %vm3356_vm9 }
0x12e7   :  { %v3351_v39 = vmul.f32 %v4630_v37, %v3350_v15  ;;  %4238 = vmatmul.msk.bf16.vlgmr.msrb.gmra.mxu0 %vm493_vm15, %v3142_v5  ;;  %3662 = vmatpush.bf16.msra.mxu3 %v4383_v9 }
0x12e8   :  { %4631 = vrsqrt.f32 %v3344_v14  ;;  %vm3385_vm2 = vweird.f32 %v3344_v14 }
0x12e9   :  { %v3352_v43 = vmul.f32 0.5, %v3351_v39 }
0x12eb   :  { %v3353_v7 = vsub.f32 1.5, %v3352_v43  ;;  %3663 = vmatpush.bf16.msra.mxu3 %v4382_v13  ;;  %v5928_v43 = vld [vmem:[%s6024_s8 + $0xd] ss:$0 sm:$0xff] }
0x12ed   :  { %v3354_v57 = vmul.f32 %v4630_v37, %v3353_v7 }
0x12ee   :  { %v4632_v32 = vpop.eup %4631 }
0x12ef   :  { %v3358_v40 = vsel %vm3357_vm11, %v4630_v37, %v3354_v57  ;;  %v3380_v54 = vmul.f32 %v4632_v32, %v3344_v14  ;;  %vm3386_vm13 = vweird.f32 %v4632_v32  ;;  %v4381_v14 = vld [vmem:[%s6023_s7 + $0x50] sm:$0xff] }
0x12f0   :  { %v3429_v38 = vmul.f32 %v3358_v40, %v3333_v33  ;;  %vm3387_vm3 = vmor %vm3385_vm2, %vm3386_vm13  ;;  %3664 = vmatpush.bf16.msra.mxu3 %v4381_v14  ;;  %v3203_v14 = vpop.f32.mrf.mxu1  ;;  %vm3695_vm2 = vcmask 254976  }
0x12f1   :  { %v3381_v34 = vmul.f32 %v4632_v32, %v3380_v54 }
0x12f2   :  { %v3438_v29 = vmul.f32 %v5868_v41, %v3429_v38 }
0x12f3   :  { %v3382_v53 = vmul.f32 0.5, %v3381_v34 }
0x12f4   :  { %v3447_v58 = vadd.f32 %v5875_v62, %v3438_v29  ;;  %3665 = vmatpush.bf16.msra.mxu3 %v4380_v52 }
0x12f5   :  { %v3383_v61 = vsub.f32 1.5, %v3382_v53 }
0x12f6   :  { %v3455_v47 = vpack.c.bf16 %v3448_v44, %v3447_v58 }
0x12f7   :  { %v3384_v11 = vmul.f32 %v4632_v32, %v3383_v61 }
0x12f8   :  { %4258 = vmatmul.msk.bf16.vlgmr.msrb.gmra.mxu2 %vm92_vm1, %v3455_v47  ;;  %3666 = vmatpush.bf16.msra.mxu3 %v4379_v51  ;;  %v3205_v51 = vpop.f32.mrf.mxu1 }
0x12f9   :  { %v3388_v49 = vsel %vm3387_vm3, %v4632_v32, %v3384_v11 }
0x12fa   :  { %v3432_v2 = vmul.f32 %v3388_v49, %v3336_v25 }
0x12fc   :  { %v3441_v20 = vmul.f32 %v5868_v41, %v3432_v2 }
0x12fe   :  { %v3450_v46 = vadd.f32 %v5875_v62, %v3441_v20 }
0x1300   :  { %v3456_v3 = vpack.c.bf16 %v3450_v46, %v3449_v28 }
0x1308   :  { %4259 = vmatmul.msk.bf16.gmra.mxu2 %vm92_vm1, %v3456_v3 }
0x135c   :  { %v3137_v18 = vpop.f32.mrf.mxu3 }
0x1364   :  { %v3139_v50 = vpop.f32.mrf.mxu3  ;;  %v3167_v17 = vpop.f32.mrf.mxu0 }
0x1365   :  { %v3143_v23 = vpack.c.bf16 %v3139_v50, %v3137_v18  ;;  %v3199_v35 = vadd.f32 %v3198_v4, %v3167_v17 }
0x1367   :  { %3208 = vst.msk [vmem:[#allocation2 + $0x20] sm:$0xff] %vm92_vm1, %v3199_v35  ;;  %4239 = vmatmul.msk.bf16.gmra.mxu0 %vm493_vm15, %v3143_v23 }
0x136c   :  { %v3169_v27 = vpop.f32.mrf.mxu0 }
0x136d   :  { %v3201_v37 = vadd.f32 %v3200_v10, %v3169_v27 }
0x136e   :  { %v3216_v31 = vld [vmem:[#allocation2 + $0x20] sm:$0xff] }
0x136f   :  { %3209 = vst.msk [vmem:[#allocation2 + $0x28] sm:$0xff] %vm92_vm1, %v3201_v37  ;;  %v3224_v42 = vadd.f32 %v3216_v31, %v5590_v0 }
0x1371   :  { %v5911_v16 = vadd.f32 %v5792_v48, %v3224_v42 }
0x1373   :  { %v3249_v15 = vsel %vm92_vm1, %v5911_v16, 0.0  ;;  %v3273_v5 = vmul.f32 %v5911_v16, %v5911_v16 }
0x1374   :  { %3250 = vadd.xlane.f32.xlu0 %v3249_v15 }
0x1375   :  { %v3289_v0 = vsel %vm92_vm1, %v3273_v5, 0.0 }
0x1376   :  { %3290 = vadd.xlane.f32.xlu2 %v3289_v0  ;;  %v3217_v39 = vld [vmem:[#allocation2 + $0x28] sm:$0xff] }
0x1377   :  { %v3225_v24 = vadd.f32 %v3217_v39, %v5594_v21 }
0x1379   :  { %v5931_v45 = vadd.f32 %v5792_v48, %v3225_v24 }
0x137b   :  { %v3498_v7 = vpop.f32.mrf.mxu2  ;;  %v3252_v36 = vsel %vm92_vm1, %v5931_v45, 0.0  ;;  %v3274_v21 = vmul.f32 %v5931_v45, %v5931_v45 }
0x137c   :  { %v3499_v57 = vadd.f32 %v5928_v43, %v3498_v7  ;;  %3253 = vadd.xlane.f32.xlu1 %v3252_v36 }
0x137d   :  { %v3292_v32 = vsel %vm92_vm1, %v3274_v21, 0.0 }
0x137e   :  { %v3518_v33 = vmul.f32 %v3499_v57, %v3499_v57  ;;  %3293 = vadd.xlane.f32.xlu0 %v3292_v32 }
0x1380   :  { %v3526_v40 = vmul.f32 %v3518_v33, %v3499_v57 }
0x1382   :  { %v3534_v54 = vmul.f32 0.044715, %v3526_v40 }
0x1383   :  { %v3500_v30 = vpop.f32.mrf.mxu2 }
0x1384   :  { %v3542_v38 = vadd.f32 %v3534_v54, %v3499_v57  ;;  %v3501_v55 = vadd.f32 %v5928_v43, %v3500_v30 }
0x1386   :  { %v3550_v34 = vmul.f32 0.7978846, %v3542_v38  ;;  %v3519_v29 = vmul.f32 %v3501_v55, %v3501_v55 }
0x1388   :  { %v3527_v53 = vmul.f32 %v3519_v29, %v3501_v55  ;;  %4633 = vtanh.f32 %v3550_v34 }
0x138a   :  { %v3535_v44 = vmul.f32 0.044715, %v3527_v53 }
0x138b   :  { %v3503_v58 = vpop.f32.mrf.mxu2 }
0x138c   :  { %v3543_v12 = vadd.f32 %v3535_v44, %v3501_v55  ;;  %v3504_v61 = vadd.f32 %v5928_v43, %v3503_v58 }
0x138e   :  { %v3551_v47 = vmul.f32 0.7978846, %v3543_v12  ;;  %v3520_v11 = vmul.f32 %v3504_v61, %v3504_v61  ;;  %v4634_v25 = vpop.eup %4633 }
0x138f   :  { %v3566_v22 = vadd.f32 1.0, %v4634_v25 }
0x1390   :  { %4635 = vtanh.f32 %v3551_v47  ;;  %v3528_v1 = vmul.f32 %v3520_v11, %v3504_v61 }
0x1391   :  { %v3574_v3 = vmul.f32 0.5, %v3566_v22 }
0x1392   :  { %v3536_v49 = vmul.f32 0.044715, %v3528_v1 }
0x1393   :  { %v3505_v2 = vpop.f32.mrf.mxu2  ;;  %v3582_v50 = vmul.f32 %v3574_v3, %v3499_v57 }
0x1394   :  { %v3544_v63 = vadd.f32 %v3536_v49, %v3504_v61  ;;  %v3506_v20 = vadd.f32 %v5928_v43, %v3505_v2 }
0x1396   :  { %v4636_v8 = vpop.eup %4635  ;;  %v3552_v46 = vmul.f32 0.7978846, %v3544_v63  ;;  %v3521_v28 = vmul.f32 %v3506_v20, %v3506_v20 }
0x1397   :  { %v3567_v18 = vadd.f32 1.0, %v4636_v8 }
0x1398   :  { %v3529_v56 = vmul.f32 %v3521_v28, %v3506_v20  ;;  %4637 = vtanh.f32 %v3552_v46 }
0x1399   :  { %v3575_v4 = vmul.f32 0.5, %v3567_v18 }
0x139a   :  { %v3537_v59 = vmul.f32 0.044715, %v3529_v56 }
0x139b   :  { %v3583_v17 = vmul.f32 %v3575_v4, %v3501_v55 }
0x139c   :  { %v3545_v23 = vadd.f32 %v3537_v59, %v3506_v20 }
0x139d   :  { %v3590_v35 = vpack.c.bf16 %v3583_v17, %v3582_v50 }
0x139e   :  { %v3553_v26 = vmul.f32 0.7978846, %v3545_v23  ;;  %v4638_v9 = vpop.eup %4637 }
0x139f   :  { %3667 = vmatmul.bf16.vlgmr.msra.gmra.mxu3 %v3590_v35  ;;  %v3568_v10 = vadd.f32 1.0, %v4638_v9 }
0x13a0   :  { %4639 = vtanh.f32 %v3553_v26 }
0x13a1   :  { %v3576_v31 = vmul.f32 0.5, %v3568_v10 }
0x13a3   :  { %v3584_v13 = vmul.f32 %v3576_v31, %v3504_v61 }
0x13a6   :  { %v4640_v27 = vpop.eup %4639 }
0x13a7   :  { %v3569_v37 = vadd.f32 1.0, %v4640_v27 }
0x13a9   :  { %v3577_v42 = vmul.f32 0.5, %v3569_v37 }
0x13ab   :  { %v3585_v15 = vmul.f32 %v3577_v42, %v3506_v20 }
0x13ad   :  { %v3591_v5 = vpack.c.bf16 %v3585_v15, %v3584_v13 }
0x13af   :  { %3671 = vmatmul.bf16.gmra.mxu3 %v3591_v5 }
0x13e4   :  { %v3172_v0 = vpop.f32.mrf.mxu0 }
0x13e5   :  { %v3204_v39 = vadd.f32 %v3203_v14, %v3172_v0 }
0x13e7   :  { %3210 = vst.msk [vmem:[#allocation2 + $0x30] sm:$0xff] %vm92_vm1, %v3204_v39  ;;  %v3251_v24 = vpop.xlane.xlu0 %3250 }
0x13e8   :  { %v3265_v52 = vmul.f32 0.03125, %v3251_v24 }
0x13e9   :  { %v3291_v7 = vpop.xlane.xlu2 %3290 }
0x13ea   :  { %v3313_v36 = vmul.f32 %v3265_v52, %v3265_v52  ;;  %v3305_v21 = vmul.f32 0.03125, %v3291_v7  ;;  %v3337_v17 = vsub.f32 %v5911_v16, %v3265_v52 }
0x13ec   :  { %v3321_v57 = vsub.f32 %v3305_v21, %v3313_v36  ;;  %v3174_v32 = vpop.f32.mrf.mxu0 }
0x13ed   :  { %v3206_v33 = vadd.f32 %v3205_v51, %v3174_v32 }
0x13ee   :  { %v3329_v40 = vmax.f32 %v3321_v57, 0.0  ;;  %v3218_v54 = vld [vmem:[#allocation2 + $0x30] sm:$0xff] }
0x13ef   :  { %3211 = vst.msk [vmem:[#allocation2 + $0x38] sm:$0xff] %vm92_vm1, %v3206_v33  ;;  %v3254_v30 = vpop.xlane.xlu1 %3253  ;;  %v3226_v38 = vadd.f32 %v3218_v54, %v5603_v6 }
0x13f0   :  { %v3345_v55 = vadd.f32 1e-12, %v3329_v40  ;;  %v3266_v34 = vmul.f32 0.03125, %v3254_v30 }
0x13f1   :  { %v3294_v29 = vpop.xlane.xlu0 %3293  ;;  %v5949_v53 = vadd.f32 %v5792_v48, %v3226_v38 }
0x13f2   :  { %4641 = vrsqrt.f32 %v3345_v55  ;;  %v3314_v44 = vmul.f32 %v3266_v34, %v3266_v34  ;;  %v3306_v58 = vmul.f32 0.03125, %v3294_v29  ;;  %vm3395_vm4 = vweird.f32 %v3345_v55 }
0x13f3   :  { %v3255_v12 = vsel %vm92_vm1, %v5949_v53, 0.0  ;;  %v3275_v61 = vmul.f32 %v5949_v53, %v5949_v53  ;;  %v3338_v9 = vsub.f32 %v5931_v45, %v3266_v34 }
0x13f4   :  { %3256 = vadd.xlane.f32.xlu1 %v3255_v12  ;;  %v3322_v47 = vsub.f32 %v3306_v58, %v3314_v44 }
0x13f5   :  { %v3295_v11 = vsel %vm92_vm1, %v3275_v61, 0.0 }
0x13f6   :  { %3296 = vadd.xlane.f32.xlu0 %v3295_v11  ;;  %v3219_v6 = vld [vmem:[#allocation2 + $0x38] sm:$0xff]  ;;  %v3330_v25 = vmax.f32 %v3322_v47, 0.0 }
0x13f7   :  { %v3227_v1 = vadd.f32 %v3219_v6, %v5607_v19 }
0x13f8   :  { %v4642_v49 = vpop.eup %4641  ;;  %v3346_v2 = vadd.f32 1e-12, %v3330_v25 }
0x13f9   :  { %v3390_v22 = vmul.f32 %v4642_v49, %v3345_v55  ;;  %v5958_v63 = vadd.f32 %v5792_v48, %v3227_v1  ;;  %vm3396_vm15 = vweird.f32 %v4642_v49 }
0x13fa   :  { %4643 = vrsqrt.f32 %v3346_v2  ;;  %vm3397_vm5 = vmor %vm3395_vm4, %vm3396_vm15  ;;  %vm3405_vm7 = vweird.f32 %v3346_v2 }
0x13fb   :  { %v3391_v20 = vmul.f32 %v4642_v49, %v3390_v22  ;;  %v3258_v8 = vsel %vm92_vm1, %v5958_v63, 0.0  ;;  %v3276_v46 = vmul.f32 %v5958_v63, %v5958_v63 }
0x13fc   :  { %3259 = vadd.xlane.f32.xlu2 %v3258_v8 }
0x13fd   :  { %v3392_v28 = vmul.f32 0.5, %v3391_v20  ;;  %v3298_v3 = vsel %vm92_vm1, %v3276_v46, 0.0 }
0x13fe   :  { %3299 = vadd.xlane.f32.xlu1 %v3298_v3 }
0x13ff   :  { %v3393_v18 = vsub.f32 1.5, %v3392_v28 }
0x1400   :  { %v4644_v19 = vpop.eup %4643 }
0x1401   :  { %v3394_v56 = vmul.f32 %v4642_v49, %v3393_v18  ;;  %v3400_v4 = vmul.f32 %v4644_v19, %v3346_v2  ;;  %vm3406_vm6 = vweird.f32 %v4644_v19 }
0x1402   :  { %vm3407_vm8 = vmor %vm3405_vm7, %vm3406_vm6 }
0x1403   :  { %v3401_v48 = vmul.f32 %v4644_v19, %v3400_v4  ;;  %v3398_v59 = vsel %vm3397_vm5, %v4642_v49, %v3394_v56  ;;  %vm3753_vm5 = vcmask 74752  }
0x1404   :  { %v3433_v35 = vmul.f32 %v3398_v59, %v3337_v17 }
0x1405   :  { %v3402_v50 = vmul.f32 0.5, %v3401_v48 }
0x1406   :  { %v3442_v37 = vmul.f32 %v5868_v41, %v3433_v35 }
0x1407   :  { %v3403_v23 = vsub.f32 1.5, %v3402_v50 }
0x1408   :  { %v3451_v42 = vadd.f32 %v5875_v62, %v3442_v37 }
0x1409   :  { %v3404_v26 = vmul.f32 %v4644_v19, %v3403_v23 }
0x140b   :  { %v3408_v10 = vsel %vm3407_vm8, %v4644_v19, %v3404_v26 }
0x140c   :  { %v3434_v27 = vmul.f32 %v3408_v10, %v3338_v9 }
0x140e   :  { %v3443_v31 = vmul.f32 %v5868_v41, %v3434_v27 }
0x1410   :  { %v3452_v13 = vadd.f32 %v5875_v62, %v3443_v31 }
0x1412   :  { %v3457_v15 = vpack.c.bf16 %v3452_v13, %v3451_v42 }
0x1414   :  { %4260 = vmatmul.msk.bf16.gmra.mxu2 %vm92_vm1, %v3457_v15 }
0x1422   :  { %v5972_v5 = vpop.f32.mrf.mxu3 }
0x142a   :  { %v3670_v14 = vpop.f32.mrf.mxu3 }
0x1432   :  { %v3672_v0 = vpop.f32.mrf.mxu3 }
0x143a   :  { %v3673_v39 = vpop.f32.mrf.mxu3 }
0x1467   :  { %v3257_v45 = vpop.xlane.xlu1 %3256 }
0x1468   :  { %v3267_v24 = vmul.f32 0.03125, %v3257_v45 }
0x1469   :  { %v3297_v52 = vpop.xlane.xlu0 %3296 }
0x146a   :  { %v3315_v7 = vmul.f32 %v3267_v24, %v3267_v24  ;;  %v3307_v36 = vmul.f32 0.03125, %v3297_v52  ;;  %v3339_v22 = vsub.f32 %v5949_v53, %v3267_v24 }
0x146c   :  { %v3323_v21 = vsub.f32 %v3307_v36, %v3315_v7 }
0x146e   :  { %v3331_v51 = vmax.f32 %v3323_v21, 0.0 }
0x146f   :  { %v3260_v57 = vpop.xlane.xlu2 %3259 }
0x1470   :  { %v3347_v32 = vadd.f32 1e-12, %v3331_v51  ;;  %v3268_v33 = vmul.f32 0.03125, %v3260_v57 }
0x1471   :  { %v3300_v54 = vpop.xlane.xlu1 %3299 }
0x1472   :  { %4645 = vrsqrt.f32 %v3347_v32  ;;  %v3316_v40 = vmul.f32 %v3268_v33, %v3268_v33  ;;  %v3308_v30 = vmul.f32 0.03125, %v3300_v54  ;;  %vm3415_vm10 = vweird.f32 %v3347_v32 }
0x1473   :  { %v3340_v46 = vsub.f32 %v5958_v63, %v3268_v33 }
0x1474   :  { %v3324_v38 = vsub.f32 %v3308_v30, %v3316_v40 }
0x1476   :  { %v3332_v55 = vmax.f32 %v3324_v38, 0.0 }
0x1478   :  { %v4646_v34 = vpop.eup %4645  ;;  %v3348_v44 = vadd.f32 1e-12, %v3332_v55 }
0x1479   :  { %v3410_v29 = vmul.f32 %v4646_v34, %v3347_v32  ;;  %vm3416_vm9 = vweird.f32 %v4646_v34 }
0x147a   :  { %4647 = vrsqrt.f32 %v3348_v44  ;;  %vm3417_vm11 = vmor %vm3415_vm10, %vm3416_vm9  ;;  %vm3425_vm13 = vweird.f32 %v3348_v44 }
0x147b   :  { %v3411_v58 = vmul.f32 %v4646_v34, %v3410_v29 }
0x147d   :  { %v3412_v12 = vmul.f32 0.5, %v3411_v58 }
0x147f   :  { %v3413_v61 = vsub.f32 1.5, %v3412_v12 }
0x1480   :  { %v4648_v47 = vpop.eup %4647 }
0x1481   :  { %v3414_v11 = vmul.f32 %v4646_v34, %v3413_v61  ;;  %v3420_v6 = vmul.f32 %v4648_v47, %v3348_v44  ;;  %vm3426_vm12 = vweird.f32 %v4648_v47 }
0x1482   :  { %vm3427_vm14 = vmor %vm3425_vm13, %vm3426_vm12 }
0x1483   :  { %v3421_v25 = vmul.f32 %v4648_v47, %v3420_v6  ;;  %v3418_v1 = vsel %vm3417_vm11, %v4646_v34, %v3414_v11 }
0x1484   :  { %v3435_v20 = vmul.f32 %v3418_v1, %v3339_v22 }
0x1485   :  { %v3422_v49 = vmul.f32 0.5, %v3421_v25 }
0x1486   :  { %v3444_v18 = vmul.f32 %v5868_v41, %v3435_v20 }
0x1487   :  { %v3423_v2 = vsub.f32 1.5, %v3422_v49  ;;  %v4429_v49 = vld [vmem:[%s6024_s8 + $0xe] ss:$0 sm:$0xff] }
0x1488   :  { %v3453_v56 = vadd.f32 %v5875_v62, %v3444_v18 }
0x1489   :  { %v3424_v8 = vmul.f32 %v4648_v47, %v3423_v2 }
0x148b   :  { %v3428_v28 = vsel %vm3427_vm14, %v4648_v47, %v3424_v8 }
0x148c   :  { %v3436_v3 = vmul.f32 %v3428_v28, %v3340_v46 }
0x148e   :  { %v3445_v19 = vmul.f32 %v5868_v41, %v3436_v3 }
0x1490   :  { %v3454_v4 = vadd.f32 %v5875_v62, %v3445_v19 }
0x1492   :  { %v3458_v48 = vpack.c.bf16 %v3454_v4, %v3453_v56 }
0x1494   :  { %4261 = vmatmul.msk.bf16.gmra.mxu2 %vm92_vm1, %v3458_v48  ;;  %v3725_v48 = vld [vmem:[%s6025_s9] sm:$0xff] }
0x1497   :  { %v3508_v53 = vpop.f32.mrf.mxu2 }
0x1498   :  { %v3509_v59 = vadd.f32 %v5928_v43, %v3508_v53 }
0x149a   :  { %v3522_v50 = vmul.f32 %v3509_v59, %v3509_v59 }
0x149c   :  { %v3530_v17 = vmul.f32 %v3522_v50, %v3509_v59 }
0x149e   :  { %v3538_v63 = vmul.f32 0.044715, %v3530_v17 }
0x149f   :  { %v3510_v23 = vpop.f32.mrf.mxu2 }
0x14a0   :  { %v3546_v35 = vadd.f32 %v3538_v63, %v3509_v59  ;;  %v3511_v26 = vadd.f32 %v5928_v43, %v3510_v23 }
0x14a2   :  { %v3554_v9 = vmul.f32 0.7978846, %v3546_v35  ;;  %v3523_v10 = vmul.f32 %v3511_v26, %v3511_v26 }
0x14a4   :  { %v3531_v41 = vmul.f32 %v3523_v10, %v3511_v26  ;;  %4649 = vtanh.f32 %v3554_v9 }
0x14a6   :  { %v3539_v27 = vmul.f32 0.044715, %v3531_v41 }
0x14a8   :  { %v3547_v37 = vadd.f32 %v3539_v27, %v3511_v26 }
0x14aa   :  { %v3555_v62 = vmul.f32 0.7978846, %v3547_v37  ;;  %v4650_v31 = vpop.eup %4649 }
0x14ab   :  { %v3570_v42 = vadd.f32 1.0, %v4650_v31 }
0x14ac   :  { %4651 = vtanh.f32 %v3555_v62 }
0x14ad   :  { %v3578_v14 = vmul.f32 0.5, %v3570_v42  ;;  %v4430_v42 = vld [vmem:[%s6026_s10] ss:$0 sm:$0xff] }
0x14af   :  { %v3586_v39 = vmul.f32 %v3578_v14, %v3509_v59 }
0x14b2   :  { %v4652_v13 = vpop.eup %4651 }
0x14b3   :  { %v3571_v15 = vadd.f32 1.0, %v4652_v13 }
0x14b5   :  { %v3579_v0 = vmul.f32 0.5, %v3571_v15  ;;  %v4431_v15 = vld [vmem:[%s6026_s10 + $0x1] ss:$0 sm:$0xff] }
0x14b7   :  { %v3587_v45 = vmul.f32 %v3579_v0, %v3511_v26 }
0x14b9   :  { %v3592_v24 = vpack.c.bf16 %v3587_v45, %v3586_v39  ;;  %v4432_v45 = vld [vmem:[%s6026_s10 + $0x2] ss:$0 sm:$0xff] }
0x14bb   :  { %3674 = vmatmul.bf16.gmra.mxu3 %v3592_v24 }
0x1517   :  { %v3513_v52 = vpop.f32.mrf.mxu2 }
0x1518   :  { %v3514_v7 = vadd.f32 %v5928_v43, %v3513_v52 }
0x151a   :  { %v3524_v36 = vmul.f32 %v3514_v7, %v3514_v7 }
0x151c   :  { %v3532_v21 = vmul.f32 %v3524_v36, %v3514_v7 }
0x151e   :  { %v3540_v51 = vmul.f32 0.044715, %v3532_v21 }
0x151f   :  { %v3515_v57 = vpop.f32.mrf.mxu2 }
0x1520   :  { %v3548_v32 = vadd.f32 %v3540_v51, %v3514_v7  ;;  %v3516_v33 = vadd.f32 %v5928_v43, %v3515_v57  ;;  %v3682_v43 = vadd.f32 %v5972_v5, %v5795_v60  ;;  %v3728_v60 = vld [vmem:[%s6025_s9 + $0x18] sm:$0xff]  ;;  %v3726_v5 = vld [vmem:[%s6025_s9 + $0x8] sm:$0xff] }
0x1521   :  { %3745 = vmatpush.msra.mxu0 %v3728_v60 }
0x1522   :  { %v3556_v40 = vmul.f32 0.7978846, %v3548_v32  ;;  %v3525_v54 = vmul.f32 %v3516_v33, %v3516_v33  ;;  %v3685_v20 = vadd.f32 %v4429_v49, %v3682_v43 }
0x1524   :  { %v3533_v30 = vmul.f32 %v3525_v54, %v3516_v33  ;;  %4653 = vtanh.f32 %v3556_v40 }
0x1526   :  { %v3541_v38 = vmul.f32 0.044715, %v3533_v30 }
0x1528   :  { %v3549_v55 = vadd.f32 %v3541_v38, %v3516_v33 }
0x152a   :  { %v3557_v34 = vmul.f32 0.7978846, %v3549_v55  ;;  %v4654_v29 = vpop.eup %4653 }
0x152b   :  { %v3572_v44 = vadd.f32 1.0, %v4654_v29 }
0x152c   :  { %4655 = vtanh.f32 %v3557_v34 }
0x152d   :  { %v3580_v61 = vmul.f32 0.5, %v3572_v44 }
0x152f   :  { %v3588_v11 = vmul.f32 %v3580_v61, %v3514_v7 }
0x1532   :  { %v4656_v58 = vpop.eup %4655 }
0x1533   :  { %v3573_v12 = vadd.f32 1.0, %v4656_v58 }
0x1535   :  { %v3581_v47 = vmul.f32 0.5, %v3573_v12 }
0x1537   :  { %v3589_v6 = vmul.f32 %v3581_v47, %v3516_v33 }
0x1539   :  { %v3593_v25 = vpack.c.bf16 %v3589_v6, %v3588_v11 }
0x153b   :  { %3678 = vmatmul.bf16.gmra.mxu3 %v3593_v25 }
0x153e   :  { %v3675_v1 = vpop.f32.mrf.mxu3 }
0x153f   :  { %v3683_v22 = vadd.f32 %v3675_v1, %v5911_v16  ;;  %v3727_v16 = vld [vmem:[%s6025_s9 + $0x10] sm:$0xff] }
0x1540   :  { %3746 = vmatpush.msra.mxu0 %v3727_v16 }
0x1541   :  { %v3686_v2 = vadd.f32 %v4429_v49, %v3683_v22 }
0x1542   :  { %3747 = vmatpush.msra.mxu0 %v3726_v5 }
0x1543   :  { %v3688_v8 = vrot.slane %v3686_v2, 7 }
0x1544   :  { %3748 = vmatpush.msra.mxu0 %v3725_v48 }
0x1545   :  { %v3691_v46 = vsel %vm3690_vm0, %v3685_v20, %v3688_v8 }
0x1546   :  { %v3677_v28 = vpop.f32.mrf.mxu3  ;;  %v3696_v3 = vsel %vm3695_vm2, %v3691_v46, 0.0  ;;  %v3700_v18 = vmul.f32 %v3691_v46, %v3691_v46 }
0x1547   :  { %3697 = vadd.xlane.f32.xlu2 %v3696_v3 }
0x1548   :  { %v3701_v19 = vsel %vm3695_vm2, %v3700_v18, 0.0 }
0x1549   :  { %3702 = vadd.xlane.f32.xlu0 %v3701_v19 }
0x15ba   :  { %v3698_v56 = vpop.xlane.xlu2 %3697 }
0x15bb   :  { %v3699_v4 = vmul.f32 0.03125, %v3698_v56 }
0x15bc   :  { %v3703_v53 = vpop.xlane.xlu0 %3702 }
0x15bd   :  { %v3705_v59 = vmul.f32 %v3699_v4, %v3699_v4  ;;  %v3704_v50 = vmul.f32 0.03125, %v3703_v53  ;;  %v3708_v31 = vsub.f32 %v3691_v46, %v3699_v4 }
0x15be   :  { %v3679_v17 = vpop.f32.mrf.mxu3 }
0x15bf   :  { %v3706_v63 = vsub.f32 %v3704_v50, %v3705_v59 }
0x15c1   :  { %v3707_v23 = vmax.f32 %v3706_v63, 0.0 }
0x15c3   :  { %v3709_v35 = vadd.f32 1e-12, %v3707_v23 }
0x15c5   :  { %4657 = vrsqrt.f32 %v3709_v35  ;;  %vm3716_vm15 = vweird.f32 %v3709_v35 }
0x15c6   :  { %v3680_v26 = vpop.f32.mrf.mxu3 }
0x15cb   :  { %v4658_v9 = vpop.eup %4657 }
0x15cc   :  { %v3711_v10 = vmul.f32 %v4658_v9, %v3709_v35  ;;  %vm3717_vm3 = vweird.f32 %v4658_v9 }
0x15cd   :  { %vm3718_vm4 = vmor %vm3716_vm15, %vm3717_vm3 }
0x15ce   :  { %v3712_v41 = vmul.f32 %v4658_v9, %v3711_v10 }
0x15d0   :  { %v3713_v27 = vmul.f32 0.5, %v3712_v41 }
0x15d2   :  { %v3714_v37 = vsub.f32 1.5, %v3713_v27 }
0x15d4   :  { %v3715_v62 = vmul.f32 %v4658_v9, %v3714_v37 }
0x15d6   :  { %v3719_v13 = vsel %vm3718_vm4, %v4658_v9, %v3715_v62 }
0x15d7   :  { %v3720_v14 = vmul.f32 %v3719_v13, %v3708_v31 }
0x15d9   :  { %v3722_v0 = vmul.f32 %v4430_v42, %v3720_v14 }
0x15db   :  { %v3724_v39 = vadd.f32 %v4431_v15, %v3722_v0 }
0x15dd   :  { %4310 = vmatmul.msk.f32.vlgmr.msra.gmra.mxu0 %vm92_vm1, %v3724_v39 }
0x165a   :  { %v3750_v24 = vpop.f32.mrf.mxu0 }
0x165b   :  { %v3751_v52 = vadd.f32 %v4432_v45, %v3750_v24 }
0x165d   :  { %3754 = vst.msk [vmem:[#allocation3] sm:$0x3] %vm3753_vm5, %v3751_v52 }
0x165e   :  { %3765 = dma.vmem_to_hbm [thread:$0]  %s3761_s18, 32, %s3763_s20, [#allocation4]  }
0x165f   :  { %4686 = dma.done.wait [#allocation4], 32  }
0x1660   :  { %4687 = vsyncadd [#allocation4], 4294967264 }
0x1661   :  { %3770 = vsyncpa [#allocation4], 1 }

</bundles_post_ra>
